<compile_context>
chip_gen: v7x
topology: tpu7x:2x2x1
jax: 0.10.0
libtpu: 0.0.40
codegen_flags: <defaults>
</compile_context>

<pallas_src>
import jax
import jax.numpy as jnp
from jax.experimental import pallas as pl
from jax.experimental.pallas import tpu as pltpu

# Scaled-down synthetic config (real ESM2-t36: D=2560, H=40, HD=64, F=10240, 36 layers).
D = 256            # hidden size
H = 4              # attention heads
HD = D // H        # head dim (64, same as real ESM2-t36)
F = 4 * D          # FFN dim
NUM_LAYERS = 2
NUM_LABELS = 2
LABEL_PAD = 128    # classifier output padded to a full lane width
L_TOK = 16         # sequence length incl. BOS/EOS
VOCAB = 33         # ESM2 alphabet size
EPS = 1e-5


def _layer_norm(x, gamma, beta):
    # f32 statistics (portable: v5e has no bf16 VPU/EUP)
    mu = jnp.mean(x, axis=-1, keepdims=True)
    xc = x - mu
    var = jnp.mean(xc * xc, axis=-1, keepdims=True)
    return xc * jax.lax.rsqrt(var + EPS) * gamma + beta


# --------------------- fused encoder-stack + classifier kernel ---------------------
def _make_stack_kernel(batch, seq):
    """batch/seq are static Python ints; the tiny attention loops unroll at trace time."""

    def kernel(x_ref, wqkv_ref, wo_ref, w1_ref, w2_ref, vecs_ref, head_ref, wc_ref,
               out_ref, x_scratch, ctx_scratch):
        layer = pl.program_id(0)
        n_layers = pl.num_programs(0)

        @pl.when(layer == 0)
        def _():
            x_scratch[...] = x_ref[...]          # load token embeddings once

        x = x_scratch[...]                       # (B*L, D) f32, resident in VMEM

        vecs = vecs_ref[0]                       # (4, F) packed per-layer vectors
        ln1_g, ln1_b = vecs[0:1, 0:D], vecs[0:1, D:2 * D]
        ln2_g, ln2_b = vecs[0:1, 2 * D:3 * D], vecs[0:1, 3 * D:4 * D]
        bq, bk = vecs[1:2, 0:D], vecs[1:2, D:2 * D]
        bv, bo = vecs[1:2, 2 * D:3 * D], vecs[1:2, 3 * D:4 * D]
        b1 = vecs[2:3, :]                        # (1, F)
        b2 = vecs[3:4, 0:D]                      # (1, D)

        # ---------------- self-attention (pre-LN) --------------------------------
        # One fused QKV matmul over the whole (B*L) row slab; [Q|K|V] lane blocks.
        h = _layer_norm(x, ln1_g, ln1_b)
        qkv = jnp.dot(h.astype(jnp.bfloat16), wqkv_ref[0],
                      preferred_element_type=jnp.float32)            # (B*L, 3D)
        q = (qkv[:, 0:D] + bq).astype(jnp.bfloat16)   # 1/sqrt(HD) folded into Wq/bq
        k = (qkv[:, D:2 * D] + bk).astype(jnp.bfloat16)
        v = (qkv[:, 2 * D:3 * D] + bv).astype(jnp.bfloat16)

        # Per-(sequence, head) scores / softmax / ctx — trace-time unrolled; tiny
        # at L=16.  Context heads are written straight into a VMEM scratch slab so
        # the output projection below sees a single lane-dense (B*L, D) operand.
        # TODO(synk): real sequence lengths need flash-style KV tiling here.
        # TODO(synk): rotary embeddings on q/k and padding masks are omitted.
        for b in range(batch):
            r0 = b * seq
            for hh in range(H):
                c0 = hh * HD
                qbh = q[r0:r0 + seq, c0:c0 + HD]
                kbh = k[r0:r0 + seq, c0:c0 + HD]
                vbh = v[r0:r0 + seq, c0:c0 + HD]
                s = jax.lax.dot_general(qbh, kbh, (((1,), (1,)), ((), ())),
                                        preferred_element_type=jnp.float32)  # (L, L)
                s = s - jnp.max(s, axis=-1, keepdims=True)
                p = jnp.exp(s)
                p = p * pl.reciprocal(jnp.sum(p, axis=-1, keepdims=True), approx=True)
                ctx_scratch[r0:r0 + seq, c0:c0 + HD] = jnp.dot(
                    p.astype(jnp.bfloat16), vbh, preferred_element_type=jnp.float32)

        # Fused output projection over all heads: K = D (full MXU depth), no head-sum.
        attn = jnp.dot(ctx_scratch[...].astype(jnp.bfloat16), wo_ref[0],
                       preferred_element_type=jnp.float32) + bo
        x = x + attn

        # ---------------------------- feed-forward (pre-LN) -----------------------
        h2 = _layer_norm(x, ln2_g, ln2_b)
        f = jnp.dot(h2.astype(jnp.bfloat16), w1_ref[0],
                    preferred_element_type=jnp.float32) + b1
        f = jax.nn.gelu(f, approximate=True)   # TODO(synk): ESM2 uses exact erf GELU
        f = jnp.dot(f.astype(jnp.bfloat16), w2_ref[0],
                    preferred_element_type=jnp.float32) + b2
        x = x + f

        x_scratch[...] = x

        # ------------- final LN + classifier head, fused into the last layer ------
        @pl.when(layer == n_layers - 1)
        def _():
            hv = head_ref[...]                                  # (4, D)
            hf = _layer_norm(x, hv[0:1, :], hv[1:2, :])         # emb_layer_norm_after
            bc = hv[2:3, 0:LABEL_PAD]
            out_ref[...] = (jnp.dot(hf.astype(jnp.bfloat16), wc_ref[...],
                                    preferred_element_type=jnp.float32)
                            + bc)                               # lane-dense (B*L, 128)

    return kernel


def run_esm_stack(x_flat, wqkv, wo, w1, w2, vecs, head, wc, *, batch, seq):
    rows = batch * seq
    nl = wqkv.shape[0]
    kernel = _make_stack_kernel(batch, seq)

    in_specs = [
        pl.BlockSpec((rows, D), lambda l: (0, 0)),              # x (whole row slab)
        pl.BlockSpec((1, D, 3 * D), lambda l: (l, 0, 0)),       # wqkv (bf16, [Q|K|V])
        pl.BlockSpec((1, D, D), lambda l: (l, 0, 0)),           # wo   (bf16)
        pl.BlockSpec((1, D, F), lambda l: (l, 0, 0)),           # w1   (bf16)
        pl.BlockSpec((1, F, D), lambda l: (l, 0, 0)),           # w2   (bf16)
        pl.BlockSpec((1, 4, F), lambda l: (l, 0, 0)),           # packed layer vectors
        pl.BlockSpec((4, D), lambda l: (0, 0)),                 # final LN + class. bias
        pl.BlockSpec((D, LABEL_PAD), lambda l: (0, 0)),         # classifier W (bf16)
    ]
    out_spec = pl.BlockSpec((rows, LABEL_PAD), lambda l: (0, 0))

    return pl.pallas_call(
        kernel,
        out_shape=jax.ShapeDtypeStruct((rows, LABEL_PAD), jnp.float32),
        grid_spec=pltpu.PrefetchScalarGridSpec(
            num_scalar_prefetch=0,
            grid=(nl,),                      # weight-stationary: layers streamed once
            in_specs=in_specs,
            out_specs=out_spec,
            scratch_shapes=[pltpu.VMEM((rows, D), jnp.float32),   # resident activation
                            pltpu.VMEM((rows, D), jnp.float32)]), # attention context
        compiler_params=pltpu.CompilerParams(
            dimension_semantics=("arbitrary",),
            # safe on all generations; re-derive for real-size tiles (v7x: 64 MiB phys)
            vmem_limit_bytes=32 * 1024 * 1024),
    )(x_flat, wqkv, wo, w1, w2, vecs, head, wc)


# --------------------------------- parameter setup --------------------------------
def init_params(key):
    scale = 1.0 / float(HD) ** 0.5

    def dense(k, shape):
        return jax.random.normal(k, shape, jnp.float32) * 0.02

    wqkv_l, wo_l, w1_l, w2_l, vecs_l = [], [], [], [], []
    ones_d = jnp.ones((D,), jnp.float32)
    zeros_d = jnp.zeros((D,), jnp.float32)
    for _ in range(NUM_LAYERS):
        key, kq, kk, kv, ko, k1, k2, kb = jax.random.split(key, 8)
        # 1/sqrt(HD) folded into Wq and bq (free: trace-time constant fold)
        wq = dense(kq, (D, D)) * scale
        wk = dense(kk, (D, D))
        wv = dense(kv, (D, D))
        bias = jax.random.normal(kb, (6, F), jnp.float32) * 0.02
        bq = bias[0, :D] * scale
        bk = bias[1, :D]
        bv = bias[2, :D]
        bo = bias[3, :D]
        b1 = bias[4, :]
        b2 = bias[5, :D]

        wqkv_l.append(jnp.concatenate([wq, wk, wv], axis=1))      # (D, 3D) [Q|K|V]
        wo_l.append(dense(ko, (D, D)))                            # (D, D) fused proj
        w1_l.append(dense(k1, (D, F)))
        w2_l.append(dense(k2, (F, D)))
        vecs_l.append(jnp.stack([
            jnp.concatenate([ones_d, zeros_d, ones_d, zeros_d]),  # ln1 g/b, ln2 g/b
            jnp.concatenate([bq, bk, bv, bo]),                    # qkv + out-proj bias
            b1,                                                   # FFN bias 1
            jnp.concatenate([b2, jnp.zeros((F - D,), jnp.float32)]),  # FFN bias 2
        ]))                                                       # (4, F)

    key, kc, kcb = jax.random.split(key, 3)
    wc = dense(kc, (D, NUM_LABELS))
    bc = dense(kcb, (NUM_LABELS,))
    wc_pad = jnp.zeros((D, LABEL_PAD), jnp.float32).at[:, :NUM_LABELS].set(wc)
    bc_row = jnp.zeros((D,), jnp.float32).at[:NUM_LABELS].set(bc)
    head = jnp.stack([ones_d, zeros_d, bc_row, zeros_d])          # (4, D)

    return (
        jnp.stack(wqkv_l).astype(jnp.bfloat16),   # (NL, D, 3D)
        jnp.stack(wo_l).astype(jnp.bfloat16),     # (NL, D, D)
        jnp.stack(w1_l).astype(jnp.bfloat16),     # (NL, D, F)
        jnp.stack(w2_l).astype(jnp.bfloat16),     # (NL, F, D)
        jnp.stack(vecs_l),                        # (NL, 4, F) f32
        head,                                     # (4, D) f32
        wc_pad.astype(jnp.bfloat16),              # (D, 128) bf16
    )


@jax.jit
def esm2t36_forward(token_ids, embed_table, params):
    wqkv, wo, w1, w2, vecs, head, wc = params
    B, L = token_ids.shape
    # glue: embedding lookup (ESM2 embed_scale == 1)
    x = jnp.take(embed_table, token_ids, axis=0).astype(jnp.float32)   # (B, L, D)
    x_flat = x.reshape(B * L, D)                                        # row slab
    out = run_esm_stack(x_flat, wqkv, wo, w1, w2, vecs, head, wc,
                        batch=B, seq=L)                                 # (B*L, 128)
    # outputs[:, 1:-1, :] + un-pad the lane-dense classifier output (layout plumbing)
    return out.reshape(B, L, LABEL_PAD)[:, 1:-1, :NUM_LABELS]


if __name__ == "__main__":
    key = jax.random.PRNGKey(0)
    k_tok, k_emb, k_params = jax.random.split(key, 3)

    B = 2
    token_ids = jax.random.randint(k_tok, (B, L_TOK), 0, VOCAB, dtype=jnp.int32)
    embed_table = jax.random.normal(k_emb, (VOCAB, D), jnp.float32) * 0.02
    params = init_params(k_params)

    logits = esm2t36_forward(token_ids, embed_table, params)
    jax.block_until_ready(logits)
    assert logits.shape == (B, L_TOK - 2, NUM_LABELS), logits.shape
    assert logits.dtype == jnp.float32
    print("KERNEL_OK")
</pallas_src>

<mosaic_0001>
module attributes {stable_mosaic.version = 11 : i64} {
  func.func @kernel(%arg0: i32, %arg1: memref<32x256xf32, #tpu.memory_space<vmem>>, %arg2: memref<1x256x768xbf16, #tpu.memory_space<vmem>>, %arg3: memref<1x256x256xbf16, #tpu.memory_space<vmem>>, %arg4: memref<1x256x1024xbf16, #tpu.memory_space<vmem>>, %arg5: memref<1x1024x256xbf16, #tpu.memory_space<vmem>>, %arg6: memref<1x4x1024xf32, #tpu.memory_space<vmem>>, %arg7: memref<4x256xf32, #tpu.memory_space<vmem>>, %arg8: memref<256x128xbf16, #tpu.memory_space<vmem>>, %arg9: memref<32x128xf32, #tpu.memory_space<vmem>>, %arg10: memref<32x256xf32, #tpu.memory_space<vmem>>, %arg11: memref<32x256xf32, #tpu.memory_space<vmem>>) attributes {dimension_semantics = [#tpu.dimension_semantics<arbitrary>], iteration_bounds = array<i64: 2>, scalar_prefetch = 0 : i64, scratch_operands = 2 : i64, tpu.core_type = #tpu.core_type<tc>, window_params = [{pipeline_mode = #tpu.pipeline_mode<synchronous>, transform_indices = @transform_0, window_bounds = array<i64: 32, 256>}, {transform_indices = @transform_1, window_bounds = array<i64: 1, 256, 768>}, {transform_indices = @transform_2, window_bounds = array<i64: 1, 256, 256>}, {transform_indices = @transform_3, window_bounds = array<i64: 1, 256, 1024>}, {transform_indices = @transform_4, window_bounds = array<i64: 1, 1024, 256>}, {transform_indices = @transform_5, window_bounds = array<i64: 1, 4, 1024>}, {pipeline_mode = #tpu.pipeline_mode<synchronous>, transform_indices = @transform_6, window_bounds = array<i64: 4, 256>}, {pipeline_mode = #tpu.pipeline_mode<synchronous>, transform_indices = @transform_7, window_bounds = array<i64: 256, 128>}, {pipeline_mode = #tpu.pipeline_mode<synchronous>, transform_indices = @transform_8, window_bounds = array<i64: 32, 128>}]} {
    %c0_i32 = arith.constant 0 : i32
    %0 = arith.cmpi eq, %arg0, %c0_i32 : i32
    %1 = arith.extui %0 : i1 to i32
    %c0_i32_0 = arith.constant 0 : i32
    %2 = arith.cmpi ne, %1, %c0_i32_0 : i32
    scf.if %2 {
      %c0_83 = arith.constant 0 : index
      %c0_84 = arith.constant 0 : index
      %246 = vector.load %arg1[%c0_83, %c0_84] : memref<32x256xf32, #tpu.memory_space<vmem>>, vector<32x256xf32>
      %c0_85 = arith.constant 0 : index
      %c0_86 = arith.constant 0 : index
      %247 = vector.load %arg10[%c0_85, %c0_86] : memref<32x256xf32, #tpu.memory_space<vmem>>, vector<32x256xf32>
      tpu.vector_store %arg10[%c0_85, %c0_86], %246 {strides = array<i32>} : memref<32x256xf32, #tpu.memory_space<vmem>>, vector<32x256xf32>,
    } else {
    }
    %c0 = arith.constant 0 : index
    %c0_1 = arith.constant 0 : index
    %3 = vector.load %arg10[%c0, %c0_1] : memref<32x256xf32, #tpu.memory_space<vmem>>, vector<32x256xf32>
    %c0_2 = arith.constant 0 : index
    %c0_3 = arith.constant 0 : index
    %c0_4 = arith.constant 0 : index
    %4 = vector.load %arg6[%c0_2, %c0_3, %c0_4] : memref<1x4x1024xf32, #tpu.memory_space<vmem>>, vector<1x4x1024xf32>
    %5 = vector.shape_cast %4 : vector<1x4x1024xf32> to vector<4x1024xf32>
    %6 = vector.extract_strided_slice %5 {offsets = [0, 0], sizes = [1, 256], strides = [1, 1]} : vector<4x1024xf32> to vector<1x256xf32>
    %7 = vector.extract_strided_slice %5 {offsets = [0, 256], sizes = [1, 256], strides = [1, 1]} : vector<4x1024xf32> to vector<1x256xf32>
    %8 = vector.extract_strided_slice %5 {offsets = [0, 512], sizes = [1, 256], strides = [1, 1]} : vector<4x1024xf32> to vector<1x256xf32>
    %9 = vector.extract_strided_slice %5 {offsets = [0, 768], sizes = [1, 256], strides = [1, 1]} : vector<4x1024xf32> to vector<1x256xf32>
    %10 = vector.extract_strided_slice %5 {offsets = [1, 0], sizes = [1, 256], strides = [1, 1]} : vector<4x1024xf32> to vector<1x256xf32>
    %11 = vector.extract_strided_slice %5 {offsets = [1, 256], sizes = [1, 256], strides = [1, 1]} : vector<4x1024xf32> to vector<1x256xf32>
    %12 = vector.extract_strided_slice %5 {offsets = [1, 512], sizes = [1, 256], strides = [1, 1]} : vector<4x1024xf32> to vector<1x256xf32>
    %13 = vector.extract_strided_slice %5 {offsets = [1, 768], sizes = [1, 256], strides = [1, 1]} : vector<4x1024xf32> to vector<1x256xf32>
    %14 = vector.extract_strided_slice %5 {offsets = [2, 0], sizes = [1, 1024], strides = [1, 1]} : vector<4x1024xf32> to vector<1x1024xf32>
    %15 = vector.extract_strided_slice %5 {offsets = [3, 0], sizes = [1, 256], strides = [1, 1]} : vector<4x1024xf32> to vector<1x256xf32>
    %cst = arith.constant dense<0.000000e+00> : vector<32xf32>
    %16 = vector.multi_reduction <add>, %3, %cst [1] : vector<32x256xf32> to vector<32xf32>
    %17 = vector.shape_cast %16 : vector<32xf32> to vector<32x1xf32>
    %cst_5 = arith.constant 2.560000e+02 : f32
    %18 = vector.broadcast %cst_5 : f32 to vector<32x1xf32>
    %19 = arith.divf %17, %18 : vector<32x1xf32>
    %20 = vector.broadcast %19 : vector<32x1xf32> to vector<32x256xf32>
    %21 = arith.subf %3, %20 : vector<32x256xf32>
    %22 = arith.mulf %21, %21 : vector<32x256xf32>
    %cst_6 = arith.constant dense<0.000000e+00> : vector<32xf32>
    %23 = vector.multi_reduction <add>, %22, %cst_6 [1] : vector<32x256xf32> to vector<32xf32>
    %24 = vector.shape_cast %23 : vector<32xf32> to vector<32x1xf32>
    %cst_7 = arith.constant 2.560000e+02 : f32
    %25 = vector.broadcast %cst_7 : f32 to vector<32x1xf32>
    %26 = arith.divf %24, %25 : vector<32x1xf32>
    %cst_8 = arith.constant 9.99999974E-6 : f32
    %27 = vector.broadcast %cst_8 : f32 to vector<32x1xf32>
    %28 = arith.addf %26, %27 : vector<32x1xf32>
    %29 = math.rsqrt %28 : vector<32x1xf32>
    %30 = vector.broadcast %29 : vector<32x1xf32> to vector<32x256xf32>
    %31 = arith.mulf %21, %30 : vector<32x256xf32>
    %32 = vector.broadcast %6 : vector<1x256xf32> to vector<32x256xf32>
    %33 = arith.mulf %31, %32 : vector<32x256xf32>
    %34 = vector.broadcast %7 : vector<1x256xf32> to vector<32x256xf32>
    %35 = arith.addf %33, %34 : vector<32x256xf32>
    %36 = arith.truncf %35 : vector<32x256xf32> to vector<32x256xbf16>
    %c0_9 = arith.constant 0 : index
    %c0_10 = arith.constant 0 : index
    %c0_11 = arith.constant 0 : index
    %37 = vector.load %arg2[%c0_9, %c0_10, %c0_11] : memref<1x256x768xbf16, #tpu.memory_space<vmem>>, vector<1x256x768xbf16>
    %38 = vector.shape_cast %37 : vector<1x256x768xbf16> to vector<256x768xbf16>
    %cst_12 = arith.constant dense<0.000000e+00> : vector<32x768xf32>
    %39 = tpu.matmul %36, %38, %cst_12 {dimension_numbers = #tpu.dot_dimension_numbers<[1], [0], [0], [1], [0, 0, 1, 1], [], []>} : vector<32x256xbf16>, vector<256x768xbf16>, vector<32x768xf32> -> vector<32x768xf32>
    %40 = vector.extract_strided_slice %39 {offsets = [0, 0], sizes = [32, 256], strides = [1, 1]} : vector<32x768xf32> to vector<32x256xf32>
    %41 = vector.broadcast %10 : vector<1x256xf32> to vector<32x256xf32>
    %42 = arith.addf %40, %41 : vector<32x256xf32>
    %43 = arith.truncf %42 : vector<32x256xf32> to vector<32x256xbf16>
    %44 = vector.extract_strided_slice %39 {offsets = [0, 256], sizes = [32, 256], strides = [1, 1]} : vector<32x768xf32> to vector<32x256xf32>
    %45 = vector.broadcast %11 : vector<1x256xf32> to vector<32x256xf32>
    %46 = arith.addf %44, %45 : vector<32x256xf32>
    %47 = arith.truncf %46 : vector<32x256xf32> to vector<32x256xbf16>
    %48 = vector.extract_strided_slice %39 {offsets = [0, 512], sizes = [32, 256], strides = [1, 1]} : vector<32x768xf32> to vector<32x256xf32>
    %49 = vector.broadcast %12 : vector<1x256xf32> to vector<32x256xf32>
    %50 = arith.addf %48, %49 : vector<32x256xf32>
    %51 = arith.truncf %50 : vector<32x256xf32> to vector<32x256xbf16>
    %52 = vector.extract_strided_slice %43 {offsets = [0, 0], sizes = [16, 64], strides = [1, 1]} : vector<32x256xbf16> to vector<16x64xbf16>
    %53 = vector.extract_strided_slice %47 {offsets = [0, 0], sizes = [16, 64], strides = [1, 1]} : vector<32x256xbf16> to vector<16x64xbf16>
    %54 = vector.extract_strided_slice %51 {offsets = [0, 0], sizes = [16, 64], strides = [1, 1]} : vector<32x256xbf16> to vector<16x64xbf16>
    %cst_13 = arith.constant dense<0.000000e+00> : vector<16x16xf32>
    %55 = tpu.matmul %52, %53, %cst_13 {dimension_numbers = #tpu.dot_dimension_numbers<[1], [1], [0], [0], [0, 0, 1, 0], [], []>} : vector<16x64xbf16>, vector<16x64xbf16>, vector<16x16xf32> -> vector<16x16xf32>
    %cst_14 = arith.constant dense<0xFF800000> : vector<16xf32>
    %56 = vector.multi_reduction <maximumf>, %55, %cst_14 [1] : vector<16x16xf32> to vector<16xf32>
    %57 = vector.shape_cast %56 : vector<16xf32> to vector<16x1xf32>
    %58 = vector.broadcast %57 : vector<16x1xf32> to vector<16x16xf32>
    %59 = arith.subf %55, %58 : vector<16x16xf32>
    %60 = math.exp %59 : vector<16x16xf32>
    %cst_15 = arith.constant dense<0.000000e+00> : vector<16xf32>
    %61 = vector.multi_reduction <add>, %60, %cst_15 [1] : vector<16x16xf32> to vector<16xf32>
    %62 = vector.shape_cast %61 : vector<16xf32> to vector<16x1xf32>
    %63 = tpu.reciprocal %62 {approx = true} : vector<16x1xf32> -> vector<16x1xf32>
    %64 = vector.broadcast %63 : vector<16x1xf32> to vector<16x16xf32>
    %65 = arith.mulf %60, %64 : vector<16x16xf32>
    %66 = arith.truncf %65 : vector<16x16xf32> to vector<16x16xbf16>
    %cst_16 = arith.constant dense<0.000000e+00> : vector<16x64xf32>
    %67 = tpu.matmul %66, %54, %cst_16 {dimension_numbers = #tpu.dot_dimension_numbers<[1], [0], [0], [1], [0, 0, 1, 1], [], []>} : vector<16x16xbf16>, vector<16x64xbf16>, vector<16x64xf32> -> vector<16x64xf32>
    %c0_17 = arith.constant 0 : index
    %c0_18 = arith.constant 0 : index
    %68 = vector.load %arg11[%c0_17, %c0_18] : memref<32x256xf32, #tpu.memory_space<vmem>>, vector<16x64xf32>
    tpu.vector_store %arg11[%c0_17, %c0_18], %67 {strides = array<i32>} : memref<32x256xf32, #tpu.memory_space<vmem>>, vector<16x64xf32>,
    %69 = vector.extract_strided_slice %43 {offsets = [0, 64], sizes = [16, 64], strides = [1, 1]} : vector<32x256xbf16> to vector<16x64xbf16>
    %70 = vector.extract_strided_slice %47 {offsets = [0, 64], sizes = [16, 64], strides = [1, 1]} : vector<32x256xbf16> to vector<16x64xbf16>
    %71 = vector.extract_strided_slice %51 {offsets = [0, 64], sizes = [16, 64], strides = [1, 1]} : vector<32x256xbf16> to vector<16x64xbf16>
    %cst_19 = arith.constant dense<0.000000e+00> : vector<16x16xf32>
    %72 = tpu.matmul %69, %70, %cst_19 {dimension_numbers = #tpu.dot_dimension_numbers<[1], [1], [0], [0], [0, 0, 1, 0], [], []>} : vector<16x64xbf16>, vector<16x64xbf16>, vector<16x16xf32> -> vector<16x16xf32>
    %cst_20 = arith.constant dense<0xFF800000> : vector<16xf32>
    %73 = vector.multi_reduction <maximumf>, %72, %cst_20 [1] : vector<16x16xf32> to vector<16xf32>
    %74 = vector.shape_cast %73 : vector<16xf32> to vector<16x1xf32>
    %75 = vector.broadcast %74 : vector<16x1xf32> to vector<16x16xf32>
    %76 = arith.subf %72, %75 : vector<16x16xf32>
    %77 = math.exp %76 : vector<16x16xf32>
    %cst_21 = arith.constant dense<0.000000e+00> : vector<16xf32>
    %78 = vector.multi_reduction <add>, %77, %cst_21 [1] : vector<16x16xf32> to vector<16xf32>
    %79 = vector.shape_cast %78 : vector<16xf32> to vector<16x1xf32>
    %80 = tpu.reciprocal %79 {approx = true} : vector<16x1xf32> -> vector<16x1xf32>
    %81 = vector.broadcast %80 : vector<16x1xf32> to vector<16x16xf32>
    %82 = arith.mulf %77, %81 : vector<16x16xf32>
    %83 = arith.truncf %82 : vector<16x16xf32> to vector<16x16xbf16>
    %cst_22 = arith.constant dense<0.000000e+00> : vector<16x64xf32>
    %84 = tpu.matmul %83, %71, %cst_22 {dimension_numbers = #tpu.dot_dimension_numbers<[1], [0], [0], [1], [0, 0, 1, 1], [], []>} : vector<16x16xbf16>, vector<16x64xbf16>, vector<16x64xf32> -> vector<16x64xf32>
    %c0_23 = arith.constant 0 : index
    %c64 = arith.constant 64 : index
    %85 = vector.load %arg11[%c0_23, %c64] : memref<32x256xf32, #tpu.memory_space<vmem>>, vector<16x64xf32>
    tpu.vector_store %arg11[%c0_23, %c64], %84 {strides = array<i32>} : memref<32x256xf32, #tpu.memory_space<vmem>>, vector<16x64xf32>,
    %86 = vector.extract_strided_slice %43 {offsets = [0, 128], sizes = [16, 64], strides = [1, 1]} : vector<32x256xbf16> to vector<16x64xbf16>
    %87 = vector.extract_strided_slice %47 {offsets = [0, 128], sizes = [16, 64], strides = [1, 1]} : vector<32x256xbf16> to vector<16x64xbf16>
    %88 = vector.extract_strided_slice %51 {offsets = [0, 128], sizes = [16, 64], strides = [1, 1]} : vector<32x256xbf16> to vector<16x64xbf16>
    %cst_24 = arith.constant dense<0.000000e+00> : vector<16x16xf32>
    %89 = tpu.matmul %86, %87, %cst_24 {dimension_numbers = #tpu.dot_dimension_numbers<[1], [1], [0], [0], [0, 0, 1, 0], [], []>} : vector<16x64xbf16>, vector<16x64xbf16>, vector<16x16xf32> -> vector<16x16xf32>
    %cst_25 = arith.constant dense<0xFF800000> : vector<16xf32>
    %90 = vector.multi_reduction <maximumf>, %89, %cst_25 [1] : vector<16x16xf32> to vector<16xf32>
    %91 = vector.shape_cast %90 : vector<16xf32> to vector<16x1xf32>
    %92 = vector.broadcast %91 : vector<16x1xf32> to vector<16x16xf32>
    %93 = arith.subf %89, %92 : vector<16x16xf32>
    %94 = math.exp %93 : vector<16x16xf32>
    %cst_26 = arith.constant dense<0.000000e+00> : vector<16xf32>
    %95 = vector.multi_reduction <add>, %94, %cst_26 [1] : vector<16x16xf32> to vector<16xf32>
    %96 = vector.shape_cast %95 : vector<16xf32> to vector<16x1xf32>
    %97 = tpu.reciprocal %96 {approx = true} : vector<16x1xf32> -> vector<16x1xf32>
    %98 = vector.broadcast %97 : vector<16x1xf32> to vector<16x16xf32>
    %99 = arith.mulf %94, %98 : vector<16x16xf32>
    %100 = arith.truncf %99 : vector<16x16xf32> to vector<16x16xbf16>
    %cst_27 = arith.constant dense<0.000000e+00> : vector<16x64xf32>
    %101 = tpu.matmul %100, %88, %cst_27 {dimension_numbers = #tpu.dot_dimension_numbers<[1], [0], [0], [1], [0, 0, 1, 1], [], []>} : vector<16x16xbf16>, vector<16x64xbf16>, vector<16x64xf32> -> vector<16x64xf32>
    %c0_28 = arith.constant 0 : index
    %c128 = arith.constant 128 : index
    %102 = vector.load %arg11[%c0_28, %c128] : memref<32x256xf32, #tpu.memory_space<vmem>>, vector<16x64xf32>
    tpu.vector_store %arg11[%c0_28, %c128], %101 {strides = array<i32>} : memref<32x256xf32, #tpu.memory_space<vmem>>, vector<16x64xf32>,
    %103 = vector.extract_strided_slice %43 {offsets = [0, 192], sizes = [16, 64], strides = [1, 1]} : vector<32x256xbf16> to vector<16x64xbf16>
    %104 = vector.extract_strided_slice %47 {offsets = [0, 192], sizes = [16, 64], strides = [1, 1]} : vector<32x256xbf16> to vector<16x64xbf16>
    %105 = vector.extract_strided_slice %51 {offsets = [0, 192], sizes = [16, 64], strides = [1, 1]} : vector<32x256xbf16> to vector<16x64xbf16>
    %cst_29 = arith.constant dense<0.000000e+00> : vector<16x16xf32>
    %106 = tpu.matmul %103, %104, %cst_29 {dimension_numbers = #tpu.dot_dimension_numbers<[1], [1], [0], [0], [0, 0, 1, 0], [], []>} : vector<16x64xbf16>, vector<16x64xbf16>, vector<16x16xf32> -> vector<16x16xf32>
    %cst_30 = arith.constant dense<0xFF800000> : vector<16xf32>
    %107 = vector.multi_reduction <maximumf>, %106, %cst_30 [1] : vector<16x16xf32> to vector<16xf32>
    %108 = vector.shape_cast %107 : vector<16xf32> to vector<16x1xf32>
    %109 = vector.broadcast %108 : vector<16x1xf32> to vector<16x16xf32>
    %110 = arith.subf %106, %109 : vector<16x16xf32>
    %111 = math.exp %110 : vector<16x16xf32>
    %cst_31 = arith.constant dense<0.000000e+00> : vector<16xf32>
    %112 = vector.multi_reduction <add>, %111, %cst_31 [1] : vector<16x16xf32> to vector<16xf32>
    %113 = vector.shape_cast %112 : vector<16xf32> to vector<16x1xf32>
    %114 = tpu.reciprocal %113 {approx = true} : vector<16x1xf32> -> vector<16x1xf32>
    %115 = vector.broadcast %114 : vector<16x1xf32> to vector<16x16xf32>
    %116 = arith.mulf %111, %115 : vector<16x16xf32>
    %117 = arith.truncf %116 : vector<16x16xf32> to vector<16x16xbf16>
    %cst_32 = arith.constant dense<0.000000e+00> : vector<16x64xf32>
    %118 = tpu.matmul %117, %105, %cst_32 {dimension_numbers = #tpu.dot_dimension_numbers<[1], [0], [0], [1], [0, 0, 1, 1], [], []>} : vector<16x16xbf16>, vector<16x64xbf16>, vector<16x64xf32> -> vector<16x64xf32>
    %c0_33 = arith.constant 0 : index
    %c192 = arith.constant 192 : index
    %119 = vector.load %arg11[%c0_33, %c192] : memref<32x256xf32, #tpu.memory_space<vmem>>, vector<16x64xf32>
    tpu.vector_store %arg11[%c0_33, %c192], %118 {strides = array<i32>} : memref<32x256xf32, #tpu.memory_space<vmem>>, vector<16x64xf32>,
    %120 = vector.extract_strided_slice %43 {offsets = [16, 0], sizes = [16, 64], strides = [1, 1]} : vector<32x256xbf16> to vector<16x64xbf16>
    %121 = vector.extract_strided_slice %47 {offsets = [16, 0], sizes = [16, 64], strides = [1, 1]} : vector<32x256xbf16> to vector<16x64xbf16>
    %122 = vector.extract_strided_slice %51 {offsets = [16, 0], sizes = [16, 64], strides = [1, 1]} : vector<32x256xbf16> to vector<16x64xbf16>
    %cst_34 = arith.constant dense<0.000000e+00> : vector<16x16xf32>
    %123 = tpu.matmul %120, %121, %cst_34 {dimension_numbers = #tpu.dot_dimension_numbers<[1], [1], [0], [0], [0, 0, 1, 0], [], []>} : vector<16x64xbf16>, vector<16x64xbf16>, vector<16x16xf32> -> vector<16x16xf32>
    %cst_35 = arith.constant dense<0xFF800000> : vector<16xf32>
    %124 = vector.multi_reduction <maximumf>, %123, %cst_35 [1] : vector<16x16xf32> to vector<16xf32>
    %125 = vector.shape_cast %124 : vector<16xf32> to vector<16x1xf32>
    %126 = vector.broadcast %125 : vector<16x1xf32> to vector<16x16xf32>
    %127 = arith.subf %123, %126 : vector<16x16xf32>
    %128 = math.exp %127 : vector<16x16xf32>
    %cst_36 = arith.constant dense<0.000000e+00> : vector<16xf32>
    %129 = vector.multi_reduction <add>, %128, %cst_36 [1] : vector<16x16xf32> to vector<16xf32>
    %130 = vector.shape_cast %129 : vector<16xf32> to vector<16x1xf32>
    %131 = tpu.reciprocal %130 {approx = true} : vector<16x1xf32> -> vector<16x1xf32>
    %132 = vector.broadcast %131 : vector<16x1xf32> to vector<16x16xf32>
    %133 = arith.mulf %128, %132 : vector<16x16xf32>
    %134 = arith.truncf %133 : vector<16x16xf32> to vector<16x16xbf16>
    %cst_37 = arith.constant dense<0.000000e+00> : vector<16x64xf32>
    %135 = tpu.matmul %134, %122, %cst_37 {dimension_numbers = #tpu.dot_dimension_numbers<[1], [0], [0], [1], [0, 0, 1, 1], [], []>} : vector<16x16xbf16>, vector<16x64xbf16>, vector<16x64xf32> -> vector<16x64xf32>
    %c16 = arith.constant 16 : index
    %c0_38 = arith.constant 0 : index
    %136 = vector.load %arg11[%c16, %c0_38] : memref<32x256xf32, #tpu.memory_space<vmem>>, vector<16x64xf32>
    tpu.vector_store %arg11[%c16, %c0_38], %135 {strides = array<i32>} : memref<32x256xf32, #tpu.memory_space<vmem>>, vector<16x64xf32>,
    %137 = vector.extract_strided_slice %43 {offsets = [16, 64], sizes = [16, 64], strides = [1, 1]} : vector<32x256xbf16> to vector<16x64xbf16>
    %138 = vector.extract_strided_slice %47 {offsets = [16, 64], sizes = [16, 64], strides = [1, 1]} : vector<32x256xbf16> to vector<16x64xbf16>
    %139 = vector.extract_strided_slice %51 {offsets = [16, 64], sizes = [16, 64], strides = [1, 1]} : vector<32x256xbf16> to vector<16x64xbf16>
    %cst_39 = arith.constant dense<0.000000e+00> : vector<16x16xf32>
    %140 = tpu.matmul %137, %138, %cst_39 {dimension_numbers = #tpu.dot_dimension_numbers<[1], [1], [0], [0], [0, 0, 1, 0], [], []>} : vector<16x64xbf16>, vector<16x64xbf16>, vector<16x16xf32> -> vector<16x16xf32>
    %cst_40 = arith.constant dense<0xFF800000> : vector<16xf32>
    %141 = vector.multi_reduction <maximumf>, %140, %cst_40 [1] : vector<16x16xf32> to vector<16xf32>
    %142 = vector.shape_cast %141 : vector<16xf32> to vector<16x1xf32>
    %143 = vector.broadcast %142 : vector<16x1xf32> to vector<16x16xf32>
    %144 = arith.subf %140, %143 : vector<16x16xf32>
    %145 = math.exp %144 : vector<16x16xf32>
    %cst_41 = arith.constant dense<0.000000e+00> : vector<16xf32>
    %146 = vector.multi_reduction <add>, %145, %cst_41 [1] : vector<16x16xf32> to vector<16xf32>
    %147 = vector.shape_cast %146 : vector<16xf32> to vector<16x1xf32>
    %148 = tpu.reciprocal %147 {approx = true} : vector<16x1xf32> -> vector<16x1xf32>
    %149 = vector.broadcast %148 : vector<16x1xf32> to vector<16x16xf32>
    %150 = arith.mulf %145, %149 : vector<16x16xf32>
    %151 = arith.truncf %150 : vector<16x16xf32> to vector<16x16xbf16>
    %cst_42 = arith.constant dense<0.000000e+00> : vector<16x64xf32>
    %152 = tpu.matmul %151, %139, %cst_42 {dimension_numbers = #tpu.dot_dimension_numbers<[1], [0], [0], [1], [0, 0, 1, 1], [], []>} : vector<16x16xbf16>, vector<16x64xbf16>, vector<16x64xf32> -> vector<16x64xf32>
    %c16_43 = arith.constant 16 : index
    %c64_44 = arith.constant 64 : index
    %153 = vector.load %arg11[%c16_43, %c64_44] : memref<32x256xf32, #tpu.memory_space<vmem>>, vector<16x64xf32>
    tpu.vector_store %arg11[%c16_43, %c64_44], %152 {strides = array<i32>} : memref<32x256xf32, #tpu.memory_space<vmem>>, vector<16x64xf32>,
    %154 = vector.extract_strided_slice %43 {offsets = [16, 128], sizes = [16, 64], strides = [1, 1]} : vector<32x256xbf16> to vector<16x64xbf16>
    %155 = vector.extract_strided_slice %47 {offsets = [16, 128], sizes = [16, 64], strides = [1, 1]} : vector<32x256xbf16> to vector<16x64xbf16>
    %156 = vector.extract_strided_slice %51 {offsets = [16, 128], sizes = [16, 64], strides = [1, 1]} : vector<32x256xbf16> to vector<16x64xbf16>
    %cst_45 = arith.constant dense<0.000000e+00> : vector<16x16xf32>
    %157 = tpu.matmul %154, %155, %cst_45 {dimension_numbers = #tpu.dot_dimension_numbers<[1], [1], [0], [0], [0, 0, 1, 0], [], []>} : vector<16x64xbf16>, vector<16x64xbf16>, vector<16x16xf32> -> vector<16x16xf32>
    %cst_46 = arith.constant dense<0xFF800000> : vector<16xf32>
    %158 = vector.multi_reduction <maximumf>, %157, %cst_46 [1] : vector<16x16xf32> to vector<16xf32>
    %159 = vector.shape_cast %158 : vector<16xf32> to vector<16x1xf32>
    %160 = vector.broadcast %159 : vector<16x1xf32> to vector<16x16xf32>
    %161 = arith.subf %157, %160 : vector<16x16xf32>
    %162 = math.exp %161 : vector<16x16xf32>
    %cst_47 = arith.constant dense<0.000000e+00> : vector<16xf32>
    %163 = vector.multi_reduction <add>, %162, %cst_47 [1] : vector<16x16xf32> to vector<16xf32>
    %164 = vector.shape_cast %163 : vector<16xf32> to vector<16x1xf32>
    %165 = tpu.reciprocal %164 {approx = true} : vector<16x1xf32> -> vector<16x1xf32>
    %166 = vector.broadcast %165 : vector<16x1xf32> to vector<16x16xf32>
    %167 = arith.mulf %162, %166 : vector<16x16xf32>
    %168 = arith.truncf %167 : vector<16x16xf32> to vector<16x16xbf16>
    %cst_48 = arith.constant dense<0.000000e+00> : vector<16x64xf32>
    %169 = tpu.matmul %168, %156, %cst_48 {dimension_numbers = #tpu.dot_dimension_numbers<[1], [0], [0], [1], [0, 0, 1, 1], [], []>} : vector<16x16xbf16>, vector<16x64xbf16>, vector<16x64xf32> -> vector<16x64xf32>
    %c16_49 = arith.constant 16 : index
    %c128_50 = arith.constant 128 : index
    %170 = vector.load %arg11[%c16_49, %c128_50] : memref<32x256xf32, #tpu.memory_space<vmem>>, vector<16x64xf32>
    tpu.vector_store %arg11[%c16_49, %c128_50], %169 {strides = array<i32>} : memref<32x256xf32, #tpu.memory_space<vmem>>, vector<16x64xf32>,
    %171 = vector.extract_strided_slice %43 {offsets = [16, 192], sizes = [16, 64], strides = [1, 1]} : vector<32x256xbf16> to vector<16x64xbf16>
    %172 = vector.extract_strided_slice %47 {offsets = [16, 192], sizes = [16, 64], strides = [1, 1]} : vector<32x256xbf16> to vector<16x64xbf16>
    %173 = vector.extract_strided_slice %51 {offsets = [16, 192], sizes = [16, 64], strides = [1, 1]} : vector<32x256xbf16> to vector<16x64xbf16>
    %cst_51 = arith.constant dense<0.000000e+00> : vector<16x16xf32>
    %174 = tpu.matmul %171, %172, %cst_51 {dimension_numbers = #tpu.dot_dimension_numbers<[1], [1], [0], [0], [0, 0, 1, 0], [], []>} : vector<16x64xbf16>, vector<16x64xbf16>, vector<16x16xf32> -> vector<16x16xf32>
    %cst_52 = arith.constant dense<0xFF800000> : vector<16xf32>
    %175 = vector.multi_reduction <maximumf>, %174, %cst_52 [1] : vector<16x16xf32> to vector<16xf32>
    %176 = vector.shape_cast %175 : vector<16xf32> to vector<16x1xf32>
    %177 = vector.broadcast %176 : vector<16x1xf32> to vector<16x16xf32>
    %178 = arith.subf %174, %177 : vector<16x16xf32>
    %179 = math.exp %178 : vector<16x16xf32>
    %cst_53 = arith.constant dense<0.000000e+00> : vector<16xf32>
    %180 = vector.multi_reduction <add>, %179, %cst_53 [1] : vector<16x16xf32> to vector<16xf32>
    %181 = vector.shape_cast %180 : vector<16xf32> to vector<16x1xf32>
    %182 = tpu.reciprocal %181 {approx = true} : vector<16x1xf32> -> vector<16x1xf32>
    %183 = vector.broadcast %182 : vector<16x1xf32> to vector<16x16xf32>
    %184 = arith.mulf %179, %183 : vector<16x16xf32>
    %185 = arith.truncf %184 : vector<16x16xf32> to vector<16x16xbf16>
    %cst_54 = arith.constant dense<0.000000e+00> : vector<16x64xf32>
    %186 = tpu.matmul %185, %173, %cst_54 {dimension_numbers = #tpu.dot_dimension_numbers<[1], [0], [0], [1], [0, 0, 1, 1], [], []>} : vector<16x16xbf16>, vector<16x64xbf16>, vector<16x64xf32> -> vector<16x64xf32>
    %c16_55 = arith.constant 16 : index
    %c192_56 = arith.constant 192 : index
    %187 = vector.load %arg11[%c16_55, %c192_56] : memref<32x256xf32, #tpu.memory_space<vmem>>, vector<16x64xf32>
    tpu.vector_store %arg11[%c16_55, %c192_56], %186 {strides = array<i32>} : memref<32x256xf32, #tpu.memory_space<vmem>>, vector<16x64xf32>,
    %c0_57 = arith.constant 0 : index
    %c0_58 = arith.constant 0 : index
    %188 = vector.load %arg11[%c0_57, %c0_58] : memref<32x256xf32, #tpu.memory_space<vmem>>, vector<32x256xf32>
    %189 = arith.truncf %188 : vector<32x256xf32> to vector<32x256xbf16>
    %c0_59 = arith.constant 0 : index
    %c0_60 = arith.constant 0 : index
    %c0_61 = arith.constant 0 : index
    %190 = vector.load %arg3[%c0_59, %c0_60, %c0_61] : memref<1x256x256xbf16, #tpu.memory_space<vmem>>, vector<1x256x256xbf16>
    %191 = vector.shape_cast %190 : vector<1x256x256xbf16> to vector<256x256xbf16>
    %cst_62 = arith.constant dense<0.000000e+00> : vector<32x256xf32>
    %192 = tpu.matmul %189, %191, %cst_62 {dimension_numbers = #tpu.dot_dimension_numbers<[1], [0], [0], [1], [0, 0, 1, 1], [], []>} : vector<32x256xbf16>, vector<256x256xbf16>, vector<32x256xf32> -> vector<32x256xf32>
    %193 = vector.broadcast %13 : vector<1x256xf32> to vector<32x256xf32>
    %194 = arith.addf %192, %193 : vector<32x256xf32>
    %195 = arith.addf %3, %194 : vector<32x256xf32>
    %cst_63 = arith.constant dense<0.000000e+00> : vector<32xf32>
    %196 = vector.multi_reduction <add>, %195, %cst_63 [1] : vector<32x256xf32> to vector<32xf32>
    %197 = vector.shape_cast %196 : vector<32xf32> to vector<32x1xf32>
    %cst_64 = arith.constant 2.560000e+02 : f32
    %198 = vector.broadcast %cst_64 : f32 to vector<32x1xf32>
    %199 = arith.divf %197, %198 : vector<32x1xf32>
    %200 = vector.broadcast %199 : vector<32x1xf32> to vector<32x256xf32>
    %201 = arith.subf %195, %200 : vector<32x256xf32>
    %202 = arith.mulf %201, %201 : vector<32x256xf32>
    %cst_65 = arith.constant dense<0.000000e+00> : vector<32xf32>
    %203 = vector.multi_reduction <add>, %202, %cst_65 [1] : vector<32x256xf32> to vector<32xf32>
    %204 = vector.shape_cast %203 : vector<32xf32> to vector<32x1xf32>
    %cst_66 = arith.constant 2.560000e+02 : f32
    %205 = vector.broadcast %cst_66 : f32 to vector<32x1xf32>
    %206 = arith.divf %204, %205 : vector<32x1xf32>
    %cst_67 = arith.constant 9.99999974E-6 : f32
    %207 = vector.broadcast %cst_67 : f32 to vector<32x1xf32>
    %208 = arith.addf %206, %207 : vector<32x1xf32>
    %209 = math.rsqrt %208 : vector<32x1xf32>
    %210 = vector.broadcast %209 : vector<32x1xf32> to vector<32x256xf32>
    %211 = arith.mulf %201, %210 : vector<32x256xf32>
    %212 = vector.broadcast %8 : vector<1x256xf32> to vector<32x256xf32>
    %213 = arith.mulf %211, %212 : vector<32x256xf32>
    %214 = vector.broadcast %9 : vector<1x256xf32> to vector<32x256xf32>
    %215 = arith.addf %213, %214 : vector<32x256xf32>
    %216 = arith.truncf %215 : vector<32x256xf32> to vector<32x256xbf16>
    %c0_68 = arith.constant 0 : index
    %c0_69 = arith.constant 0 : index
    %c0_70 = arith.constant 0 : index
    %217 = vector.load %arg4[%c0_68, %c0_69, %c0_70] : memref<1x256x1024xbf16, #tpu.memory_space<vmem>>, vector<1x256x1024xbf16>
    %218 = vector.shape_cast %217 : vector<1x256x1024xbf16> to vector<256x1024xbf16>
    %cst_71 = arith.constant dense<0.000000e+00> : vector<32x1024xf32>
    %219 = tpu.matmul %216, %218, %cst_71 {dimension_numbers = #tpu.dot_dimension_numbers<[1], [0], [0], [1], [0, 0, 1, 1], [], []>} : vector<32x256xbf16>, vector<256x1024xbf16>, vector<32x1024xf32> -> vector<32x1024xf32>
    %220 = vector.broadcast %14 : vector<1x1024xf32> to vector<32x1024xf32>
    %221 = arith.addf %219, %220 : vector<32x1024xf32>
    %222 = arith.mulf %221, %221 : vector<32x1024xf32>
    %223 = arith.mulf %221, %222 : vector<32x1024xf32>
    %cst_72 = arith.constant 4.471500e-02 : f32
    %224 = vector.broadcast %cst_72 : f32 to vector<32x1024xf32>
    %225 = arith.mulf %224, %223 : vector<32x1024xf32>
    %226 = arith.addf %221, %225 : vector<32x1024xf32>
    %cst_73 = arith.constant 0.797884583 : f32
    %227 = vector.broadcast %cst_73 : f32 to vector<32x1024xf32>
    %228 = arith.mulf %227, %226 : vector<32x1024xf32>
    %229 = math.tanh %228 : vector<32x1024xf32>
    %cst_74 = arith.constant 1.000000e+00 : f32
    %230 = vector.broadcast %cst_74 : f32 to vector<32x1024xf32>
    %231 = arith.addf %230, %229 : vector<32x1024xf32>
    %cst_75 = arith.constant 5.000000e-01 : f32
    %232 = vector.broadcast %cst_75 : f32 to vector<32x1024xf32>
    %233 = arith.mulf %232, %231 : vector<32x1024xf32>
    %234 = arith.mulf %221, %233 : vector<32x1024xf32>
    %235 = arith.truncf %234 : vector<32x1024xf32> to vector<32x1024xbf16>
    %c0_76 = arith.constant 0 : index
    %c0_77 = arith.constant 0 : index
    %c0_78 = arith.constant 0 : index
    %236 = vector.load %arg5[%c0_76, %c0_77, %c0_78] : memref<1x1024x256xbf16, #tpu.memory_space<vmem>>, vector<1x1024x256xbf16>
    %237 = vector.shape_cast %236 : vector<1x1024x256xbf16> to vector<1024x256xbf16>
    %cst_79 = arith.constant dense<0.000000e+00> : vector<32x256xf32>
    %238 = tpu.matmul %235, %237, %cst_79 {dimension_numbers = #tpu.dot_dimension_numbers<[1], [0], [0], [1], [0, 0, 1, 1], [], []>} : vector<32x1024xbf16>, vector<1024x256xbf16>, vector<32x256xf32> -> vector<32x256xf32>
    %239 = vector.broadcast %15 : vector<1x256xf32> to vector<32x256xf32>
    %240 = arith.addf %238, %239 : vector<32x256xf32>
    %241 = arith.addf %195, %240 : vector<32x256xf32>
    %c0_80 = arith.constant 0 : index
    %c0_81 = arith.constant 0 : index
    %242 = vector.load %arg10[%c0_80, %c0_81] : memref<32x256xf32, #tpu.memory_space<vmem>>, vector<32x256xf32>
    tpu.vector_store %arg10[%c0_80, %c0_81], %241 {strides = array<i32>} : memref<32x256xf32, #tpu.memory_space<vmem>>, vector<32x256xf32>,
    %c1_i32 = arith.constant 1 : i32
    %243 = arith.cmpi eq, %arg0, %c1_i32 : i32
    %244 = arith.extui %243 : i1 to i32
    %c0_i32_82 = arith.constant 0 : i32
    %245 = arith.cmpi ne, %244, %c0_i32_82 : i32
    scf.if %245 {
      %c0_83 = arith.constant 0 : index
      %c0_84 = arith.constant 0 : index
      %246 = vector.load %arg7[%c0_83, %c0_84] : memref<4x256xf32, #tpu.memory_space<vmem>>, vector<4x256xf32>
      %247 = vector.extract_strided_slice %246 {offsets = [0, 0], sizes = [1, 256], strides = [1, 1]} : vector<4x256xf32> to vector<1x256xf32>
      %248 = vector.extract_strided_slice %246 {offsets = [1, 0], sizes = [1, 256], strides = [1, 1]} : vector<4x256xf32> to vector<1x256xf32>
      %cst_85 = arith.constant dense<0.000000e+00> : vector<32xf32>
      %249 = vector.multi_reduction <add>, %241, %cst_85 [1] : vector<32x256xf32> to vector<32xf32>
      %250 = vector.shape_cast %249 : vector<32xf32> to vector<32x1xf32>
      %cst_86 = arith.constant 2.560000e+02 : f32
      %251 = vector.broadcast %cst_86 : f32 to vector<32x1xf32>
      %252 = arith.divf %250, %251 : vector<32x1xf32>
      %253 = vector.broadcast %252 : vector<32x1xf32> to vector<32x256xf32>
      %254 = arith.subf %241, %253 : vector<32x256xf32>
      %255 = arith.mulf %254, %254 : vector<32x256xf32>
      %cst_87 = arith.constant dense<0.000000e+00> : vector<32xf32>
      %256 = vector.multi_reduction <add>, %255, %cst_87 [1] : vector<32x256xf32> to vector<32xf32>
      %257 = vector.shape_cast %256 : vector<32xf32> to vector<32x1xf32>
      %cst_88 = arith.constant 2.560000e+02 : f32
      %258 = vector.broadcast %cst_88 : f32 to vector<32x1xf32>
      %259 = arith.divf %257, %258 : vector<32x1xf32>
      %cst_89 = arith.constant 9.99999974E-6 : f32
      %260 = vector.broadcast %cst_89 : f32 to vector<32x1xf32>
      %261 = arith.addf %259, %260 : vector<32x1xf32>
      %262 = math.rsqrt %261 : vector<32x1xf32>
      %263 = vector.broadcast %262 : vector<32x1xf32> to vector<32x256xf32>
      %264 = arith.mulf %254, %263 : vector<32x256xf32>
      %265 = vector.broadcast %247 : vector<1x256xf32> to vector<32x256xf32>
      %266 = arith.mulf %264, %265 : vector<32x256xf32>
      %267 = vector.broadcast %248 : vector<1x256xf32> to vector<32x256xf32>
      %268 = arith.addf %266, %267 : vector<32x256xf32>
      %269 = vector.extract_strided_slice %246 {offsets = [2, 0], sizes = [1, 128], strides = [1, 1]} : vector<4x256xf32> to vector<1x128xf32>
      %270 = arith.truncf %268 : vector<32x256xf32> to vector<32x256xbf16>
      %c0_90 = arith.constant 0 : index
      %c0_91 = arith.constant 0 : index
      %271 = vector.load %arg8[%c0_90, %c0_91] : memref<256x128xbf16, #tpu.memory_space<vmem>>, vector<256x128xbf16>
      %cst_92 = arith.constant dense<0.000000e+00> : vector<32x128xf32>
      %272 = tpu.matmul %270, %271, %cst_92 {dimension_numbers = #tpu.dot_dimension_numbers<[1], [0], [0], [1], [0, 0, 1, 1], [], []>} : vector<32x256xbf16>, vector<256x128xbf16>, vector<32x128xf32> -> vector<32x128xf32>
      %273 = vector.broadcast %269 : vector<1x128xf32> to vector<32x128xf32>
      %274 = arith.addf %272, %273 : vector<32x128xf32>
      %c0_93 = arith.constant 0 : index
      %c0_94 = arith.constant 0 : index
      %275 = vector.load %arg9[%c0_93, %c0_94] : memref<32x128xf32, #tpu.memory_space<vmem>>, vector<32x128xf32>
      tpu.vector_store %arg9[%c0_93, %c0_94], %274 {strides = array<i32>} : memref<32x128xf32, #tpu.memory_space<vmem>>, vector<32x128xf32>,
    } else {
    }
    return
  }
  func.func @transform_0(%arg0: i32) -> (i32, i32) {
    %c0_i32 = arith.constant 0 : i32
    %c0_i32_0 = arith.constant 0 : i32
    %c0_i32_1 = arith.constant 0 : i32
    return %c0_i32, %c0_i32_0 : i32, i32
  }
  func.func @transform_1(%arg0: i32) -> (i32, i32, i32) {
    %c0_i32 = arith.constant 0 : i32
    %c0_i32_0 = arith.constant 0 : i32
    %c0_i32_1 = arith.constant 0 : i32
    return %arg0, %c0_i32, %c0_i32_0 : i32, i32, i32
  }
  func.func @transform_2(%arg0: i32) -> (i32, i32, i32) {
    %c0_i32 = arith.constant 0 : i32
    %c0_i32_0 = arith.constant 0 : i32
    %c0_i32_1 = arith.constant 0 : i32
    return %arg0, %c0_i32, %c0_i32_0 : i32, i32, i32
  }
  func.func @transform_3(%arg0: i32) -> (i32, i32, i32) {
    %c0_i32 = arith.constant 0 : i32
    %c0_i32_0 = arith.constant 0 : i32
    %c0_i32_1 = arith.constant 0 : i32
    return %arg0, %c0_i32, %c0_i32_0 : i32, i32, i32
  }
  func.func @transform_4(%arg0: i32) -> (i32, i32, i32) {
    %c0_i32 = arith.constant 0 : i32
    %c0_i32_0 = arith.constant 0 : i32
    %c0_i32_1 = arith.constant 0 : i32
    return %arg0, %c0_i32, %c0_i32_0 : i32, i32, i32
  }
  func.func @transform_5(%arg0: i32) -> (i32, i32, i32) {
    %c0_i32 = arith.constant 0 : i32
    %c0_i32_0 = arith.constant 0 : i32
    %c0_i32_1 = arith.constant 0 : i32
    return %arg0, %c0_i32, %c0_i32_0 : i32, i32, i32
  }
  func.func @transform_6(%arg0: i32) -> (i32, i32) {
    %c0_i32 = arith.constant 0 : i32
    %c0_i32_0 = arith.constant 0 : i32
    %c0_i32_1 = arith.constant 0 : i32
    return %c0_i32, %c0_i32_0 : i32, i32
  }
  func.func @transform_7(%arg0: i32) -> (i32, i32) {
    %c0_i32 = arith.constant 0 : i32
    %c0_i32_0 = arith.constant 0 : i32
    %c0_i32_1 = arith.constant 0 : i32
    return %c0_i32, %c0_i32_0 : i32, i32
  }
  func.func @transform_8(%arg0: i32) -> (i32, i32) {
    %c0_i32 = arith.constant 0 : i32
    %c0_i32_0 = arith.constant 0 : i32
    %c0_i32_1 = arith.constant 0 : i32
    return %c0_i32, %c0_i32_0 : i32, i32
  }
}

</mosaic_0001>

<bundles_post_ra>
// kernel: esm2t36_forward.1
= control target key start
LH: loop header
LB: loop body
LE: loop exit
PB: predicated region body
PF: predicated region fallthrough
CT: control target
= control target key end

     0   :  { %s8778_s0 = inlined_call_operand.vmem [shape: f32[32,256], index: 0, kind: input, shape index: {}]   ;;  %s8779_s1 = inlined_call_operand.hbm [shape: bf16[2,256,768], index: 1, kind: input, shape index: {}]   ;;  %s8780_s2 = inlined_call_operand.vmem [shape: bf16[2,256,256], index: 2, kind: input, shape index: {}]   ;;  %s8781_s3 = inlined_call_operand.hbm [shape: bf16[2,256,1024], index: 3, kind: input, shape index: {}]   ;;  %s8782_s4 = inlined_call_operand.hbm [shape: bf16[2,1024,256], index: 4, kind: input, shape index: {}]   ;;  %s8783_s5 = inlined_call_operand.vmem [shape: f32[2,4,1024], index: 5, kind: input, shape index: {}]   ;;  %s8784_s6 = inlined_call_operand.vmem [shape: f32[4,256], index: 6, kind: input, shape index: {}]   ;;  %s8785_s7 = inlined_call_operand.vmem [shape: bf16[256,128], index: 7, kind: input, shape index: {}]   ;;  %s8786_s8 = inlined_call_operand.vmem [shape: f32[32,128], index: 8, kind: output, shape index: {}]  }
   0x1   :  { %8802 = sst [smem:[#allocation24_spill]] %s8781_s3 }
   0x2   :  { %13 = vsyncpa [#allocation5], 0 }
   0x3   :  { %15 = vsyncpa [#allocation5 + $0x1], 0 }
   0x4   :  { %16 = vsyncpa [#allocation7], 0 }
   0x5   :  { %18 = vsyncpa [#allocation7 + $0x1], 0  ;;  %s7062_s27 = smov 0   ;;  %s7064_s28 = smov 0  }
   0x6   :  { %s7066_s29 = smov 0   ;;  %s7068_s30 = smov 0  }
   0x7 LB: > { %s7081_s9 = sadd.s32 4294967295, %s7003_s30   ;;  %s7084_s10 = sadd.s32 1, %s7003_s30   ;;  %s7003_s30 = sphi %s7068_s30, %s8841_s30   ;;  %s6999_s29 = sphi %s7066_s29, %s8840_s29   ;;  %s6995_s28 = sphi %s7064_s28, %s8839_s28   ;;  %s6991_s27 = sphi %s7062_s27, %s8838_s27  }
   0x8   : > { %s49_s11 = ssub.s32 %s7003_s30, %s7084_s10  ;;  %s52_s12 = sadd.s32 1, %s6999_s29 }
   0x9   : > { %p50_p0 = scmp.eq.s32.totalorder %s49_s11, 0  ;;  %p59_p1 = scmp.ne.s32.totalorder %s6999_s29, %s6995_s28 }
   0xa   : > { %p60_p2 = scmp.eq.s32.totalorder %s7003_s30, 0  ;;  %p65_p3 = scmp.ne.s32.totalorder %s6995_s28, %s6991_s27 }
   0xb   : > { %s7094_s13 = scalar_select %p50_p0, %s6999_s29, %s52_s12  }
   0xc   : > { %p61_p4 = por %p60_p2, %p59_p1  ;;  %p66_p5 = scmp.eq.s32.totalorder %s7081_s9, 0 }
   0xd   : > { %8803 = sst [smem:[#allocation11_spill]] %s7094_s13  ;;  %p6268_p6 = scmp.lt.s32.totalorder %s7003_s30, 2 }
   0xe   : > { %p7098_p7 = por %p66_p5, %p65_p3  ;;  %s7103_s15 = sand.u32 1, %s6999_s29  }
   0xf   : > { %p7105_p8 = pnand %p6268_p6, %p61_p4  ;;  %s294_s17 = sand.u32 1, %s7003_s30  }
  0x10   : > { %s8804_s14 = scalar_select %p7098_p7, 1, 0 }
  0x11   : > { %s5608_s18 = sshll.u32 %s7103_s15, 10  ;;  %s6041_s19 = sshll.u32 %s7003_s30, 14 }
  0x12   : > { %s298_s20 = scalar_lea.vmem [#allocation6], %s5608_s18  ;;  %s8806_s3 = sld [smem:[#allocation24_spill]] }
  0x13   : > { %s305_s21 = sshll.u32 %s298_s20, 4  ;;  %s7123_s25 = scalar_lea.sflag [#allocation7], %s294_s17  ;;  %s7121_s21 = int_to_ptr.vmem [resolvable:$true] %s305_s21 }
  0x14   : > { %p7129_p10 = pneg %p7105_p8 }
  0x18   : > { %s7119_s24 = scalar_lea.hbm %s8806_s3, %s6041_s19  ;;  %s6880_s20 = scalar_lea.hbm %s8806_s3, 32768 }
  0x19   : > { %s6875_s26 = scalar_lea.hbm %s7119_s24, 16384  ;;  %p6881_p13 = scmp.lt.u32.totalorder %s7119_s24, %s8806_s3 }
  0x1a   : > { %p6876_p9 = scmp.ne.s32.totalorder %s7119_s24, %s6875_s26  ;;  %p6882_p0 = scmp.lt.u32.totalorder %s6880_s20, %s6875_s26 }
  0x1b   : > { %p6884_p2 = scmp.lt.u32.totalorder %s6875_s26, %s7119_s24 }
  0x1c   : > { %p6878_p11 = pnand %p7129_p10, %p6876_p9  ;;  %p6883_p1 = por %p6882_p0, %p6881_p13 }
  0x1e   : > { %p6879_p12 = pneg %p6878_p11  ;;  %p6885_p3 = por %p6884_p2, %p6883_p1 }
  0x20   : > { %p6886_p4 = pnand %p6885_p3, %p6879_p12 }
  0x22   : > { %6889 = shalt.err (!%p6886_p4)
}
  0x23   : > { %s6890_s17 = scalar_lea.vmem %s7121_s21, 16384  ;;  %s7005_s11 = smov [#allocation6]  }
  0x24   : > { %p6891_p5 = scmp.ne.s32.totalorder %s7121_s21, %s6890_s17  ;;  %s6895_s12 = sshll.u32 %s7005_s11, 4  ;;  %s6896_s12 = int_to_ptr.vmem [resolvable:$false] %s6895_s12 }
  0x25   : > { %s6897_s22 = scalar_lea.vmem %s6896_s12, 32768  ;;  %p6898_p11 = scmp.lt.s32.totalorder %s7121_s21, %s6896_s12 }
  0x26   : > { %p6893_p6 = pnand %p6891_p5, %p7129_p10  ;;  %p6899_p7 = scmp.lt.s32.totalorder %s6897_s22, %s6890_s17 }
  0x28   : > { %p6894_p9 = pneg %p6893_p6  ;;  %p6900_p13 = por %p6899_p7, %p6898_p11 }
  0x2a   : > { %p6901_p0 = pnand %p6900_p13, %p6894_p9 }
  0x2c   : > { %6904 = shalt.err (!%p6901_p0)
}
  0x2d   : > { %s7006_s26 = smov 512   ;;  %s7007_s20 = smov 32  }
  0x2e   : > { %6264 = dma.hbm_to_vmem [thread:$0]  (!%p7105_p8), %s7119_s24, 16384, %s7121_s21, %s7123_s25, %s7006_s26, %s7006_s26, %s7007_s20  }
  0x2f   : > { %s7158_s11 = scalar_lea.hbm %s8782_s4, %s6041_s19  ;;  %s319_s12 = scalar_lea.vmem [#allocation8], %s5608_s18 }
  0x30   : > { %s326_s22 = sshll.u32 %s319_s12, 4  ;;  %p5614_p7 = scmp.ge.s32.totalorder %s7003_s30, 1  ;;  %s7163_s22 = int_to_ptr.vmem [resolvable:$true] %s326_s22 }
  0x31   : > { %p342_p12 = scmp.lt.s32.totalorder %s7003_s30, 3  ;;  %s6249_s3 = smul.u32 768, %s7103_s15 }
  0x32   : > { %s6250_s21 = smul.u32 12288, %s7003_s30  ;;  %s266_s23 = scalar_lea.sflag [#allocation5], %s7103_s15 }
  0x33   : > { %p7167_p1 = pnand %p5614_p7, %p342_p12  ;;  %s269_s18 = scalar_lea.vmem [#allocation4], %s6249_s3 }
  0x34   : > { %s7175_s20 = scalar_lea.hbm %s8779_s1, %s6250_s21  ;;  %s276_s19 = sshll.u32 %s269_s18, 4  ;;  %s7177_s19 = int_to_ptr.vmem [resolvable:$true] %s276_s19 }
  0x35   : > { %s8808_s13 = scalar_select %p7167_p1, 1, 0 }
  0x36   : > { %s6905_s17 = scalar_lea.hbm %s7175_s20, 12288  ;;  %s6910_s24 = scalar_lea.hbm %s8779_s1, 24576 }
  0x37   : > { %p6906_p2 = scmp.ne.s32.totalorder %s7175_s20, %s6905_s17  ;;  %p6911_p5 = scmp.lt.u32.totalorder %s7175_s20, %s8779_s1 }
  0x38   : > { %p6912_p6 = scmp.lt.u32.totalorder %s6910_s24, %s6905_s17  ;;  %p6914_p11 = scmp.lt.u32.totalorder %s6905_s17, %s7175_s20 }
  0x39   : > { %p6908_p3 = pnand %p6906_p2, %p7129_p10 }
  0x3a   : > { %p6913_p9 = por %p6912_p6, %p6911_p5 }
  0x3b   : > { %p6909_p4 = pneg %p6908_p3 }
  0x3c   : > { %p6915_p13 = por %p6914_p11, %p6913_p9 }
  0x3e   : > { %p6916_p0 = pnand %p6915_p13, %p6909_p4 }
  0x40   : > { %6919 = shalt.err (!%p6916_p0)
}
  0x41   : > { %s6920_s3 = scalar_lea.vmem %s7177_s19, 12288  ;;  %s7008_s18 = smov [#allocation4]  }
  0x42   : > { %p6921_p7 = scmp.ne.s32.totalorder %s7177_s19, %s6920_s3  ;;  %s6925_s30 = sshll.u32 %s7008_s18, 4  ;;  %s6926_s30 = int_to_ptr.vmem [resolvable:$false] %s6925_s30 }
  0x43   : > { %s6927_s12 = scalar_lea.vmem %s6926_s30, 24576  ;;  %p6928_p3 = scmp.lt.s32.totalorder %s7177_s19, %s6926_s30 }
  0x44   : > { %p6923_p12 = pnand %p6921_p7, %p7129_p10  ;;  %p6929_p1 = scmp.lt.s32.totalorder %s6927_s12, %s6920_s3 }
  0x46   : > { %p6924_p2 = pneg %p6923_p12  ;;  %p6930_p5 = por %p6929_p1, %p6928_p3 }
  0x48   : > { %p6931_p6 = pnand %p6930_p5, %p6924_p2 }
  0x4a   : > { %6934 = shalt.err (!%p6931_p6)
}
  0x4b   : > { %s7009_s17 = smov 384   ;;  %s7010_s24 = smov 24  }
  0x4c   : > { %6261 = dma.hbm_to_vmem [thread:$0]  (!%p7105_p8), %s7175_s20, 12288, %s7177_s19, %s266_s23, %s7009_s17, %s7009_s17, %s7010_s24  }
  0x4d   : > { %s6935_s21 = scalar_lea.hbm %s7158_s11, 16384  ;;  %s6940_s18 = scalar_lea.hbm %s8782_s4, 32768 }
  0x4e   : > { %p6936_p4 = scmp.ne.s32.totalorder %s7158_s11, %s6935_s21  ;;  %p6941_p11 = scmp.lt.u32.totalorder %s7158_s11, %s8782_s4 }
  0x4f   : > { %p6942_p13 = scmp.lt.u32.totalorder %s6940_s18, %s6935_s21  ;;  %p6944_p7 = scmp.lt.u32.totalorder %s6935_s21, %s7158_s11 }
  0x50   : > { %p6938_p1 = pnand %p6936_p4, %p7129_p10 }
  0x51   : > { %p6943_p0 = por %p6942_p13, %p6941_p11 }
  0x52   : > { %p6939_p9 = pneg %p6938_p1 }
  0x53   : > { %p6945_p12 = por %p6944_p7, %p6943_p0 }
  0x55   : > { %p6946_p2 = pnand %p6945_p12, %p6939_p9 }
  0x57   : > { %6949 = shalt.err (!%p6946_p2)
}
  0x58   : > { %s6950_s15 = scalar_lea.vmem %s7163_s22, 16384  ;;  %s7011_s20 = smov [#allocation8]  }
  0x59   : > { %p6951_p3 = scmp.ne.s32.totalorder %s7163_s22, %s6950_s15  ;;  %s6955_s19 = sshll.u32 %s7011_s20, 4  ;;  %s6956_s19 = int_to_ptr.vmem [resolvable:$false] %s6955_s19 }
  0x5a   : > { %s6957_s23 = scalar_lea.vmem %s6956_s19, 32768  ;;  %p6958_p4 = scmp.lt.s32.totalorder %s7163_s22, %s6956_s19 }
  0x5b   : > { %p6953_p5 = pnand %p6951_p3, %p7129_p10  ;;  %p6959_p1 = scmp.lt.s32.totalorder %s6957_s23, %s6950_s15 }
  0x5d   : > { %p6954_p6 = pneg %p6953_p5  ;;  %p6960_p11 = por %p6959_p1, %p6958_p4 }
  0x5f   : > { %p6961_p13 = pnand %p6960_p11, %p6954_p6 }
  0x61   : > { %6964 = shalt.err (!%p6961_p13)
}
  0x62   : > { %s7012_s17 = smov 128   ;;  %s7013_s24 = smov 8  }
  0x63   : > { %6267 = dma.hbm_to_vmem [thread:$0]  (!%p7105_p8), %s7158_s11, 16384, %s7163_s22, %s7123_s25, %s7012_s17, %s7012_s17, %s7013_s24  }
  0x64   : > { %p8809_p10 = scmp.ne.s32.totalorder %s8808_s13, 0 }
  0x66   : > { %346 = sbr.rel (%p8809_p10) target bundleno = 4999 (0x1387), region = 52 }
  0x6d   : > { %s348_s27 = sand.u32 1, %s6995_s28   ;;  %p8810_p9 = scmp.ne.s32.totalorder %s8804_s14, 0 }
  0x6e   : > { %s6251_s21 = smul.u32 768, %s348_s27  ;;  %s349_s26 = scalar_lea.sflag [#allocation5], %s348_s27 }
  0x70   : > { %s7228_s3 = scalar_lea.vmem [#allocation4], %s6251_s21 }
  0x71   : > { %6982 = dma.done.wait (%p8810_p9), %s349_s26, 12288  }
  0x72   : > { %6984 = vsyncadd (%p8810_p9), %s349_s26, 4294955008  ;;  %s357_s18 = sand.u32 1, %s7081_s9   ;;  %s5615_s16 = sshll.u32 %s348_s27, 10 }
  0x73   : > { %s358_s25 = scalar_lea.sflag [#allocation7], %s357_s18  ;;  %s7235_s11 = scalar_lea.vmem [#allocation6], %s5615_s16 }
  0x74   : > { %6986 = dma.done.wait (%p8810_p9), %s358_s25, 32768  }
  0x75   : > { %6988 = vsyncadd (%p8810_p9), %s358_s25, 4294934528  ;;  %p418_p8 = scmp.lt.s32.totalorder %s7081_s9, 1  ;;  %s7253_s24 = scalar_lea.vmem [#allocation8], %s5615_s16 }
  0x76   : > { %p5621_p0 = scmp.ne.s32.totalorder %s7081_s9, 0 }
  0x77   : > { %s419_s13 = scalar_select %p418_p8, %s7081_s9, 1 }
  0x78   : > { %432 = sbr.rel (%p5621_p0) target bundleno = 127 (0x7f), region = 68  ;;  %v433_v0 = vld [vmem:[%s8778_s0] sm:$0xff] (!%p5621_p0)  ;;  %v434_v1 = vld [vmem:[%s8778_s0 + $0x8] sm:$0xff] (!%p5621_p0)  ;;  %v435_v2 = vld [vmem:[%s8778_s0 + $0x10] sm:$0xff] (!%p5621_p0) }
  0x79   : > { %s6043_s22 = sshll.u32 %s419_s13, 8  ;;  %s6044_s30 = sshll.u32 %s419_s13, 5  ;;  %441 = vst [vmem:[#allocation2] sm:$0xff] (!%p5621_p0), %v433_v0  ;;  %442 = vst [vmem:[#allocation2 + $0x8] sm:$0xff] (!%p5621_p0), %v434_v1  ;;  %v436_v3 = vld [vmem:[%s8778_s0 + $0x18] sm:$0xff] (!%p5621_p0)  ;;  %v437_v4 = vld [vmem:[%s8778_s0 + $0x20] sm:$0xff] (!%p5621_p0) }
  0x7a   : > { %s7246_s20 = scalar_lea.vmem %s8780_s2, %s6043_s22  ;;  %s7251_s17 = scalar_lea.vmem %s8783_s5, %s6044_s30  ;;  %443 = vst [vmem:[#allocation2 + $0x10] sm:$0xff] (!%p5621_p0), %v435_v2  ;;  %v438_v5 = vld [vmem:[%s8778_s0 + $0x28] sm:$0xff] (!%p5621_p0)  ;;  %444 = vst [vmem:[#allocation2 + $0x18] sm:$0xff] (!%p5621_p0), %v436_v3  ;;  %v439_v6 = vld [vmem:[%s8778_s0 + $0x30] sm:$0xff] (!%p5621_p0) }
  0x7b   : > { %445 = vst [vmem:[#allocation2 + $0x20] sm:$0xff] (!%p5621_p0), %v437_v4  ;;  %446 = vst [vmem:[#allocation2 + $0x28] sm:$0xff] (!%p5621_p0), %v438_v5  ;;  %v440_v7 = vld [vmem:[%s8778_s0 + $0x38] sm:$0xff] (!%p5621_p0) }
  0x7c   : > { %447 = vst [vmem:[#allocation2 + $0x30] sm:$0xff] (!%p5621_p0), %v439_v6  ;;  %448 = vst [vmem:[#allocation2 + $0x38] sm:$0xff] (!%p5621_p0), %v440_v7 }
  0x7f PF: > { %v6310_v20 = vld [vmem:[%s7228_s3 + $0x4] ss:$24 sps:$4 sm:$0xff]   ;;  %v6312_v21 = vld [vmem:[%s7228_s3] ss:$24 sps:$4 sm:$0xff]   ;;  %v6313_v22 = vld [vmem:[%s7228_s3 + $0x34] ss:$24 sps:$4 sm:$0xff]  }
  0x80   : > { %v449_v8 = vld [vmem:[#allocation2] sm:$0xff]  ;;  %v450_v9 = vld [vmem:[#allocation2 + $0x8] sm:$0xff]  ;;  %1160 = vmatprep.subr.bf16.mxu0 %v6310_v20  ;;  %vm7015_vm0 = vmmov 0   ;;  %vm1410_vm1 = vcmask 523264   ;;  %vm1458_vm2 = vcmask 130048   ;;  %vm1660_vm3 = vcmask 1048064  }
  0x81   : > { %v461_v11 = vadd.f32 %v450_v9, %v449_v8  ;;  %v7280_v13 = vld [vmem:[#allocation2 + $0x10] sm:$0xff]  ;;  %v7282_v14 = vld [vmem:[#allocation2 + $0x18] sm:$0xff]  ;;  %1161 = vmatpush1.bf16.msra.mxu0 %v6312_v21  ;;  %p6022_p7 = scmp.ne.s32.totalorder %s7081_s9, 1 }
  0x82   : > { %v453_v10 = vld [vmem:[#allocation2 + $0x20] sm:$0xff]  ;;  %v454_v12 = vld [vmem:[#allocation2 + $0x28] sm:$0xff]  ;;  %v464_v18 = vadd.f32 %v7282_v14, %v7280_v13  ;;  %1162 = vmatprep.subr.bf16.mxu0 %v6313_v22 }
  0x83   : > { %v467_v15 = vadd.f32 %v454_v12, %v453_v10  ;;  %v7284_v16 = vld [vmem:[#allocation2 + $0x30] sm:$0xff]  ;;  %v7286_v17 = vld [vmem:[#allocation2 + $0x38] sm:$0xff]  ;;  %462 = vadd.xlane.f32.xlu0 %v461_v11 }
  0x84   : > { %v470_v19 = vadd.f32 %v7286_v17, %v7284_v16  ;;  %v6315_v23 = vld [vmem:[%s7228_s3 + $0x30] ss:$24 sps:$4 sm:$0xff]   ;;  %v6316_v24 = vld [vmem:[%s7228_s3 + $0x64] ss:$24 sps:$4 sm:$0xff]   ;;  %v6318_v25 = vld [vmem:[%s7228_s3 + $0x60] ss:$24 sps:$4 sm:$0xff]  }
  0x85   : > { %468 = vadd.xlane.f32.xlu1 %v467_v15  ;;  %v6319_v26 = vld [vmem:[%s7228_s3 + $0x94] ss:$24 sps:$4 sm:$0xff]   ;;  %1163 = vmatpush1.bf16.msra.mxu0 %v6315_v23  ;;  %v6321_v27 = vld [vmem:[%s7228_s3 + $0x90] ss:$24 sps:$4 sm:$0xff]   ;;  %v6322_v28 = vld [vmem:[%s7228_s3 + $0xc4] ss:$24 sps:$4 sm:$0xff]  }
  0x86   : > { %1164 = vmatprep.subr.bf16.mxu0 %v6316_v24  ;;  %v6324_v29 = vld [vmem:[%s7228_s3 + $0xc0] ss:$24 sps:$4 sm:$0xff]   ;;  %v6325_v30 = vld [vmem:[%s7228_s3 + $0xf4] ss:$24 sps:$4 sm:$0xff]   ;;  %v6327_v31 = vld [vmem:[%s7228_s3 + $0xf0] ss:$24 sps:$4 sm:$0xff]  }
  0x87   : > { %465 = vadd.xlane.f32.xlu0 %v464_v18  ;;  %v6328_v32 = vld [vmem:[%s7228_s3 + $0x124] ss:$24 sps:$4 sm:$0xff]   ;;  %v6330_v33 = vld [vmem:[%s7228_s3 + $0x120] ss:$24 sps:$4 sm:$0xff]   ;;  %v6331_v34 = vld [vmem:[%s7228_s3 + $0x154] ss:$24 sps:$4 sm:$0xff]  }
  0x88   : > { %v6333_v35 = vld [vmem:[%s7228_s3 + $0x150] ss:$24 sps:$4 sm:$0xff]   ;;  %v6334_v36 = vld [vmem:[%s7228_s3 + $0x184] ss:$24 sps:$4 sm:$0xff]   ;;  %v6336_v37 = vld [vmem:[%s7228_s3 + $0x180] ss:$24 sps:$4 sm:$0xff]  }
  0x89   : > { %471 = vadd.xlane.f32.xlu1 %v470_v19  ;;  %1165 = vmatpush1.bf16.msra.mxu0 %v6318_v25  ;;  %v6337_v38 = vld [vmem:[%s7228_s3 + $0x1b4] ss:$24 sps:$4 sm:$0xff]   ;;  %v6339_v3 = vld [vmem:[%s7228_s3 + $0x1b0] ss:$24 sps:$4 sm:$0xff]   ;;  %v6340_v4 = vld [vmem:[%s7228_s3 + $0x1e4] ss:$24 sps:$4 sm:$0xff]  }
  0x8a   : > { %1166 = vmatprep.subr.bf16.mxu0 %v6319_v26  ;;  %v6342_v5 = vld [vmem:[%s7228_s3 + $0x1e0] ss:$24 sps:$4 sm:$0xff]   ;;  %v6343_v6 = vld [vmem:[%s7228_s3 + $0x214] ss:$24 sps:$4 sm:$0xff]   ;;  %v6345_v7 = vld [vmem:[%s7228_s3 + $0x210] ss:$24 sps:$4 sm:$0xff]  }
  0x8b   : > { %v6351_v11 = vld [vmem:[%s7228_s3 + $0x270] ss:$24 sps:$4 sm:$0xff]  }
  0x8c   : > { %v6357_v15 = vld [vmem:[%s7228_s3 + $0x2d0] ss:$24 sps:$4 sm:$0xff]  }
  0x8d   : > { %1167 = vmatpush1.bf16.msra.mxu0 %v6321_v27 }
  0x8e   : > { %1168 = vmatprep.subr.bf16.mxu0 %v6322_v28 }
  0x91   : > { %1169 = vmatpush1.bf16.msra.mxu0 %v6324_v29 }
  0x92   : > { %1170 = vmatprep.subr.bf16.mxu0 %v6325_v30 }
  0x95   : > { %1171 = vmatpush1.bf16.msra.mxu0 %v6327_v31  ;;  %v7370_v31 = vld [vmem:[%s7251_s17] sm:$0xff] }
  0x96   : > { %1172 = vmatprep.subr.bf16.mxu0 %v6328_v32 }
  0x99   : > { %1173 = vmatpush1.bf16.msra.mxu0 %v6330_v33 }
  0x9a   : > { %1174 = vmatprep.subr.bf16.mxu0 %v6331_v34 }
  0x9d   : > { %1175 = vmatpush1.bf16.msra.mxu0 %v6333_v35 }
  0x9e   : > { %1176 = vmatprep.subr.bf16.mxu0 %v6334_v36  ;;  %v7377_v36 = vld [vmem:[%s7251_s17 + $0x8] sm:$0xff] }
  0xa1   : > { %1177 = vmatpush1.bf16.msra.mxu0 %v6336_v37 }
  0xa2   : > { %1178 = vmatprep.subr.bf16.mxu0 %v6337_v38 }
  0xa5   : > { %1179 = vmatpush1.bf16.msra.mxu0 %v6339_v3 }
  0xa6   : > { %1180 = vmatprep.subr.bf16.mxu0 %v6340_v4 }
  0xa9   : > { %1181 = vmatpush1.bf16.msra.mxu0 %v6342_v5 }
  0xaa   : > { %1182 = vmatprep.subr.bf16.mxu0 %v6343_v6 }
  0xad   : > { %1183 = vmatpush1.bf16.msra.mxu0 %v6345_v7  ;;  %v6363_v7 = vld [vmem:[%s7228_s3 + $0x3c] ss:$24 sps:$4 sm:$0xff]  }
 0x110   : > { %v463_v39 = vpop.xlane.xlu0 %462 }
 0x111   : > { %v474_v40 = vmul.f32 0.00390625, %v463_v39 }
 0x112   : > { %v469_v41 = vpop.xlane.xlu1 %468 }
 0x113   : > { %v476_v42 = vmul.f32 0.00390625, %v469_v41  ;;  %v7311_v43 = vsub.f32 %v449_v8, %v474_v40  ;;  %v7313_v44 = vsub.f32 %v450_v9, %v474_v40  ;;  %v6346_v8 = vld [vmem:[%s7228_s3 + $0x244] ss:$24 sps:$4 sm:$0xff]   ;;  %v6348_v9 = vld [vmem:[%s7228_s3 + $0x240] ss:$24 sps:$4 sm:$0xff]  }
 0x114   : > { %v466_v47 = vpop.xlane.xlu0 %465  ;;  %1184 = vmatprep.subr.bf16.mxu0 %v6346_v8 }
 0x115   : > { %v7315_v45 = vsub.f32 %v453_v10, %v476_v42  ;;  %v7317_v46 = vsub.f32 %v454_v12, %v476_v42  ;;  %v475_v48 = vmul.f32 0.00390625, %v466_v47  ;;  %v486_v50 = vmul.f32 %v7311_v43, %v7311_v43  ;;  %v6349_v10 = vld [vmem:[%s7228_s3 + $0x274] ss:$24 sps:$4 sm:$0xff]   ;;  %1185 = vmatpush1.bf16.msra.mxu0 %v6348_v9  ;;  %v6352_v12 = vld [vmem:[%s7228_s3 + $0x2a4] ss:$24 sps:$4 sm:$0xff]  }
 0x116   : > { %v472_v49 = vpop.xlane.xlu1 %471  ;;  %v487_v51 = vmul.f32 %v7313_v44, %v7313_v44  ;;  %1186 = vmatprep.subr.bf16.mxu0 %v6349_v10  ;;  %v6361_v10 = vld [vmem:[%s7228_s3 + $0x38] ss:$24 sps:$4 sm:$0xff]  }
 0x117   : > { %v477_v52 = vmul.f32 0.00390625, %v472_v49  ;;  %v490_v53 = vmul.f32 %v7315_v45, %v7315_v45  ;;  %v491_v54 = vmul.f32 %v7317_v46, %v7317_v46  ;;  %v7328_v55 = vsub.f32 %v7280_v13, %v475_v48  ;;  %v6354_v13 = vld [vmem:[%s7228_s3 + $0x2a0] ss:$24 sps:$4 sm:$0xff]  }
 0x118   : > { %v7331_v56 = vsub.f32 %v7282_v14, %v475_v48  ;;  %v494_v57 = vadd.f32 %v487_v51, %v486_v50  ;;  %v6355_v14 = vld [vmem:[%s7228_s3 + $0x2d4] ss:$24 sps:$4 sm:$0xff]  }
 0x119   : > { %v7334_v58 = vsub.f32 %v7284_v16, %v477_v52  ;;  %v7337_v59 = vsub.f32 %v7286_v17, %v477_v52  ;;  %v500_v60 = vadd.f32 %v491_v54, %v490_v53  ;;  %v488_v61 = vmul.f32 %v7328_v55, %v7328_v55  ;;  %1187 = vmatpush1.bf16.msra.mxu0 %v6351_v11  ;;  %v6360_v16 = vld [vmem:[%s7228_s3 + $0xc] ss:$24 sps:$4 sm:$0xff]  }
 0x11a   : > { %495 = vadd.xlane.f32.xlu0 %v494_v57  ;;  %v489_v62 = vmul.f32 %v7331_v56, %v7331_v56  ;;  %1188 = vmatprep.subr.bf16.mxu0 %v6352_v12  ;;  %v527_v17 = vlaneseq  ;;  %v6366_v11 = vld [vmem:[%s7228_s3 + $0x6c] ss:$24 sps:$4 sm:$0xff]  }
 0x11b   : > { %v492_v63 = vmul.f32 %v7334_v58, %v7334_v58  ;;  %v493_v0 = vmul.f32 %v7337_v59, %v7337_v59 }
 0x11c   : > { %v497_v1 = vadd.f32 %v489_v62, %v488_v61  ;;  %v7361_v21 = vshrl.u32 %v527_v17, 7  ;;  %v6367_v17 = vld [vmem:[%s7228_s3 + $0x98] ss:$24 sps:$4 sm:$0xff]  }
 0x11d   : > { %v503_v2 = vadd.f32 %v493_v0, %v492_v63  ;;  %1189 = vmatpush1.bf16.msra.mxu0 %v6354_v13 }
 0x11e   : > { %501 = vadd.xlane.f32.xlu0 %v500_v60  ;;  %498 = vadd.xlane.f32.xlu1 %v497_v1  ;;  %v7364_v28 = vsub.s32 0, %v7361_v21  ;;  %v7367_v29 = vsub.s32 4, %v7361_v21 }
 0x11f   : > { %1190 = vmatprep.subr.bf16.mxu0 %v6355_v14  ;;  %v6364_v14 = vld [vmem:[%s7228_s3 + $0x68] ss:$24 sps:$4 sm:$0xff]  }
 0x120   : > { %8811 = vst [vmem:[#allocation12_spill] sm:$0xff] %v7364_v28  ;;  %8812 = vst [vmem:[#allocation13_spill] sm:$0xff] %v7367_v29  ;;  %v534_v34 = vrot.slane %v7370_v31, %v7367_v29  ;;  %v530_v35 = vrot.slane %v7370_v31, %v7364_v28  ;;  %v561_v39 = vrot.slane %v7377_v36, %v7367_v29 }
 0x121   : > { %1191 = vmatpush1.bf16.msra.mxu0 %v6357_v15  ;;  %v557_v41 = vrot.slane %v7377_v36, %v7364_v28 }
 0x122   : > { %504 = vadd.xlane.f32.xlu1 %v503_v2  ;;  %1213 = vmatprep.subr.bf16.mxu0 %v6360_v16  ;;  %v544_v38 = vrot.slane %v534_v34, %v7364_v28  ;;  %v540_v40 = vrot.slane %v530_v35, %v7364_v28  ;;  %v571_v50 = vrot.slane %v561_v39, %v7364_v28  ;;  %v6369_v16 = vld [vmem:[%s7228_s3 + $0x9c] ss:$24 sps:$4 sm:$0xff]   ;;  %v6390_v34 = vld [vmem:[%s7228_s3 + $0x1ec] ss:$24 sps:$4 sm:$0xff]   ;;  %v6388_v35 = vld [vmem:[%s7228_s3 + $0x1e8] ss:$24 sps:$4 sm:$0xff]  }
 0x123   : > { %v567_v52 = vrot.slane %v557_v41, %v7364_v28  ;;  %v6396_v39 = vld [vmem:[%s7228_s3 + $0x24c] ss:$24 sps:$4 sm:$0xff]   ;;  %v6399_v41 = vld [vmem:[%s7228_s3 + $0x27c] ss:$24 sps:$4 sm:$0xff]  }
 0x1a7   : > { %v496_v18 = vpop.xlane.xlu0 %495 }
 0x1a8   : > { %v506_v19 = vmul.f32 0.00390625, %v496_v18  ;;  %v6372_v18 = vld [vmem:[%s7228_s3 + $0xcc] ss:$24 sps:$4 sm:$0xff]  }
 0x1aa   : > { %v510_v20 = vadd.f32 1e-05, %v506_v19  ;;  %v6370_v19 = vld [vmem:[%s7228_s3 + $0xc8] ss:$24 sps:$4 sm:$0xff]  }
 0x1ab   : > { %v499_v22 = vpop.xlane.xlu1 %498  ;;  %v502_v23 = vpop.xlane.xlu0 %501 }
 0x1ac   : > { %6694 = vrsqrt.f32 %v510_v20  ;;  %v507_v24 = vmul.f32 0.00390625, %v499_v22  ;;  %v508_v25 = vmul.f32 0.00390625, %v502_v23  ;;  %v6375_v20 = vld [vmem:[%s7228_s3 + $0xfc] ss:$24 sps:$4 sm:$0xff]   ;;  %v6373_v22 = vld [vmem:[%s7228_s3 + $0xf8] ss:$24 sps:$4 sm:$0xff]  }
 0x1ad   : > { %v6378_v23 = vld [vmem:[%s7228_s3 + $0x12c] ss:$24 sps:$4 sm:$0xff]  }
 0x1ae   : > { %v511_v26 = vadd.f32 1e-05, %v507_v24  ;;  %v512_v27 = vadd.f32 1e-05, %v508_v25  ;;  %v6376_v24 = vld [vmem:[%s7228_s3 + $0x128] ss:$24 sps:$4 sm:$0xff]  }
 0x1af   : > { %v505_v30 = vpop.xlane.xlu1 %504  ;;  %v6381_v25 = vld [vmem:[%s7228_s3 + $0x15c] ss:$24 sps:$4 sm:$0xff]  }
 0x1b0   : > { %6696 = vrsqrt.f32 %v511_v26  ;;  %v509_v32 = vmul.f32 0.00390625, %v505_v30  ;;  %v6379_v26 = vld [vmem:[%s7228_s3 + $0x158] ss:$24 sps:$4 sm:$0xff]   ;;  %v6382_v30 = vld [vmem:[%s7228_s3 + $0x188] ss:$24 sps:$4 sm:$0xff]  }
 0x1b1   : > { %6698 = vrsqrt.f32 %v512_v27  ;;  %v6384_v27 = vld [vmem:[%s7228_s3 + $0x18c] ss:$24 sps:$4 sm:$0xff]  }
 0x1b2   : > { %v513_v33 = vadd.f32 1e-05, %v509_v32  ;;  %v6387_v32 = vld [vmem:[%s7228_s3 + $0x1bc] ss:$24 sps:$4 sm:$0xff]  }
 0x1b4   : > { %6700 = vrsqrt.f32 %v513_v33  ;;  %v6385_v33 = vld [vmem:[%s7228_s3 + $0x1b8] ss:$24 sps:$4 sm:$0xff]  }
 0x1b6   : > { %v6695_v37 = vpop.eup %6694 }
 0x1b7   : > { %v519_v42 = vmul.f32 %v6695_v37, %v7313_v44  ;;  %v518_v47 = vmul.f32 %v6695_v37, %v7311_v43  ;;  %v6393_v37 = vld [vmem:[%s7228_s3 + $0x21c] ss:$24 sps:$4 sm:$0xff]  }
 0x1b9   : > { %v546_v49 = vmul.f32 %v544_v38, %v519_v42  ;;  %v545_v51 = vmul.f32 %v540_v40, %v518_v47  ;;  %v6397_v42 = vld [vmem:[%s7228_s3 + $0x278] ss:$24 sps:$4 sm:$0xff]   ;;  %v6402_v47 = vld [vmem:[%s7228_s3 + $0x2ac] ss:$24 sps:$4 sm:$0xff]  }
 0x1ba   : > { %v6697_v48 = vpop.eup %6696 }
 0x1bb   : > { %v6699_v53 = vpop.eup %6698  ;;  %v521_v54 = vmul.f32 %v6697_v48, %v7331_v56  ;;  %v520_v57 = vmul.f32 %v6697_v48, %v7328_v55  ;;  %v573_v43 = vadd.f32 %v571_v50, %v546_v49  ;;  %v572_v63 = vadd.f32 %v567_v52, %v545_v51  ;;  %v6400_v48 = vld [vmem:[%s7228_s3 + $0x2a8] ss:$24 sps:$4 sm:$0xff]   ;;  %v6405_v49 = vld [vmem:[%s7228_s3 + $0x2dc] ss:$24 sps:$4 sm:$0xff]  }
 0x1bc   : > { %v523_v60 = vmul.f32 %v6699_v53, %v7317_v46  ;;  %v522_v56 = vmul.f32 %v6699_v53, %v7315_v45  ;;  %v6358_v46 = vld [vmem:[%s7228_s3 + $0x8] ss:$24 sps:$4 sm:$0xff]   ;;  %v6408_v51 = vld [vmem:[%s7228_s3 + $0x14] ss:$24 sps:$4 sm:$0xff]   ;;  %v6411_v53 = vld [vmem:[%s7228_s3 + $0x44] ss:$24 sps:$4 sm:$0xff]  }
 0x1bd   : > { %v548_v61 = vmul.f32 %v544_v38, %v521_v54  ;;  %v547_v44 = vmul.f32 %v540_v40, %v520_v57  ;;  %v6409_v54 = vld [vmem:[%s7228_s3 + $0x40] ss:$24 sps:$4 sm:$0xff]   ;;  %v6414_v57 = vld [vmem:[%s7228_s3 + $0x74] ss:$24 sps:$4 sm:$0xff]  }
 0x1be   : > { %v6701_v62 = vpop.eup %6700  ;;  %v550_v0 = vmul.f32 %v544_v38, %v523_v60  ;;  %v6412_v60 = vld [vmem:[%s7228_s3 + $0x70] ss:$24 sps:$4 sm:$0xff]  }
 0x1bf   : > { %v575_v1 = vadd.f32 %v571_v50, %v548_v61  ;;  %v574_v2 = vadd.f32 %v567_v52, %v547_v44  ;;  %v525_v3 = vmul.f32 %v6701_v62, %v7337_v59  ;;  %v524_v4 = vmul.f32 %v6701_v62, %v7334_v58  ;;  %v6417_v61 = vld [vmem:[%s7228_s3 + $0xa4] ss:$24 sps:$4 sm:$0xff]   ;;  %v6415_v44 = vld [vmem:[%s7228_s3 + $0xa0] ss:$24 sps:$4 sm:$0xff]   ;;  %v6420_v62 = vld [vmem:[%s7228_s3 + $0xd4] ss:$24 sps:$4 sm:$0xff]  }
 0x1c0   : > { %v577_v9 = vadd.f32 %v571_v50, %v550_v0  ;;  %v549_v58 = vmul.f32 %v540_v40, %v522_v56  ;;  %v6421_v0 = vld [vmem:[%s7228_s3 + $0x100] ss:$24 sps:$4 sm:$0xff]   ;;  %v6432_v56 = vld [vmem:[%s7228_s3 + $0x194] ss:$24 sps:$4 sm:$0xff]  }
 0x1c1   : > { %v7395_v55 = vpack.c.bf16 %v575_v1, %v573_v43  ;;  %v7398_v5 = vpack.c.bf16 %v574_v2, %v572_v63  ;;  %v552_v6 = vmul.f32 %v544_v38, %v525_v3  ;;  %v551_v8 = vmul.f32 %v540_v40, %v524_v4  ;;  %v6391_v38 = vld [vmem:[%s7228_s3 + $0x218] ss:$24 sps:$4 sm:$0xff]   ;;  %v6394_v40 = vld [vmem:[%s7228_s3 + $0x248] ss:$24 sps:$4 sm:$0xff]   ;;  %v6423_v63 = vld [vmem:[%s7228_s3 + $0x104] ss:$24 sps:$4 sm:$0xff]  }
 0x1c2   : > { %v576_v13 = vadd.f32 %v567_v52, %v549_v58  ;;  %v6418_v43 = vld [vmem:[%s7228_s3 + $0xd0] ss:$24 sps:$4 sm:$0xff]   ;;  %v6426_v1 = vld [vmem:[%s7228_s3 + $0x134] ss:$24 sps:$4 sm:$0xff]   ;;  %v6429_v3 = vld [vmem:[%s7228_s3 + $0x164] ss:$24 sps:$4 sm:$0xff]  }
 0x1c3   : > { %1192 = vmatprep.mubr.bf16.mxu0 %v7395_v55  ;;  %v579_v59 = vadd.f32 %v571_v50, %v552_v6  ;;  %v578_v12 = vadd.f32 %v567_v52, %v551_v8  ;;  %v6403_v50 = vld [vmem:[%s7228_s3 + $0x2d8] ss:$24 sps:$4 sm:$0xff]   ;;  %v6444_v58 = vld [vmem:[%s7228_s3 + $0x254] ss:$24 sps:$4 sm:$0xff]  }
 0x1c4   : > { %1193 = vmatmul.mubr.bf16.vlgmr.msra.gmra.mrb[0].mxu0 %v7398_v5  ;;  %v6406_v52 = vld [vmem:[%s7228_s3 + $0x10] ss:$24 sps:$4 sm:$0xff]   ;;  %v6427_v4 = vld [vmem:[%s7228_s3 + $0x160] ss:$24 sps:$4 sm:$0xff]  }
 0x1c5   : > { %1214 = vmatpush1.bf16.msra.mxu0 %v6358_v46  ;;  %v7403_v45 = vpack.c.bf16 %v579_v59, %v577_v9  ;;  %v7409_v15 = vpack.c.bf16 %v578_v12, %v576_v13  ;;  %v6424_v2 = vld [vmem:[%s7228_s3 + $0x130] ss:$24 sps:$4 sm:$0xff]   ;;  %v6435_v46 = vld [vmem:[%s7228_s3 + $0x1c4] ss:$24 sps:$4 sm:$0xff]   ;;  %v6433_v6 = vld [vmem:[%s7228_s3 + $0x1c0] ss:$24 sps:$4 sm:$0xff]  }
 0x1c6   : > { %1215 = vmatprep.subr.bf16.mxu0 %v6363_v7  ;;  %v6438_v7 = vld [vmem:[%s7228_s3 + $0x1f4] ss:$24 sps:$4 sm:$0xff]   ;;  %v6436_v8 = vld [vmem:[%s7228_s3 + $0x1f0] ss:$24 sps:$4 sm:$0xff]   ;;  %v6441_v9 = vld [vmem:[%s7228_s3 + $0x224] ss:$24 sps:$4 sm:$0xff]  }
 0x1c7   : > { %1202 = vmatprep.mubr.bf16.mxu0 %v7403_v45  ;;  %v6439_v59 = vld [vmem:[%s7228_s3 + $0x220] ss:$24 sps:$4 sm:$0xff]   ;;  %v6450_v13 = vld [vmem:[%s7228_s3 + $0x2b4] ss:$24 sps:$4 sm:$0xff]  }
 0x1c8   : > { %v6445_v12 = vld [vmem:[%s7228_s3 + $0x280] ss:$24 sps:$4 sm:$0xff]  }
 0x1c9   : > { %1216 = vmatpush1.bf16.msra.mxu0 %v6361_v10  ;;  %v6442_v10 = vld [vmem:[%s7228_s3 + $0x250] ss:$24 sps:$4 sm:$0xff]  }
 0x1ca   : > { %1217 = vmatprep.subr.bf16.mxu0 %v6366_v11  ;;  %v6447_v11 = vld [vmem:[%s7228_s3 + $0x284] ss:$24 sps:$4 sm:$0xff]  }
 0x1cc   : > { %1203 = vmatmul.mubr.bf16.gmra.mrb[4].mxu0 %v7409_v15 }
 0x1cd   : > { %1218 = vmatpush1.bf16.msra.mxu0 %v6364_v14  ;;  %1245 = vmatprep.mubr.bf16.mxu0 %v7395_v55  ;;  %v6448_v14 = vld [vmem:[%s7228_s3 + $0x2b0] ss:$24 sps:$4 sm:$0xff]  }
 0x1ce   : > { %1219 = vmatprep.subr.bf16.mxu0 %v6369_v16  ;;  %v6453_v16 = vld [vmem:[%s7228_s3 + $0x2e4] ss:$24 sps:$4 sm:$0xff]  }
 0x1d1   : > { %1220 = vmatpush1.bf16.msra.mxu0 %v6367_v17  ;;  %v6451_v17 = vld [vmem:[%s7228_s3 + $0x2e0] ss:$24 sps:$4 sm:$0xff]  }
 0x1d2   : > { %1221 = vmatprep.subr.bf16.mxu0 %v6372_v18  ;;  %v7014_v18 = vmov 0.0  }
 0x1d3   : > { %6123 = vmatprep.subr.bf16.mxu1 %v7014_v18  ;;  %6125 = vmatprep.mubr.msk.bf16.mxu1 %vm7015_vm0, %v7014_v18 }
 0x1d5   : > { %1222 = vmatpush1.bf16.msra.mxu0 %v6370_v19  ;;  %v7485_v19 = vsub.s32 1, %v7361_v21 }
 0x1d6   : > { %1223 = vmatprep.subr.bf16.mxu0 %v6375_v20 }
 0x1d7   : > { %8813 = vst [vmem:[#allocation14_spill] sm:$0xff] %v7485_v19 }
 0x1d9   : > { %1224 = vmatpush1.bf16.msra.mxu0 %v6373_v22 }
 0x1da   : > { %1225 = vmatprep.subr.bf16.mxu0 %v6378_v23 }
 0x1dd   : > { %1226 = vmatpush1.bf16.msra.mxu0 %v6376_v24 }
 0x1de   : > { %1227 = vmatprep.subr.bf16.mxu0 %v6381_v25 }
 0x1e1   : > { %1228 = vmatpush1.bf16.msra.mxu0 %v6379_v26 }
 0x1e2   : > { %1229 = vmatprep.subr.bf16.mxu0 %v6384_v27 }
 0x1e5   : > { %1230 = vmatpush1.bf16.msra.mxu0 %v6382_v30 }
 0x1e6   : > { %1231 = vmatprep.subr.bf16.mxu0 %v6387_v32 }
 0x1e9   : > { %1232 = vmatpush1.bf16.msra.mxu0 %v6385_v33 }
 0x1ea   : > { %1233 = vmatprep.subr.bf16.mxu0 %v6390_v34 }
 0x1ed   : > { %1234 = vmatpush1.bf16.msra.mxu0 %v6388_v35 }
 0x1ee   : > { %1235 = vmatprep.subr.bf16.mxu0 %v6393_v37 }
 0x1f1   : > { %1236 = vmatpush1.bf16.msra.mxu0 %v6391_v38 }
 0x1f2   : > { %1237 = vmatprep.subr.bf16.mxu0 %v6396_v39 }
 0x1f5   : > { %1238 = vmatpush1.bf16.msra.mxu0 %v6394_v40 }
 0x1f6   : > { %1239 = vmatprep.subr.bf16.mxu0 %v6399_v41 }
 0x1f9   : > { %1240 = vmatpush1.bf16.msra.mxu0 %v6397_v42 }
 0x1fa   : > { %1241 = vmatprep.subr.bf16.mxu0 %v6402_v47 }
 0x1fd   : > { %1242 = vmatpush1.bf16.msra.mxu0 %v6400_v48 }
 0x1fe   : > { %1243 = vmatprep.subr.bf16.mxu0 %v6405_v49 }
 0x201   : > { %1244 = vmatpush1.bf16.msra.mxu0 %v6403_v50  ;;  %v1352_v50 = vrot.slane %v7377_v36, %v7485_v19 }
 0x202   : > { %1266 = vmatprep.subr.bf16.mxu0 %v6408_v51 }
 0x204   : > { %1246 = vmatmul.mubr.bf16.vlgmr.msra.gmra.mrb[8].mxu0 %v7398_v5 }
 0x205   : > { %1255 = vmatprep.mubr.bf16.mxu0 %v7403_v45  ;;  %1267 = vmatpush1.bf16.msra.mxu0 %v6406_v52  ;;  %v1362_v52 = vrot.slane %v1352_v50, %v7485_v19 }
 0x206   : > { %1268 = vmatprep.subr.bf16.mxu0 %v6411_v53 }
 0x209   : > { %1269 = vmatpush1.bf16.msra.mxu0 %v6409_v54 }
 0x20a   : > { %1270 = vmatprep.subr.bf16.mxu0 %v6414_v57 }
 0x20c   : > { %1256 = vmatmul.mubr.bf16.gmra.mrb[12].mxu0 %v7409_v15 }
 0x20d   : > { %1271 = vmatpush1.bf16.msra.mxu0 %v6412_v60  ;;  %1298 = vmatprep.mubr.bf16.mxu0 %v7395_v55  ;;  %v6430_v55 = vld [vmem:[%s7228_s3 + $0x190] ss:$24 sps:$4 sm:$0xff]   ;;  %s7016_s3 = smov 64  }
 0x20e   : > { %1272 = vmatprep.subr.bf16.mxu0 %v6417_v61 }
 0x211   : > { %1273 = vmatpush1.bf16.msra.mxu0 %v6415_v44 }
 0x212   : > { %1274 = vmatprep.subr.bf16.mxu0 %v6420_v62 }
 0x215   : > { %1275 = vmatpush1.bf16.msra.mxu0 %v6418_v43 }
 0x216   : > { %1276 = vmatprep.subr.bf16.mxu0 %v6423_v63 }
 0x219   : > { %1277 = vmatpush1.bf16.msra.mxu0 %v6421_v0 }
 0x21a   : > { %1278 = vmatprep.subr.bf16.mxu0 %v6426_v1 }
 0x21d   : > { %1279 = vmatpush1.bf16.msra.mxu0 %v6424_v2 }
 0x21e   : > { %1280 = vmatprep.subr.bf16.mxu0 %v6429_v3 }
 0x221   : > { %1281 = vmatpush1.bf16.msra.mxu0 %v6427_v4 }
 0x222   : > { %1282 = vmatprep.subr.bf16.mxu0 %v6432_v56 }
 0x225   : > { %1283 = vmatpush1.bf16.msra.mxu0 %v6430_v55 }
 0x226   : > { %1284 = vmatprep.subr.bf16.mxu0 %v6435_v46 }
 0x229   : > { %1285 = vmatpush1.bf16.msra.mxu0 %v6433_v6 }
 0x22a   : > { %1286 = vmatprep.subr.bf16.mxu0 %v6438_v7 }
 0x22d   : > { %1287 = vmatpush1.bf16.msra.mxu0 %v6436_v8 }
 0x22e   : > { %1288 = vmatprep.subr.bf16.mxu0 %v6441_v9 }
 0x231   : > { %1289 = vmatpush1.bf16.msra.mxu0 %v6439_v59  ;;  %v459_v59 = vld [vmem:[%s7251_s17 + $0x10] sm:$0xff] }
 0x232   : > { %1290 = vmatprep.subr.bf16.mxu0 %v6444_v58  ;;  %v1383_v58 = vrot.slane %v459_v59, %v7485_v19 }
 0x235   : > { %1291 = vmatpush1.bf16.msra.mxu0 %v6442_v10 }
 0x236   : > { %1292 = vmatprep.subr.bf16.mxu0 %v6447_v11  ;;  %v1393_v11 = vrot.slane %v1383_v58, %v7485_v19 }
 0x239   : > { %1293 = vmatpush1.bf16.msra.mxu0 %v6445_v12 }
 0x23a   : > { %1294 = vmatprep.subr.bf16.mxu0 %v6450_v13 }
 0x23d   : > { %1295 = vmatpush1.bf16.msra.mxu0 %v6448_v14 }
 0x23e   : > { %1296 = vmatprep.subr.bf16.mxu0 %v6453_v16 }
 0x241   : > { %1297 = vmatpush1.bf16.msra.mxu0 %v6451_v17 }
 0x242   : > { %6105 = vmatprep.subr.bf16.mxu0 %v7014_v18 }
 0x244   : > { %1299 = vmatmul.mubr.bf16.vlgmr.msra.gmra.mrb[16].mxu0 %v7398_v5  ;;  %v7488_v5 = vsub.s32 5, %v7361_v21 }
 0x245   : > { %1308 = vmatprep.mubr.bf16.mxu0 %v7403_v45  ;;  %v1322_v45 = vrot.slane %v7370_v31, %v7485_v19 }
 0x246   : > { %8814 = vst [vmem:[#allocation15_spill] sm:$0xff] %v7488_v5  ;;  %v1356_v51 = vrot.slane %v7377_v36, %v7488_v5  ;;  %v1387_v10 = vrot.slane %v459_v59, %v7488_v5 }
 0x247   : > { %v1332_v20 = vrot.slane %v1322_v45, %v7485_v19 }
 0x248   : > { %v1366_v54 = vrot.slane %v1356_v51, %v7485_v19  ;;  %v1397_v13 = vrot.slane %v1387_v10, %v7485_v19 }
 0x24c   : > { %1309 = vmatmul.mubr.bf16.gmra.mrb[20].mxu0 %v7409_v15  ;;  %v1326_v15 = vrot.slane %v7370_v31, %v7488_v5 }
 0x24d   : > { %6107 = vmatprep.mubr.msk.bf16.mxu0 %vm7015_vm0, %v7014_v18 }
 0x24e   : > { %v1336_v23 = vrot.slane %v1326_v15, %v7485_v19 }
 0x297   : > { %v1194_v22 = vpop.f32.mrb[0].mxu0 }
 0x298   : > { %v1196_v24 = vpop.f32.mrb[1].mxu0  ;;  %v1337_v26 = vadd.f32 %v1332_v20, %v1194_v22 }
 0x299   : > { %v1198_v25 = vpop.f32.mrb[2].mxu0  ;;  %v1338_v32 = vadd.f32 %v1336_v23, %v1196_v24 }
 0x29a   : > { %v1339_v27 = vadd.f32 %v1332_v20, %v1198_v25  ;;  %v1200_v30 = vpop.f32.mrb[3].mxu0 }
 0x29b   : > { %v1340_v33 = vadd.f32 %v1336_v23, %v1200_v30 }
 0x29c   : > { %v7496_v34 = vpack.c.bf16 %v1339_v27, %v1337_v26 }
 0x29d   : > { %v7498_v35 = vpack.c.bf16 %v1340_v33, %v1338_v32 }
 0x29f   : > { %v1204_v37 = vpop.f32.mrb[4].mxu0 }
 0x2a0   : > { %v1341_v38 = vadd.f32 %v1332_v20, %v1204_v37  ;;  %v1206_v39 = vpop.f32.mrb[5].mxu0 }
 0x2a1   : > { %v1208_v31 = vpop.f32.mrb[6].mxu0  ;;  %v1342_v42 = vadd.f32 %v1336_v23, %v1206_v39 }
 0x2a2   : > { %v1343_v40 = vadd.f32 %v1332_v20, %v1208_v31  ;;  %v1210_v41 = vpop.f32.mrb[7].mxu0 }
 0x2a3   : > { %v1344_v47 = vadd.f32 %v1336_v23, %v1210_v41 }
 0x2a4   : > { %v7500_v48 = vpack.c.bf16 %v1343_v40, %v1341_v38 }
 0x2a5   : > { %v7502_v49 = vpack.c.bf16 %v1344_v47, %v1342_v42 }
 0x2d7   : > { %v1247_v53 = vpop.f32.mrb[8].mxu0 }
 0x2d8   : > { %v1249_v57 = vpop.f32.mrb[9].mxu0  ;;  %v1367_v61 = vadd.f32 %v1362_v52, %v1247_v53 }
 0x2d9   : > { %v1251_v60 = vpop.f32.mrb[10].mxu0  ;;  %v1368_v43 = vadd.f32 %v1366_v54, %v1249_v57 }
 0x2da   : > { %v1369_v44 = vadd.f32 %v1362_v52, %v1251_v60  ;;  %v1253_v62 = vpop.f32.mrb[11].mxu0 }
 0x2db   : > { %v1370_v63 = vadd.f32 %v1366_v54, %v1253_v62 }
 0x2dc   : > { %v7510_v0 = vpack.c.bf16 %v1369_v44, %v1367_v61 }
 0x2dd   : > { %v7512_v1 = vpack.c.bf16 %v1370_v63, %v1368_v43 }
 0x2de   : > { %v1415_v36 = vsel %vm1410_vm1, %v7510_v0, 0 }
 0x2df   : > { %v1257_v2 = vpop.f32.mrb[12].mxu0  ;;  %6106 = vmatpush3.bf16.xpose.msra.mxu0 %v1415_v36 }
 0x2e0   : > { %v1371_v3 = vadd.f32 %v1362_v52, %v1257_v2  ;;  %v1259_v4 = vpop.f32.mrb[13].mxu0  ;;  %6111 = vmatprep.subr.bf16.mxu0 %v7014_v18 }
 0x2e1   : > { %v1261_v56 = vpop.f32.mrb[14].mxu0  ;;  %v1372_v6 = vadd.f32 %v1366_v54, %v1259_v4 }
 0x2e2   : > { %v1373_v55 = vadd.f32 %v1362_v52, %v1261_v56  ;;  %v1263_v46 = vpop.f32.mrb[15].mxu0 }
 0x2e3   : > { %v1374_v7 = vadd.f32 %v1366_v54, %v1263_v46 }
 0x2e4   : > { %v7517_v8 = vpack.c.bf16 %v1373_v55, %v1371_v3 }
 0x2e5   : > { %v7519_v9 = vpack.c.bf16 %v1374_v7, %v1372_v6 }
 0x2e6   : > { %6108 = vmatmul.mubr.msk.bf16.vlgmr.msra.gmra.mrb[24].mxu0 %vm1410_vm1, %v7496_v34 }
 0x2e7   : > { %6113 = vmatprep.mubr.msk.bf16.mxu0 %vm7015_vm0, %v7014_v18 }
 0x317   : > { %v1300_v12 = vpop.f32.mrb[16].mxu0 }
 0x318   : > { %v1302_v14 = vpop.f32.mrb[17].mxu0  ;;  %v1398_v17 = vadd.f32 %v1393_v11, %v1300_v12 }
 0x319   : > { %v1304_v16 = vpop.f32.mrb[18].mxu0  ;;  %v1399_v20 = vadd.f32 %v1397_v13, %v1302_v14 }
 0x31a   : > { %v1400_v45 = vadd.f32 %v1393_v11, %v1304_v16  ;;  %v1306_v15 = vpop.f32.mrb[19].mxu0 }
 0x31b   : > { %v1401_v22 = vadd.f32 %v1397_v13, %v1306_v15 }
 0x31c   : > { %v7530_v23 = vpack.c.bf16 %v1400_v45, %v1398_v17 }
 0x31d   : > { %v7532_v24 = vpack.c.bf16 %v1401_v22, %v1399_v20 }
 0x31e   : > { %6112 = vmatpush3.bf16.msra.mxu0 %v7530_v23 }
 0x31f   : > { %v1310_v25 = vpop.f32.mrb[20].mxu0  ;;  %6117 = vmatprep.subr.bf16.mxu0 %v7014_v18 }
 0x320   : > { %v1402_v26 = vadd.f32 %v1393_v11, %v1310_v25  ;;  %v1312_v27 = vpop.f32.mrb[21].mxu0 }
 0x321   : > { %v1403_v30 = vadd.f32 %v1397_v13, %v1312_v27  ;;  %v1314_v32 = vpop.f32.mrb[22].mxu0 }
 0x322   : > { %v1404_v33 = vadd.f32 %v1393_v11, %v1314_v32  ;;  %v1316_v37 = vpop.f32.mrb[23].mxu0 }
 0x323   : > { %v1405_v38 = vadd.f32 %v1397_v13, %v1316_v37 }
 0x324   : > { %v7536_v39 = vpack.c.bf16 %v1404_v33, %v1402_v26 }
 0x325   : > { %v7538_v31 = vpack.c.bf16 %v1405_v38, %v1403_v30 }
 0x3b9   : > { %v1451_v40 = vpop.f32.mrb[24].mxu0 }
 0x3ba   : > { %v6109_v41 = vpop.f32.mrb[25].mxu0  ;;  %v1459_v42 = vsel %vm1458_vm2, %v1451_v40, -inf }
 0x3bb   : > { %1460 = vmax.xlane.f32.xlu0 %v1459_v42  ;;  %v1454_v47 = vpop.f32.mrb[26].mxu0 }
 0x3bc   : > { %v6110_v50 = vpop.f32.mrb[27].mxu0  ;;  %v1462_v51 = vsel %vm1458_vm2, %v1454_v47, -inf }
 0x3bd   : > { %1463 = vmax.xlane.f32.xlu1 %v1462_v51 }
 0x448   : > { %v1461_v52 = vpop.xlane.xlu0 %1460 }
 0x449   : > { %v1465_v53 = vsub.f32 %v1451_v40, %v1461_v52 }
 0x44a   : > { %v1464_v54 = vpop.xlane.xlu1 %1463 }
 0x44b   : > { %v1467_v57 = vmul.f32 1.442695, %v1465_v53  ;;  %v1466_v60 = vsub.f32 %v1454_v47, %v1464_v54 }
 0x44d   : > { %6702 = vpow2.f32 %v1467_v57  ;;  %v1469_v61 = vmul.f32 1.442695, %v1466_v60 }
 0x44f   : > { %6704 = vpow2.f32 %v1469_v61  ;;  %v1667_v61 = vsel %vm1410_vm1, %v7512_v1, 0 }
 0x457   : > { %v6703_v44 = vpop.eup %6702 }
 0x458   : > { %v1471_v62 = vsel %vm1458_vm2, %v6703_v44, 0.0 }
 0x459   : > { %v6705_v43 = vpop.eup %6704  ;;  %1472 = vadd.xlane.f32.xlu0 %v1471_v62  ;;  %v2167_v62 = vsel %vm1410_vm1, %v7519_v9, 0 }
 0x45a   : > { %v1474_v63 = vsel %vm1458_vm2, %v6705_v43, 0.0 }
 0x45b   : > { %1475 = vadd.xlane.f32.xlu1 %v1474_v63 }
 0x46c   : > { %1529 = vrot.lane.b32.xlu1 %v7496_v34, %s7016_s3 }
 0x46f   : > { %1532 = vrot.lane.b32.xlu0 %v7510_v0, %s7016_s3  ;;  %v1917_v0 = vsel %vm1410_vm1, %v7517_v8, 0 }
 0x4e6   : > { %v1473_v36 = vpop.xlane.xlu0 %1472 }
 0x4e7   : > { %6706 = vrcp.f32 %v1473_v36 }
 0x4e8   : > { %v1476_v2 = vpop.xlane.xlu1 %1475 }
 0x4e9   : > { %6708 = vrcp.f32 %v1476_v2 }
 0x4ea   : > { %v1533_v46 = vpop.permute.xlu0 %1532 }
 0x4eb   : > { %v1538_v7 = vsel %vm1410_vm1, %v1533_v46, 0 }
 0x4ec   : > { %v1530_v34 = vpop.permute.xlu1 %1529 }
 0x4f1   : > { %v6707_v3 = vpop.eup %6706 }
 0x4f2   : > { %v1479_v56 = vmul.f32 %v6707_v3, %v6703_v44 }
 0x4f3   : > { %v6709_v4 = vpop.eup %6708 }
 0x4f4   : > { %v1480_v55 = vmul.f32 %v6709_v4, %v6705_v43 }
 0x4f6   : > { %v1481_v6 = vpack.c.bf16 %v1480_v55, %v1479_v56 }
 0x4f8   : > { %6114 = vmatmul.mubr.msk.bf16.vlgmr.msra.gmra.mrb[28].mxu0 %vm1458_vm2, %v1481_v6 }
 0x4f9   : > { %6118 = vmatpush3.bf16.xpose.msra.mxu0 %v1538_v7  ;;  %6119 = vmatprep.mubr.msk.bf16.mxu0 %vm7015_vm0, %v7014_v18 }
 0x4fa   : > { %6153 = vmatprep.subr.bf16.mxu0 %v7014_v18 }
 0x500   : > { %6120 = vmatmul.mubr.msk.bf16.vlgmr.msra.gmra.mrb[32].mxu0 %vm1410_vm1, %v1530_v34 }
 0x501   : > { %6154 = vmatpush3.bf16.xpose.msra.mxu0 %v1917_v0  ;;  %6155 = vmatprep.mubr.msk.bf16.mxu0 %vm7015_vm0, %v7014_v18 }
 0x502   : > { %6165 = vmatprep.subr.bf16.mxu0 %v7014_v18 }
 0x508   : > { %6156 = vmatmul.mubr.msk.bf16.vlgmr.msra.gmra.mrb[36].mxu0 %vm1410_vm1, %v7500_v48 }
 0x509   : > { %6167 = vmatprep.mubr.msk.bf16.mxu0 %vm7015_vm0, %v7014_v18 }
 0x5cb   : > { %v1519_v59 = vpop.f32.mrb[28].mxu0 }
 0x5cc   : > { %1526 = vst.msk [vmem:[#allocation3] sm:$0xff] %vm1410_vm1, %v1519_v59  ;;  %v6115_v58 = vpop.f32.mrb[29].mxu0 }
 0x5cd   : > { %v1522_v10 = vpop.f32.mrb[30].mxu0 }
 0x5ce   : > { %1527 = vst.msk [vmem:[#allocation3 + $0x10] sm:$0xff] %vm1410_vm1, %v1522_v10  ;;  %v6116_v11 = vpop.f32.mrb[31].mxu0 }
 0x5d3   : > { %v1574_v12 = vpop.f32.mrb[32].mxu0 }
 0x5d4   : > { %v6121_v13 = vpop.f32.mrb[33].mxu0  ;;  %v1581_v14 = vsel %vm1458_vm2, %v1574_v12, -inf }
 0x5d5   : > { %1582 = vmax.xlane.f32.xlu1 %v1581_v14  ;;  %v1577_v16 = vpop.f32.mrb[34].mxu0 }
 0x5d6   : > { %v6122_v17 = vpop.f32.mrb[35].mxu0  ;;  %v1584_v45 = vsel %vm1458_vm2, %v1577_v16, -inf }
 0x5d7   : > { %1585 = vmax.xlane.f32.xlu0 %v1584_v45 }
 0x5db   : > { %v7567_v15 = vpop.f32.mrb[36].mxu0 }
 0x5dc   : > { %v6157_v20 = vpop.f32.mrb[37].mxu0 }
 0x5dd   : > { %v7569_v22 = vpop.f32.mrb[38].mxu0 }
 0x5de   : > { %v6158_v25 = vpop.f32.mrb[39].mxu0 }
 0x662   : > { %v1583_v26 = vpop.xlane.xlu1 %1582 }
 0x663   : > { %v1587_v27 = vsub.f32 %v1574_v12, %v1583_v26 }
 0x664   : > { %v1586_v30 = vpop.xlane.xlu0 %1585 }
 0x665   : > { %v1589_v32 = vmul.f32 1.442695, %v1587_v27  ;;  %v1588_v33 = vsub.f32 %v1577_v16, %v1586_v30 }
 0x667   : > { %6710 = vpow2.f32 %v1589_v32  ;;  %v1591_v37 = vmul.f32 1.442695, %v1588_v33 }
 0x669   : > { %6712 = vpow2.f32 %v1591_v37 }
 0x671   : > { %v6711_v38 = vpop.eup %6710 }
 0x672   : > { %v1593_v40 = vsel %vm1458_vm2, %v6711_v38, 0.0 }
 0x673   : > { %v6713_v41 = vpop.eup %6712  ;;  %1594 = vadd.xlane.f32.xlu0 %v1593_v40 }
 0x674   : > { %v1596_v42 = vsel %vm1458_vm2, %v6713_v41, 0.0 }
 0x675   : > { %1597 = vadd.xlane.f32.xlu1 %v1596_v42 }
 0x689   : > { %1605 = vrot.lane.b32.xlu0 %v7530_v23, %s7016_s3 }
 0x68d   : > { %1780 = vrot.lane.b32.xlu0 %v7498_v35, %s7016_s3 }
 0x691   : > { %2033 = vrot.lane.b32.xlu0 %v7517_v8, %s7016_s3 }
 0x695   : > { %2030 = vrot.lane.b32.xlu0 %v7500_v48, %s7016_s3 }
 0x699   : > { %2280 = vrot.lane.b32.xlu0 %v7502_v49, %s7016_s3 }
 0x700   : > { %v1595_v47 = vpop.xlane.xlu0 %1594 }
 0x701   : > { %6714 = vrcp.f32 %v1595_v47 }
 0x702   : > { %v1598_v50 = vpop.xlane.xlu1 %1597 }
 0x703   : > { %6716 = vrcp.f32 %v1598_v50 }
 0x704   : > { %v1606_v51 = vpop.permute.xlu0 %1605 }
 0x705   : > { %6124 = vmatpush3.bf16.msra.mxu1 %v1606_v51 }
 0x706   : > { %6129 = vmatprep.subr.bf16.mxu1 %v7014_v18 }
 0x708   : > { %v7584_v23 = vpop.permute.xlu0 %1780 }
 0x70b   : > { %v6715_v52 = vpop.eup %6714 }
 0x70c   : > { %v2034_v53 = vpop.permute.xlu0 %2033  ;;  %v1601_v48 = vmul.f32 %v6715_v52, %v6711_v38 }
 0x70d   : > { %v6717_v54 = vpop.eup %6716  ;;  %v2039_v8 = vsel %vm1410_vm1, %v2034_v53, 0 }
 0x70e   : > { %6166 = vmatpush3.bf16.xpose.msra.mxu0 %v2039_v8  ;;  %v1602_v57 = vmul.f32 %v6717_v54, %v6713_v41 }
 0x70f   : > { %6177 = vmatprep.subr.bf16.mxu0 %v7014_v18 }
 0x710   : > { %v1603_v60 = vpack.c.bf16 %v1602_v57, %v1601_v48  ;;  %v2031_v44 = vpop.permute.xlu0 %2030 }
 0x712   : > { %6126 = vmatmul.mubr.msk.bf16.vlgmr.msra.gmra.mrb[0].mxu1 %vm1458_vm2, %v1603_v60 }
 0x713   : > { %6130 = vmatpush3.bf16.xpose.msra.mxu1 %v1667_v61  ;;  %6131 = vmatprep.mubr.msk.bf16.mxu1 %vm7015_vm0, %v7014_v18 }
 0x714   : > { %6135 = vmatprep.subr.bf16.mxu1 %v7014_v18  ;;  %v2281_v50 = vpop.permute.xlu0 %2280 }
 0x715   : > { %6168 = vmatmul.mubr.msk.bf16.vlgmr.msra.gmra.mrb[40].mxu0 %vm1410_vm1, %v2031_v44 }
 0x716   : > { %6178 = vmatpush3.bf16.xpose.msra.mxu0 %v2167_v62  ;;  %6179 = vmatprep.mubr.msk.bf16.mxu0 %vm7015_vm0, %v7014_v18 }
 0x717   : > { %6189 = vmatprep.subr.bf16.mxu0 %v7014_v18 }
 0x71a   : > { %6132 = vmatmul.mubr.msk.bf16.vlgmr.msra.gmra.mrb[4].mxu1 %vm1410_vm1, %v7498_v35 }
 0x71b   : > { %6136 = vmatpush3.bf16.msra.mxu1 %v7532_v24  ;;  %6137 = vmatprep.mubr.msk.bf16.mxu1 %vm7015_vm0, %v7014_v18 }
 0x71c   : > { %6141 = vmatprep.subr.bf16.mxu1 %v7014_v18 }
 0x71d   : > { %6180 = vmatmul.mubr.msk.bf16.vlgmr.msra.gmra.mrb[44].mxu0 %vm1410_vm1, %v7502_v49 }
 0x71e   : > { %6191 = vmatprep.mubr.msk.bf16.mxu0 %vm7015_vm0, %v7014_v18 }
 0x7e5   : > { %v7610_v43 = vpop.f32.mrb[0].mxu1 }
 0x7e6   : > { %v6127_v63 = vpop.f32.mrb[1].mxu1 }
 0x7e7   : > { %v7612_v36 = vpop.f32.mrb[2].mxu1 }
 0x7e8   : > { %v6128_v2 = vpop.f32.mrb[3].mxu1  ;;  %v7614_v35 = vpop.f32.mrb[40].mxu0 }
 0x7e9   : > { %v6169_v3 = vpop.f32.mrb[41].mxu0  ;;  %v2082_v2 = vsel %vm1458_vm2, %v7614_v35, -inf }
 0x7ea   : > { %v7616_v4 = vpop.f32.mrb[42].mxu0  ;;  %v1960_v3 = vsel %vm1458_vm2, %v7567_v15, -inf }
 0x7eb   : > { %v6170_v56 = vpop.f32.mrb[43].mxu0 }
 0x7ed   : > { %v1703_v55 = vpop.f32.mrb[4].mxu1 }
 0x7ee   : > { %v6133_v46 = vpop.f32.mrb[5].mxu1  ;;  %v1710_v6 = vsel %vm1458_vm2, %v1703_v55, -inf }
 0x7ef   : > { %1711 = vmax.xlane.f32.xlu1 %v1710_v6  ;;  %v1706_v49 = vpop.f32.mrb[6].mxu1  ;;  %v2085_v6 = vsel %vm1458_vm2, %v7616_v4, -inf }
 0x7f0   : > { %v6134_v7 = vpop.f32.mrb[7].mxu1  ;;  %v7619_v34 = vpop.f32.mrb[44].mxu0  ;;  %v1713_v58 = vsel %vm1458_vm2, %v1706_v49, -inf }
 0x7f1   : > { %v6181_v0 = vpop.f32.mrb[45].mxu0  ;;  %v2210_v56 = vsel %vm1458_vm2, %v7619_v34, -inf }
 0x7f2   : > { %v7621_v59 = vpop.f32.mrb[46].mxu0 }
 0x7f3   : > { %1714 = vmax.xlane.f32.xlu1 %v1713_v58  ;;  %v6182_v10 = vpop.f32.mrb[47].mxu0 }
 0x87c   : > { %v1712_v11 = vpop.xlane.xlu1 %1711 }
 0x87d   : > { %v1716_v12 = vsub.f32 %v1703_v55, %v1712_v11  ;;  %v1963_v55 = vsel %vm1458_vm2, %v7569_v22, -inf }
 0x87f   : > { %v1718_v13 = vmul.f32 1.442695, %v1716_v12 }
 0x880   : > { %v1715_v14 = vpop.xlane.xlu1 %1714 }
 0x881   : > { %6718 = vpow2.f32 %v1718_v13  ;;  %v1717_v16 = vsub.f32 %v1706_v49, %v1715_v14  ;;  %v2213_v49 = vsel %vm1458_vm2, %v7621_v59, -inf }
 0x883   : > { %v1720_v17 = vmul.f32 1.442695, %v1717_v16 }
 0x885   : > { %6720 = vpow2.f32 %v1720_v17 }
 0x88b   : > { %v6719_v45 = vpop.eup %6718 }
 0x88c   : > { %v1722_v20 = vsel %vm1458_vm2, %v6719_v45, 0.0 }
 0x88d   : > { %1723 = vadd.xlane.f32.xlu1 %v1722_v20 }
 0x88f   : > { %v6721_v25 = vpop.eup %6720 }
 0x890   : > { %v1725_v26 = vsel %vm1458_vm2, %v6721_v25, 0.0 }
 0x891   : > { %1726 = vadd.xlane.f32.xlu1 %v1725_v26 }
 0x8a2   : > { %1783 = vrot.lane.b32.xlu1 %v7512_v1, %s7016_s3 }
 0x8a6   : > { %2283 = vrot.lane.b32.xlu1 %v7519_v9, %s7016_s3 }
 0x91a   : > { %v1724_v27 = vpop.xlane.xlu1 %1723 }
 0x91b   : > { %6722 = vrcp.f32 %v1724_v27 }
 0x91e   : > { %v1727_v30 = vpop.xlane.xlu1 %1726 }
 0x91f   : > { %6724 = vrcp.f32 %v1727_v30 }
 0x922   : > { %v1784_v32 = vpop.permute.xlu1 %1783 }
 0x923   : > { %v1789_v1 = vsel %vm1410_vm1, %v1784_v32, 0 }
 0x925   : > { %v6723_v37 = vpop.eup %6722 }
 0x926   : > { %v2284_v33 = vpop.permute.xlu1 %2283  ;;  %v1730_v41 = vmul.f32 %v6723_v37, %v6719_v45 }
 0x927   : > { %v2289_v38 = vsel %vm1410_vm1, %v2284_v33, 0 }
 0x928   : > { %6190 = vmatpush3.bf16.xpose.msra.mxu0 %v2289_v38 }
 0x929   : > { %v6725_v40 = vpop.eup %6724 }
 0x92a   : > { %v1731_v42 = vmul.f32 %v6725_v40, %v6721_v25 }
 0x92c   : > { %v1732_v47 = vpack.c.bf16 %v1731_v42, %v1730_v41 }
 0x92e   : > { %6138 = vmatmul.mubr.msk.bf16.vlgmr.msra.gmra.mrb[8].mxu1 %vm1458_vm2, %v1732_v47 }
 0x92f   : > { %6142 = vmatpush3.bf16.xpose.msra.mxu1 %v1789_v1  ;;  %6192 = vmatmul.mubr.msk.bf16.vlgmr.msra.gmra.mrb[48].mxu0 %vm1410_vm1, %v2281_v50 }
 0x930   : > { %6143 = vmatprep.mubr.msk.bf16.mxu1 %vm7015_vm0, %v7014_v18  ;;  %6147 = vmatprep.subr.bf16.mxu1 %v7014_v18 }
 0x936   : > { %6144 = vmatmul.mubr.msk.bf16.vlgmr.msra.gmra.mrb[12].mxu1 %vm1410_vm1, %v7584_v23 }
 0x937   : > { %6149 = vmatprep.mubr.msk.bf16.mxu1 %vm7015_vm0, %v7014_v18 }
 0xa01   : > { %v1770_v9 = vpop.f32.mrb[8].mxu1 }
 0xa02   : > { %1777 = vst.msk [vmem:[#allocation3 + $0x8] sm:$0xff] %vm1410_vm1, %v1770_v9  ;;  %v6139_v51 = vpop.f32.mrb[9].mxu1  ;;  %v7642_v52 = vpop.f32.mrb[48].mxu0 }
 0xa03   : > { %v1773_v53 = vpop.f32.mrb[10].mxu1  ;;  %v6193_v54 = vpop.f32.mrb[49].mxu0  ;;  %v2332_v46 = vsel %vm1458_vm2, %v7642_v52, -inf }
 0xa04   : > { %1778 = vst.msk [vmem:[#allocation3 + $0x18] sm:$0xff] %vm1410_vm1, %v1773_v53  ;;  %v6140_v8 = vpop.f32.mrb[11].mxu1  ;;  %v7645_v48 = vpop.f32.mrb[50].mxu0 }
 0xa05   : > { %v6194_v57 = vpop.f32.mrb[51].mxu0  ;;  %v2335_v7 = vsel %vm1458_vm2, %v7645_v48, -inf }
 0xa09   : > { %v1825_v60 = vpop.f32.mrb[12].mxu1 }
 0xa0a   : > { %v6145_v61 = vpop.f32.mrb[13].mxu1  ;;  %v1832_v23 = vsel %vm1458_vm2, %v1825_v60, -inf }
 0xa0b   : > { %1833 = vmax.xlane.f32.xlu1 %v1832_v23  ;;  %v1828_v44 = vpop.f32.mrb[14].mxu1 }
 0xa0c   : > { %v6146_v62 = vpop.f32.mrb[15].mxu1  ;;  %v1835_v63 = vsel %vm1458_vm2, %v1828_v44, -inf }
 0xa0d   : > { %1836 = vmax.xlane.f32.xlu0 %v1835_v63 }
 0xa0f   : > { %2083 = vmax.xlane.f32.xlu1 %v2082_v2 }
 0xa11   : > { %1961 = vmax.xlane.f32.xlu0 %v1960_v3 }
 0xa13   : > { %2211 = vmax.xlane.f32.xlu1 %v2210_v56 }
 0xa15   : > { %1964 = vmax.xlane.f32.xlu0 %v1963_v55 }
 0xa17   : > { %2333 = vmax.xlane.f32.xlu1 %v2332_v46 }
 0xa19   : > { %2086 = vmax.xlane.f32.xlu0 %v2085_v6 }
 0xa1d   : > { %2214 = vmax.xlane.f32.xlu0 %v2213_v49 }
 0xa21   : > { %2336 = vmax.xlane.f32.xlu0 %v2335_v7 }
 0xa98   : > { %v1834_v0 = vpop.xlane.xlu1 %1833 }
 0xa99   : > { %v1838_v58 = vsub.f32 %v1825_v60, %v1834_v0 }
 0xa9a   : > { %v1837_v10 = vpop.xlane.xlu0 %1836 }
 0xa9b   : > { %v1840_v11 = vmul.f32 1.442695, %v1838_v58  ;;  %v1839_v12 = vsub.f32 %v1828_v44, %v1837_v10 }
 0xa9c   : > { %v2084_v14 = vpop.xlane.xlu1 %2083 }
 0xa9d   : > { %6726 = vpow2.f32 %v1840_v11  ;;  %v1842_v13 = vmul.f32 1.442695, %v1839_v12  ;;  %v2088_v45 = vsub.f32 %v7614_v35, %v2084_v14 }
 0xa9e   : > { %v1962_v16 = vpop.xlane.xlu0 %1961 }
 0xa9f   : > { %6728 = vpow2.f32 %v1842_v13  ;;  %v1966_v17 = vsub.f32 %v7567_v15, %v1962_v16  ;;  %v2090_v30 = vmul.f32 1.442695, %v2088_v45 }
 0xaa0   : > { %v2212_v27 = vpop.xlane.xlu1 %2211 }
 0xaa1   : > { %v1968_v20 = vmul.f32 1.442695, %v1966_v17  ;;  %v2216_v3 = vsub.f32 %v7619_v34, %v2212_v27 }
 0xaa2   : > { %v1965_v25 = vpop.xlane.xlu0 %1964 }
 0xaa3   : > { %6730 = vpow2.f32 %v1968_v20  ;;  %v1967_v26 = vsub.f32 %v7569_v22, %v1965_v25  ;;  %v2218_v56 = vmul.f32 1.442695, %v2216_v3  ;;  %v6475_v3 = vld [vmem:[%s7246_s20 + $0x70] ss:$8 sps:$4 sm:$0xff]  }
 0xaa4   : > { %v2334_v41 = vpop.xlane.xlu1 %2333 }
 0xaa5   : > { %v1970_v32 = vmul.f32 1.442695, %v1967_v26 }
 0xaa6   : > { %v2087_v33 = vpop.xlane.xlu0 %2086 }
 0xaa7   : > { %v7668_v37 = vpop.eup %6726  ;;  %6732 = vpow2.f32 %v1970_v32  ;;  %v2089_v38 = vsub.f32 %v7616_v4, %v2087_v33  ;;  %v2338_v4 = vsub.f32 %v7642_v52, %v2334_v41 }
 0xaa8   : > { %v1844_v40 = vsel %vm1458_vm2, %v7668_v37, 0.0  ;;  %6734 = vpow2.f32 %v2090_v30 }
 0xaa9   : > { %v7673_v15 = vpop.eup %6728  ;;  %v2092_v35 = vmul.f32 1.442695, %v2089_v38  ;;  %1845 = vadd.xlane.f32.xlu1 %v1844_v40  ;;  %v2340_v54 = vmul.f32 1.442695, %v2338_v4 }
 0xaaa   : > { %v2215_v42 = vpop.xlane.xlu0 %2214  ;;  %v1847_v22 = vsel %vm1458_vm2, %v7673_v15, 0.0 }
 0xaab   : > { %v2217_v47 = vsub.f32 %v7621_v59, %v2215_v42  ;;  %1848 = vadd.xlane.f32.xlu0 %v1847_v22  ;;  %6736 = vpow2.f32 %v2092_v35 }
 0xaad   : > { %v7678_v50 = vpop.eup %6730  ;;  %v2220_v1 = vmul.f32 1.442695, %v2217_v47 }
 0xaae   : > { %v2337_v9 = vpop.xlane.xlu0 %2336  ;;  %v1972_v51 = vsel %vm1458_vm2, %v7678_v50, 0.0 }
 0xaaf   : > { %1973 = vadd.xlane.f32.xlu0 %v1972_v51  ;;  %6738 = vpow2.f32 %v2220_v1  ;;  %v2339_v8 = vsub.f32 %v7645_v48, %v2337_v9 }
 0xab0   : > { %6740 = vpow2.f32 %v2340_v54  ;;  %v6454_v54 = vld [vmem:[%s7246_s20] ss:$8 sps:$4 sm:$0xff]  }
 0xab1   : > { %v6733_v53 = vpop.eup %6732  ;;  %v2342_v60 = vmul.f32 1.442695, %v2339_v8  ;;  %v6456_v8 = vld [vmem:[%s7246_s20 + $0x4] ss:$8 sps:$4 sm:$0xff]  }
 0xab2   : > { %v1975_v57 = vsel %vm1458_vm2, %v6733_v53, 0.0  ;;  %v7685_v59 = vpop.eup %6734  ;;  %2636 = vmatprep.subr.bf16.mxu0 %v6456_v8 }
 0xab3   : > { %1976 = vadd.xlane.f32.xlu0 %v1975_v57  ;;  %v2094_v52 = vsel %vm1458_vm2, %v7685_v59, 0.0  ;;  %6742 = vpow2.f32 %v2342_v60  ;;  %v6459_v57 = vld [vmem:[%s7246_s20 + $0x14] ss:$8 sps:$4 sm:$0xff]   ;;  %2637 = vmatpush1.bf16.msra.mxu0 %v6454_v54  ;;  %v6460_v60 = vld [vmem:[%s7246_s20 + $0x20] ss:$8 sps:$4 sm:$0xff]  }
 0xab4   : > { %6744 = vpow2.f32 %v2218_v56  ;;  %2638 = vmatprep.subr.bf16.mxu0 %v6459_v57  ;;  %v6480_v56 = vld [vmem:[%s7246_s20 + $0x84] ss:$8 sps:$4 sm:$0xff]  }
 0xab5   : > { %v6737_v61 = vpop.eup %6736 }
 0xab6   : > { %v2097_v23 = vsel %vm1458_vm2, %v6737_v61, 0.0 }
 0xab7   : > { %2095 = vadd.xlane.f32.xlu0 %v2094_v52  ;;  %v6465_v52 = vld [vmem:[%s7246_s20 + $0x34] ss:$8 sps:$4 sm:$0xff]  }
 0xab9   : > { %v7692_v44 = vpop.eup %6738 }
 0xaba   : > { %1856 = vrot.lane.b32.xlu1 %v7532_v24, %s7016_s3  ;;  %v2225_v48 = vsel %vm1458_vm2, %v7692_v44, 0.0  ;;  %v7696_v62 = vpop.eup %6740 }
 0xabb   : > { %2098 = vadd.xlane.f32.xlu0 %v2097_v23  ;;  %v2344_v63 = vsel %vm1458_vm2, %v7696_v62, 0.0  ;;  %v6468_v23 = vld [vmem:[%s7246_s20 + $0x44] ss:$8 sps:$4 sm:$0xff]  }
 0xabd   : > { %v7700_v2 = vpop.eup %6742 }
 0xabe   : > { %v2347_v24 = vsel %vm1458_vm2, %v7700_v2, 0.0  ;;  %v7705_v55 = vpop.eup %6744 }
 0xabf   : > { %2226 = vadd.xlane.f32.xlu0 %v2225_v48  ;;  %v2222_v46 = vsel %vm1458_vm2, %v7705_v55, 0.0  ;;  %v6471_v48 = vld [vmem:[%s7246_s20 + $0x54] ss:$8 sps:$4 sm:$0xff]  }
 0xac3   : > { %2345 = vadd.xlane.f32.xlu0 %v2344_v63  ;;  %v6474_v63 = vld [vmem:[%s7246_s20 + $0x64] ss:$8 sps:$4 sm:$0xff]  }
 0xac7   : > { %2348 = vadd.xlane.f32.xlu0 %v2347_v24  ;;  %v6477_v24 = vld [vmem:[%s7246_s20 + $0x74] ss:$8 sps:$4 sm:$0xff]  }
 0xadd   : > { %2106 = vrot.lane.b32.xlu0 %v7536_v39, %s7016_s3 }
 0xade   : > { %2223 = vadd.xlane.f32.xlu1 %v2222_v46  ;;  %v6483_v46 = vld [vmem:[%s7246_s20 + $0x94] ss:$8 sps:$4 sm:$0xff]  }
 0xae1   : > { %1654 = vrot.lane.b32.xlu0 %v7610_v43, %s7016_s3 }
 0xaef   : > { %2356 = vrot.lane.b32.xlu1 %v7538_v31, %s7016_s3 }
 0xb36   : > { %v1846_v6 = vpop.xlane.xlu1 %1845 }
 0xb37   : > { %6746 = vrcp.f32 %v1846_v6  ;;  %v6481_v6 = vld [vmem:[%s7246_s20 + $0x90] ss:$8 sps:$4 sm:$0xff]  }
 0xb38   : > { %v1849_v34 = vpop.xlane.xlu0 %1848 }
 0xb39   : > { %6748 = vrcp.f32 %v1849_v34  ;;  %v6486_v34 = vld [vmem:[%s7246_s20 + $0xa4] ss:$8 sps:$4 sm:$0xff]  }
 0xb3a   : > { %v1857_v49 = vpop.permute.xlu1 %1856 }
 0xb3b   : > { %6148 = vmatpush3.bf16.msra.mxu1 %v1857_v49  ;;  %v6484_v49 = vld [vmem:[%s7246_s20 + $0xa0] ss:$8 sps:$4 sm:$0xff]  }
 0xb3c   : > { %v1974_v7 = vpop.xlane.xlu0 %1973  ;;  %6159 = vmatprep.subr.bf16.mxu1 %v7014_v18 }
 0xb3d   : > { %6750 = vrcp.f32 %v1974_v7  ;;  %v6489_v7 = vld [vmem:[%s7246_s20 + $0xb4] ss:$8 sps:$4 sm:$0xff]  }
 0xb40   : > { %v1977_v0 = vpop.xlane.xlu0 %1976 }
 0xb41   : > { %v6747_v58 = vpop.eup %6746  ;;  %6752 = vrcp.f32 %v1977_v0  ;;  %v6487_v0 = vld [vmem:[%s7246_s20 + $0xb0] ss:$8 sps:$4 sm:$0xff]  }
 0xb42   : > { %v1852_v11 = vmul.f32 %v6747_v58, %v7668_v37  ;;  %v6490_v58 = vld [vmem:[%s7246_s20 + $0xc0] ss:$8 sps:$4 sm:$0xff]  }
 0xb43   : > { %v6749_v10 = vpop.eup %6748 }
 0xb44   : > { %v1853_v43 = vmul.f32 %v6749_v10, %v7673_v15  ;;  %v2096_v12 = vpop.xlane.xlu0 %2095  ;;  %v6492_v10 = vld [vmem:[%s7246_s20 + $0xc4] ss:$8 sps:$4 sm:$0xff]  }
 0xb46   : > { %v1854_v13 = vpack.c.bf16 %v1853_v43, %v1852_v11  ;;  %v6493_v11 = vld [vmem:[%s7246_s20 + $0xd0] ss:$8 sps:$4 sm:$0xff]   ;;  %v6495_v43 = vld [vmem:[%s7246_s20 + $0xd4] ss:$8 sps:$4 sm:$0xff]  }
 0xb47   : > { %v6751_v16 = vpop.eup %6750 }
 0xb48   : > { %6150 = vmatmul.mubr.msk.bf16.vlgmr.msra.gmra.mrb[16].mxu1 %vm1458_vm2, %v1854_v13  ;;  %v2099_v14 = vpop.xlane.xlu0 %2098  ;;  %v1980_v45 = vmul.f32 %v6751_v16, %v7678_v50  ;;  %v6498_v13 = vld [vmem:[%s7246_s20 + $0xe4] ss:$8 sps:$4 sm:$0xff]   ;;  %v6499_v16 = vld [vmem:[%s7246_s20 + $0xf0] ss:$8 sps:$4 sm:$0xff]  }
 0xb49   : > { %6160 = vmatpush3.bf16.msra.mxu1 %v7536_v39  ;;  %6754 = vrcp.f32 %v2099_v14  ;;  %6161 = vmatprep.mubr.msk.bf16.mxu1 %vm7015_vm0, %v7014_v18  ;;  %v6501_v14 = vld [vmem:[%s7246_s20 + $0xf4] ss:$8 sps:$4 sm:$0xff]  }
 0xb4a   : > { %6171 = vmatprep.subr.bf16.mxu1 %v7014_v18  ;;  %6756 = vrcp.f32 %v2096_v12  ;;  %v6496_v12 = vld [vmem:[%s7246_s20 + $0xe0] ss:$8 sps:$4 sm:$0xff]  }
 0xb4b   : > { %v6753_v17 = vpop.eup %6752 }
 0xb4c   : > { %v1981_v20 = vmul.f32 %v6753_v17, %v6733_v53  ;;  %v2227_v25 = vpop.xlane.xlu0 %2226 }
 0xb4d   : > { %6758 = vrcp.f32 %v2227_v25 }
 0xb4e   : > { %v1982_v26 = vpack.c.bf16 %v1981_v20, %v1980_v45 }
 0xb50   : > { %6162 = vmatmul.mubr.msk.bf16.vlgmr.msra.gmra.mrb[20].mxu1 %vm1458_vm2, %v1982_v26  ;;  %v2346_v27 = vpop.xlane.xlu0 %2345 }
 0xb51   : > { %6173 = vmatprep.mubr.msk.bf16.mxu1 %vm7015_vm0, %v7014_v18 }
 0xb53   : > { %v6755_v39 = vpop.eup %6754 }
 0xb54   : > { %v2349_v30 = vpop.xlane.xlu0 %2348  ;;  %v6757_v32 = vpop.eup %6756  ;;  %v2103_v33 = vmul.f32 %v6755_v39, %v6737_v61  ;;  %v6463_v61 = vld [vmem:[%s7246_s20 + $0x30] ss:$8 sps:$4 sm:$0xff]  }
 0xb55   : > { %v2102_v37 = vmul.f32 %v6757_v32, %v7685_v59  ;;  %v6457_v59 = vld [vmem:[%s7246_s20 + $0x10] ss:$8 sps:$4 sm:$0xff]  }
 0xb56   : > { %2639 = vmatpush1.bf16.msra.mxu0 %v6457_v59 }
 0xb57   : > { %v2104_v40 = vpack.c.bf16 %v2103_v33, %v2102_v37  ;;  %v6759_v41 = vpop.eup %6758 }
 0xb58   : > { %v2107_v38 = vpop.permute.xlu0 %2106  ;;  %v2231_v22 = vmul.f32 %v6759_v41, %v7692_v44  ;;  %v6466_v44 = vld [vmem:[%s7246_s20 + $0x40] ss:$8 sps:$4 sm:$0xff]  }
 0xb59   : > { %6172 = vmatpush3.bf16.msra.mxu1 %v2107_v38 }
 0xb5a   : > { %6183 = vmatprep.subr.bf16.mxu1 %v7014_v18 }
 0xb5c   : > { %6174 = vmatmul.mubr.msk.bf16.vlgmr.msra.gmra.mrb[24].mxu1 %vm1458_vm2, %v2104_v40  ;;  %v1655_v15 = vpop.permute.xlu0 %1654 }
 0xb5d   : > { %1661 = vst.msk [vmem:[#allocation3] sm:$0xff] %vm1660_vm3, %v1655_v15  ;;  %6184 = vmatpush3.bf16.msra.mxu1 %v7538_v31  ;;  %6185 = vmatprep.mubr.msk.bf16.mxu1 %vm7015_vm0, %v7014_v18 }
 0xb5e   : > { %6195 = vmatprep.subr.bf16.mxu1 %v7014_v18 }
 0xb6b   : > { %v2224_v35 = vpop.xlane.xlu1 %2223 }
 0xb6c   : > { %6760 = vrcp.f32 %v2224_v35 }
 0xb6d   : > { %6762 = vrcp.f32 %v2349_v30 }
 0xb6e   : > { %6764 = vrcp.f32 %v2346_v27 }
 0xb6f   : > { %v2357_v4 = vpop.permute.xlu1 %2356 }
 0xb76   : > { %v6761_v42 = vpop.eup %6760 }
 0xb77   : > { %v2230_v47 = vmul.f32 %v6761_v42, %v7705_v55  ;;  %v6763_v50 = vpop.eup %6762  ;;  %v6478_v55 = vld [vmem:[%s7246_s20 + $0x80] ss:$8 sps:$4 sm:$0xff]  }
 0xb78   : > { %v6765_v1 = vpop.eup %6764  ;;  %v2353_v9 = vmul.f32 %v6763_v50, %v7700_v2  ;;  %v6472_v2 = vld [vmem:[%s7246_s20 + $0x60] ss:$8 sps:$4 sm:$0xff]  }
 0xb79   : > { %v2232_v31 = vpack.c.bf16 %v2231_v22, %v2230_v47  ;;  %v2352_v51 = vmul.f32 %v6765_v1, %v7696_v62  ;;  %v6469_v62 = vld [vmem:[%s7246_s20 + $0x50] ss:$8 sps:$4 sm:$0xff]  }
 0xb7b   : > { %6186 = vmatmul.mubr.msk.bf16.vlgmr.msra.gmra.mrb[28].mxu1 %vm1458_vm2, %v2232_v31  ;;  %v2354_v53 = vpack.c.bf16 %v2353_v9, %v2352_v51 }
 0xb7c   : > { %6196 = vmatpush3.bf16.msra.mxu1 %v2357_v4  ;;  %6197 = vmatprep.mubr.msk.bf16.mxu1 %vm7015_vm0, %v7014_v18  ;;  %v6462_v18 = vld [vmem:[%s7246_s20 + $0x24] ss:$8 sps:$4 sm:$0xff]  }
 0xb7d   : > { %2640 = vmatprep.subr.bf16.mxu0 %v6462_v18 }
 0xb7e   : > { %2641 = vmatpush1.bf16.msra.mxu0 %v6460_v60 }
 0xb7f   : > { %2642 = vmatprep.subr.bf16.mxu0 %v6465_v52 }
 0xb82   : > { %2643 = vmatpush1.bf16.msra.mxu0 %v6463_v61 }
 0xb83   : > { %6198 = vmatmul.mubr.msk.bf16.vlgmr.msra.gmra.mrb[32].mxu1 %vm1458_vm2, %v2354_v53  ;;  %2644 = vmatprep.subr.bf16.mxu0 %v6468_v23  ;;  %v2413_v53 = vld [vmem:[#allocation3] sm:$0xff] }
 0xb86   : > { %2645 = vmatpush1.bf16.msra.mxu0 %v6466_v44 }
 0xb87   : > { %2646 = vmatprep.subr.bf16.mxu0 %v6471_v48 }
 0xb8a   : > { %2647 = vmatpush1.bf16.msra.mxu0 %v6469_v62 }
 0xb8b   : > { %2648 = vmatprep.subr.bf16.mxu0 %v6474_v63  ;;  %v7795_v63 = vld [vmem:[%s7251_s17 + $0x18] sm:$0xff] }
 0xb8e   : > { %2649 = vmatpush1.bf16.msra.mxu0 %v6472_v2  ;;  %v2461_v2 = vrot.slane %v7795_v63, %v7485_v19 }
 0xb8f   : > { %2650 = vmatprep.subr.bf16.mxu0 %v6477_v24  ;;  %v2465_v24 = vrot.slane %v7795_v63, %v7488_v5 }
 0xb92   : > { %2651 = vmatpush1.bf16.msra.mxu0 %v6475_v3  ;;  %v2471_v3 = vrot.slane %v2461_v2, %v7485_v19 }
 0xb93   : > { %2652 = vmatprep.subr.bf16.mxu0 %v6480_v56  ;;  %v2475_v56 = vrot.slane %v2465_v24, %v7485_v19 }
 0xb96   : > { %2653 = vmatpush1.bf16.msra.mxu0 %v6478_v55 }
 0xb97   : > { %2654 = vmatprep.subr.bf16.mxu0 %v6483_v46 }
 0xb9a   : > { %2655 = vmatpush1.bf16.msra.mxu0 %v6481_v6 }
 0xb9b   : > { %2656 = vmatprep.subr.bf16.mxu0 %v6486_v34 }
 0xb9e   : > { %2657 = vmatpush1.bf16.msra.mxu0 %v6484_v49 }
 0xb9f   : > { %2658 = vmatprep.subr.bf16.mxu0 %v6489_v7  ;;  %v6838_v7 = vld [vmem:[#allocation2] sm:$0xff] }
 0xba2   : > { %2659 = vmatpush1.bf16.msra.mxu0 %v6487_v0 }
 0xba3   : > { %2660 = vmatprep.subr.bf16.mxu0 %v6492_v10 }
 0xba6   : > { %2661 = vmatpush1.bf16.msra.mxu0 %v6490_v58 }
 0xba7   : > { %2662 = vmatprep.subr.bf16.mxu0 %v6495_v43 }
 0xbaa   : > { %2663 = vmatpush1.bf16.msra.mxu0 %v6493_v11  ;;  %v6839_v11 = vld [vmem:[#allocation2 + $0x8] sm:$0xff] }
 0xbab   : > { %2664 = vmatprep.subr.bf16.mxu0 %v6498_v13  ;;  %v6840_v13 = vld [vmem:[#allocation2 + $0x10] sm:$0xff] }
 0xbae   : > { %2665 = vmatpush1.bf16.msra.mxu0 %v6496_v12 }
 0xbaf   : > { %2666 = vmatprep.subr.bf16.mxu0 %v6501_v14 }
 0xbb2   : > { %2667 = vmatpush1.bf16.msra.mxu0 %v6499_v16  ;;  %v6841_v16 = vld [vmem:[#allocation2 + $0x18] sm:$0xff] }
 0xc1b   : > { %v1896_v17 = vpop.f32.mrb[16].mxu1 }
 0xc1c   : > { %1905 = vrot.lane.b32.xlu0 %v1896_v17, %s7016_s3  ;;  %v6151_v45 = vpop.f32.mrb[17].mxu1 }
 0xc1d   : > { %v1899_v20 = vpop.f32.mrb[18].mxu1 }
 0xc1e   : > { %v6152_v25 = vpop.f32.mrb[19].mxu1 }
 0xc20   : > { %1907 = vrot.lane.b32.xlu0 %v1899_v20, %s7016_s3 }
 0xc23   : > { %v2020_v26 = vpop.f32.mrb[20].mxu1 }
 0xc24   : > { %2027 = vst.msk [vmem:[#allocation3 + $0x20] sm:$0xff] %vm1410_vm1, %v2020_v26  ;;  %1656 = vrot.lane.b32.xlu0 %v7612_v36, %s7016_s3  ;;  %v6163_v27 = vpop.f32.mrb[21].mxu1 }
 0xc25   : > { %v2023_v39 = vpop.f32.mrb[22].mxu1 }
 0xc26   : > { %2028 = vst.msk [vmem:[#allocation3 + $0x30] sm:$0xff] %vm1410_vm1, %v2023_v39  ;;  %v6164_v30 = vpop.f32.mrb[23].mxu1 }
 0xc2f   : > { %v2146_v32 = vpop.f32.mrb[24].mxu1 }
 0xc30   : > { %v6175_v33 = vpop.f32.mrb[25].mxu1 }
 0xc31   : > { %v2149_v37 = vpop.f32.mrb[26].mxu1 }
 0xc32   : > { %v6176_v38 = vpop.f32.mrb[27].mxu1 }
 0xc4e   : > { %v2270_v40 = vpop.f32.mrb[28].mxu1 }
 0xc4f   : > { %2277 = vst.msk [vmem:[#allocation3 + $0x28] sm:$0xff] %vm1410_vm1, %v2270_v40  ;;  %v6187_v15 = vpop.f32.mrb[29].mxu1  ;;  %v6843_v40 = vld [vmem:[#allocation2 + $0x28] sm:$0xff] }
 0xc50   : > { %v2273_v35 = vpop.f32.mrb[30].mxu1 }
 0xc51   : > { %2278 = vst.msk [vmem:[#allocation3 + $0x38] sm:$0xff] %vm1410_vm1, %v2273_v35  ;;  %v6188_v41 = vpop.f32.mrb[31].mxu1 }
 0xc52   : > { %v6844_v41 = vld [vmem:[#allocation2 + $0x30] sm:$0xff] }
 0xc56   : > { %v2396_v42 = vpop.f32.mrb[32].mxu1 }
 0xc57   : > { %2405 = vrot.lane.b32.xlu0 %v2396_v42, %s7016_s3  ;;  %v6199_v36 = vpop.f32.mrb[33].mxu1 }
 0xc58   : > { %v2399_v22 = vpop.f32.mrb[34].mxu1  ;;  %v6845_v36 = vld [vmem:[#allocation2 + $0x38] sm:$0xff] }
 0xc59   : > { %2407 = vrot.lane.b32.xlu1 %v2399_v22, %s7016_s3  ;;  %v6200_v47 = vpop.f32.mrb[35].mxu1 }
 0xc5b   : > { %2155 = vrot.lane.b32.xlu0 %v2146_v32, %s7016_s3  ;;  %v6842_v32 = vld [vmem:[#allocation2 + $0x20] sm:$0xff] }
 0xc5d   : > { %2157 = vrot.lane.b32.xlu1 %v2149_v37, %s7016_s3 }
 0xc8e   : > { %v1906_v31 = vpop.permute.xlu0 %1905 }
 0xc8f   : > { %1911 = vst.msk [vmem:[#allocation3 + $0x8] sm:$0xff] %vm1660_vm3, %v1906_v31 }
 0xc92   : > { %v1908_v50 = vpop.permute.xlu0 %1907 }
 0xc93   : > { %1912 = vst.msk [vmem:[#allocation3 + $0x18] sm:$0xff] %vm1660_vm3, %v1908_v50  ;;  %v2817_v50 = vld [vmem:[%s7235_s11] sm:$0xff] }
 0xc96   : > { %v1657_v4 = vpop.permute.xlu0 %1656  ;;  %v2414_v1 = vld [vmem:[#allocation3 + $0x8] sm:$0xff] }
 0xc97   : > { %1662 = vst.msk [vmem:[#allocation3 + $0x10] sm:$0xff] %vm1660_vm3, %v1657_v4  ;;  %v2821_v4 = vld [vmem:[%s7235_s11 + $0x20] sm:$0xff] }
 0xc9a   : > { %v2416_v9 = vld [vmem:[#allocation3 + $0x18] sm:$0xff] }
 0xc9b   : > { %v2422_v51 = vpack.c.bf16 %v2416_v9, %v2414_v1  ;;  %v2818_v1 = vld [vmem:[%s7235_s11 + $0x8] sm:$0xff]  ;;  %v5766_v9 = vcombine.low %v2817_v50, %v2821_v4 }
 0xc9d   : > { %2668 = vmatprep.mubr.bf16.mxu0 %v2422_v51  ;;  %v5767_v51 = vcombine.high %v2817_v50, %v2821_v4 }
 0xc9e   : > { %v2415_v54 = vld [vmem:[#allocation3 + $0x10] sm:$0xff] }
 0xc9f   : > { %v2421_v8 = vpack.c.bf16 %v2415_v54, %v2413_v53  ;;  %v2822_v53 = vld [vmem:[%s7235_s11 + $0x28] sm:$0xff]  ;;  %v2825_v54 = vld [vmem:[%s7235_s11 + $0x40] sm:$0xff]  ;;  %3657 = vmatprep.subr.bf16.mxu1 %v5767_v51 }
 0xca0   : > { %3658 = vmatpush1.bf16.msra.mxu1 %v5766_v9  ;;  %v2873_v51 = vld [vmem:[%s7235_s11 + $0x1c0] sm:$0xff] }
 0xca1   : > { %2669 = vmatmul.mubr.bf16.vlgmr.msra.gmra.mrb[52].mxu0 %v2421_v8  ;;  %v2829_v8 = vld [vmem:[%s7235_s11 + $0x60] sm:$0xff] }
 0xca2   : > { %v5774_v2 = vcombine.low %v2825_v54, %v2829_v8 }
 0xcc9   : > { %v2406_v57 = vpop.permute.xlu0 %2405 }
 0xcca   : > { %2411 = vst.msk [vmem:[#allocation3 + $0x28] sm:$0xff] %vm1660_vm3, %v2406_v57  ;;  %v5768_v57 = vcombine.low %v2818_v1, %v2822_v53 }
 0xccb   : > { %v2408_v59 = vpop.permute.xlu1 %2407 }
 0xccc   : > { %2412 = vst.msk [vmem:[#allocation3 + $0x38] sm:$0xff] %vm1660_vm3, %v2408_v59  ;;  %v5769_v59 = vcombine.high %v2818_v1, %v2822_v53  ;;  %v2877_v53 = vld [vmem:[%s7235_s11 + $0x1e0] sm:$0xff] }
 0xccd   : > { %v2156_v18 = vpop.permute.xlu0 %2155 }
 0xcce   : > { %2161 = vst.msk [vmem:[#allocation3 + $0x20] sm:$0xff] %vm1660_vm3, %v2156_v18  ;;  %v5775_v18 = vcombine.high %v2825_v54, %v2829_v8  ;;  %3710 = vmatprep.subr.bf16.mxu0 %v5769_v59  ;;  %v2874_v54 = vld [vmem:[%s7235_s11 + $0x1c8] sm:$0xff] }
 0xccf   : > { %v2158_v60 = vpop.permute.xlu1 %2157  ;;  %3711 = vmatpush1.bf16.msra.mxu0 %v5768_v57  ;;  %v2878_v8 = vld [vmem:[%s7235_s11 + $0x1e8] sm:$0xff] }
 0xcd0   : > { %2162 = vst.msk [vmem:[#allocation3 + $0x30] sm:$0xff] %vm1660_vm3, %v2158_v60  ;;  %v2826_v60 = vld [vmem:[%s7235_s11 + $0x48] sm:$0xff]  ;;  %3659 = vmatprep.subr.bf16.mxu1 %v5775_v18  ;;  %v5823_v18 = vcombine.high %v2873_v51, %v2877_v53 }
 0xcd1   : > { %v2418_v52 = vld [vmem:[#allocation3 + $0x28] sm:$0xff]  ;;  %3660 = vmatpush1.bf16.msra.mxu1 %v5774_v2 }
 0xcd3   : > { %v2420_v61 = vld [vmem:[#allocation3 + $0x38] sm:$0xff] }
 0xcd4   : > { %v2424_v23 = vpack.c.bf16 %v2420_v61, %v2418_v52  ;;  %v2830_v52 = vld [vmem:[%s7235_s11 + $0x68] sm:$0xff]  ;;  %v2833_v61 = vld [vmem:[%s7235_s11 + $0x80] sm:$0xff] }
 0xcd5   : > { %v2417_v44 = vld [vmem:[#allocation3 + $0x20] sm:$0xff]  ;;  %v5776_v24 = vcombine.low %v2826_v60, %v2830_v52 }
 0xcd6   : > { %2678 = vmatprep.mubr.bf16.mxu0 %v2424_v23  ;;  %v5777_v23 = vcombine.high %v2826_v60, %v2830_v52  ;;  %v5825_v60 = vcombine.high %v2874_v54, %v2878_v8  ;;  %v2881_v52 = vld [vmem:[%s7235_s11 + $0x200] sm:$0xff] }
 0xcd7   : > { %v2419_v48 = vld [vmem:[#allocation3 + $0x30] sm:$0xff] }
 0xcd8   : > { %v2423_v62 = vpack.c.bf16 %v2419_v48, %v2417_v44  ;;  %v2837_v44 = vld [vmem:[%s7235_s11 + $0xa0] sm:$0xff]  ;;  %v2834_v48 = vld [vmem:[%s7235_s11 + $0x88] sm:$0xff]  ;;  %3712 = vmatprep.subr.bf16.mxu0 %v5777_v23 }
 0xcd9   : > { %3713 = vmatpush1.bf16.msra.mxu0 %v5776_v24  ;;  %v2882_v23 = vld [vmem:[%s7235_s11 + $0x208] sm:$0xff] }
 0xcda   : > { %2679 = vmatmul.mubr.bf16.gmra.mrb[56].mxu0 %v2423_v62  ;;  %v2838_v62 = vld [vmem:[%s7235_s11 + $0xa8] sm:$0xff] }
 0xd74   : > { %v2670_v55 = vpop.f32.mrb[52].mxu0 }
 0xd75   : > { %v2671_v46 = vadd.f32 %v2670_v55, %v2471_v3  ;;  %v2672_v6 = vpop.f32.mrb[53].mxu0  ;;  %v2841_v55 = vld [vmem:[%s7235_s11 + $0xc0] sm:$0xff] }
 0xd76   : > { %v2673_v34 = vadd.f32 %v2672_v6, %v2475_v56  ;;  %v2674_v49 = vpop.f32.mrb[54].mxu0  ;;  %v2842_v6 = vld [vmem:[%s7235_s11 + $0xc8] sm:$0xff] }
 0xd77   : > { %v7803_v0 = vadd.f32 %v6838_v7, %v2671_v46  ;;  %v2675_v58 = vadd.f32 %v2674_v49, %v2471_v3  ;;  %v2676_v10 = vpop.f32.mrb[55].mxu0  ;;  %v2845_v46 = vld [vmem:[%s7235_s11 + $0xe0] sm:$0xff]  ;;  %v5782_v49 = vcombine.low %v2833_v61, %v2837_v44  ;;  %v5784_v7 = vcombine.low %v2834_v48, %v2838_v62 }
 0xd78   : > { %v7805_v43 = vadd.f32 %v6839_v11, %v2673_v34  ;;  %v2677_v12 = vadd.f32 %v2676_v10, %v2475_v56  ;;  %v2846_v34 = vld [vmem:[%s7235_s11 + $0xe8] sm:$0xff]  ;;  %v2849_v11 = vld [vmem:[%s7235_s11 + $0x100] sm:$0xff] }
 0xd79   : > { %v7807_v14 = vadd.f32 %v6840_v13, %v2675_v58  ;;  %v5791_v58 = vcombine.high %v2841_v55, %v2845_v46  ;;  %v5793_v10 = vcombine.high %v2842_v6, %v2846_v34  ;;  %v2850_v13 = vld [vmem:[%s7235_s11 + $0x108] sm:$0xff] }
 0xd7a   : > { %8815 = vst [vmem:[#allocation16_spill] sm:$0xff] %v7805_v43  ;;  %v7809_v17 = vadd.f32 %v6841_v16, %v2677_v12  ;;  %v2697_v45 = vadd.f32 %v7805_v43, %v7803_v0  ;;  %v2853_v12 = vld [vmem:[%s7235_s11 + $0x120] sm:$0xff]  ;;  %v2854_v16 = vld [vmem:[%s7235_s11 + $0x128] sm:$0xff] }
 0xd7b   : > { %8816 = vst [vmem:[#allocation17_spill] sm:$0xff] %v7807_v14 }
 0xd7c   : > { %8817 = vst [vmem:[#allocation18_spill] sm:$0xff] %v7809_v17  ;;  %2698 = vadd.xlane.f32.xlu0 %v2697_v45  ;;  %v2700_v20 = vadd.f32 %v7809_v17, %v7807_v14  ;;  %v5790_v45 = vcombine.low %v2841_v55, %v2845_v46  ;;  %v2890_v55 = vld [vmem:[%s7235_s11 + $0x248] sm:$0xff] }
 0xd7d   : > { %v2894_v46 = vld [vmem:[%s7235_s11 + $0x268] sm:$0xff] }
 0xd7e   : > { %2701 = vadd.xlane.f32.xlu1 %v2700_v20  ;;  %v5792_v20 = vcombine.low %v2842_v6, %v2846_v34 }
 0xdad   : > { %v2680_v25 = vpop.f32.mrb[56].mxu0 }
 0xdae   : > { %v2681_v26 = vadd.f32 %v2680_v25, %v2471_v3  ;;  %v2682_v27 = vpop.f32.mrb[57].mxu0  ;;  %v5799_v25 = vcombine.high %v2849_v11, %v2853_v12 }
 0xdaf   : > { %v2683_v39 = vadd.f32 %v2682_v27, %v2475_v56  ;;  %v2684_v30 = vpop.f32.mrb[58].mxu0  ;;  %v2857_v27 = vld [vmem:[%s7235_s11 + $0x140] sm:$0xff] }
 0xdb0   : > { %v7815_v33 = vadd.f32 %v6842_v32, %v2681_v26  ;;  %v2685_v37 = vadd.f32 %v2684_v30, %v2471_v3  ;;  %v2686_v38 = vpop.f32.mrb[59].mxu0  ;;  %v5783_v3 = vcombine.high %v2833_v61, %v2837_v44  ;;  %v5801_v26 = vcombine.high %v2850_v13, %v2854_v16  ;;  %v2858_v30 = vld [vmem:[%s7235_s11 + $0x148] sm:$0xff]  ;;  %v2885_v61 = vld [vmem:[%s7235_s11 + $0x220] sm:$0xff] }
 0xdb1   : > { %v7817_v15 = vadd.f32 %v6843_v40, %v2683_v39  ;;  %v2687_v35 = vadd.f32 %v2686_v38, %v2475_v56  ;;  %v5785_v56 = vcombine.high %v2834_v48, %v2838_v62  ;;  %v2861_v39 = vld [vmem:[%s7235_s11 + $0x160] sm:$0xff]  ;;  %v2862_v32 = vld [vmem:[%s7235_s11 + $0x168] sm:$0xff]  ;;  %v5800_v38 = vcombine.low %v2850_v13, %v2854_v16 }
 0xdb2   : > { %8818 = vst [vmem:[#allocation19_spill] sm:$0xff] %v7815_v33  ;;  %v7819_v42 = vadd.f32 %v6844_v41, %v2685_v37  ;;  %3661 = vmatprep.subr.bf16.mxu1 %v5783_v3  ;;  %v5798_v37 = vcombine.low %v2849_v11, %v2853_v12  ;;  %v5807_v40 = vcombine.high %v2857_v27, %v2861_v39  ;;  %v2865_v41 = vld [vmem:[%s7235_s11 + $0x180] sm:$0xff]  ;;  %v2886_v44 = vld [vmem:[%s7235_s11 + $0x228] sm:$0xff] }
 0xdb3   : > { %8819 = vst [vmem:[#allocation20_spill] sm:$0xff] %v7817_v15  ;;  %v7821_v22 = vadd.f32 %v6845_v36, %v2687_v35  ;;  %v2703_v47 = vadd.f32 %v7817_v15, %v7815_v33  ;;  %3714 = vmatprep.subr.bf16.mxu0 %v5785_v56  ;;  %3662 = vmatpush1.bf16.msra.mxu1 %v5782_v49  ;;  %v2869_v36 = vld [vmem:[%s7235_s11 + $0x1a0] sm:$0xff] }
 0xdb4   : > { %8820 = vst [vmem:[#allocation21_spill] sm:$0xff] %v7819_v42  ;;  %3715 = vmatpush1.bf16.msra.mxu0 %v5784_v7  ;;  %3663 = vmatprep.subr.bf16.mxu1 %v5791_v58  ;;  %v5809_v35 = vcombine.high %v2858_v30, %v2862_v32  ;;  %v5806_v50 = vcombine.low %v2857_v27, %v2861_v39  ;;  %v2889_v3 = vld [vmem:[%s7235_s11 + $0x240] sm:$0xff] }
 0xdb5   : > { %8821 = vst [vmem:[#allocation22_spill] sm:$0xff] %v7821_v22  ;;  %2704 = vadd.xlane.f32.xlu0 %v2703_v47  ;;  %v2706_v31 = vadd.f32 %v7821_v22, %v7819_v42  ;;  %3716 = vmatprep.subr.bf16.mxu0 %v5793_v10  ;;  %v2866_v47 = vld [vmem:[%s7235_s11 + $0x188] sm:$0xff]  ;;  %v5808_v4 = vcombine.low %v2858_v30, %v2862_v32  ;;  %v2893_v56 = vld [vmem:[%s7235_s11 + $0x260] sm:$0xff] }
 0xdb6   : > { %v5815_v1 = vcombine.high %v2865_v41, %v2869_v36  ;;  %v5814_v57 = vcombine.low %v2865_v41, %v2869_v36  ;;  %v5822_v48 = vcombine.low %v2873_v51, %v2877_v53  ;;  %v5824_v62 = vcombine.low %v2874_v54, %v2878_v8  ;;  %v2898_v41 = vld [vmem:[%s7235_s11 + $0x288] sm:$0xff] }
 0xdb7   : > { %3664 = vmatpush1.bf16.msra.mxu1 %v5790_v45  ;;  %v5831_v2 = vcombine.high %v2881_v52, %v2885_v61  ;;  %v5833_v24 = vcombine.high %v2882_v23, %v2886_v44  ;;  %v5830_v6 = vcombine.low %v2881_v52, %v2885_v61  ;;  %v5832_v34 = vcombine.low %v2882_v23, %v2886_v44  ;;  %v2906_v51 = vld [vmem:[%s7235_s11 + $0x2c8] sm:$0xff] }
 0xdb8   : > { %3717 = vmatpush1.bf16.msra.mxu0 %v5792_v20  ;;  %3665 = vmatprep.subr.bf16.mxu1 %v5799_v25  ;;  %v5839_v49 = vcombine.high %v2889_v3, %v2893_v56  ;;  %v5841_v7 = vcombine.high %v2890_v55, %v2894_v46  ;;  %v5838_v58 = vcombine.low %v2889_v3, %v2893_v56  ;;  %v2910_v54 = vld [vmem:[%s7235_s11 + $0x2e8] sm:$0xff] }
 0xdb9   : > { %2707 = vadd.xlane.f32.xlu0 %v2706_v31  ;;  %3718 = vmatprep.subr.bf16.mxu0 %v5801_v26  ;;  %v2870_v31 = vld [vmem:[%s7235_s11 + $0x1a8] sm:$0xff]  ;;  %v5840_v10 = vcombine.low %v2890_v55, %v2894_v46 }
 0xdba   : > { %v5817_v9 = vcombine.high %v2866_v47, %v2870_v31  ;;  %v5816_v59 = vcombine.low %v2866_v47, %v2870_v31  ;;  %v2902_v47 = vld [vmem:[%s7235_s11 + $0x2a8] sm:$0xff] }
 0xdbb   : > { %3666 = vmatpush1.bf16.msra.mxu1 %v5798_v37  ;;  %v2914_v52 = vld [vmem:[%s7235_s11 + $0x308] sm:$0xff] }
 0xdbc   : > { %3719 = vmatpush1.bf16.msra.mxu0 %v5800_v38  ;;  %3667 = vmatprep.subr.bf16.mxu1 %v5807_v40  ;;  %v2897_v40 = vld [vmem:[%s7235_s11 + $0x280] sm:$0xff]  ;;  %v2918_v23 = vld [vmem:[%s7235_s11 + $0x328] sm:$0xff] }
 0xdbd   : > { %3720 = vmatprep.subr.bf16.mxu0 %v5809_v35  ;;  %v2901_v35 = vld [vmem:[%s7235_s11 + $0x2a0] sm:$0xff]  ;;  %v2922_v3 = vld [vmem:[%s7235_s11 + $0x348] sm:$0xff] }
 0xdbe   : > { %v5847_v36 = vcombine.high %v2897_v40, %v2901_v35  ;;  %v5846_v31 = vcombine.low %v2897_v40, %v2901_v35  ;;  %v2926_v55 = vld [vmem:[%s7235_s11 + $0x368] sm:$0xff] }
 0xdbf   : > { %3668 = vmatpush1.bf16.msra.mxu1 %v5806_v50  ;;  %v5848_v50 = vcombine.low %v2898_v41, %v2902_v47 }
 0xdc0   : > { %3721 = vmatpush1.bf16.msra.mxu0 %v5808_v4  ;;  %3669 = vmatprep.subr.bf16.mxu1 %v5815_v1  ;;  %v5849_v4 = vcombine.high %v2898_v41, %v2902_v47  ;;  %v2905_v1 = vld [vmem:[%s7235_s11 + $0x2c0] sm:$0xff]  ;;  %v7912_v41 = vld [vmem:[%s7235_s11 + $0x10] sm:$0xff]  ;;  %v7918_v47 = vld [vmem:[%s7235_s11 + $0x18] sm:$0xff] }
 0xdc1   : > { %3722 = vmatprep.subr.bf16.mxu0 %v5817_v9  ;;  %v2909_v9 = vld [vmem:[%s7235_s11 + $0x2e0] sm:$0xff] }
 0xdc2   : > { %v5855_v53 = vcombine.high %v2905_v1, %v2909_v9  ;;  %v5854_v8 = vcombine.low %v2905_v1, %v2909_v9 }
 0xdc3   : > { %3670 = vmatpush1.bf16.msra.mxu1 %v5814_v57  ;;  %v5856_v57 = vcombine.low %v2906_v51, %v2910_v54 }
 0xdc4   : > { %3723 = vmatpush1.bf16.msra.mxu0 %v5816_v59  ;;  %3671 = vmatprep.subr.bf16.mxu1 %v5823_v18  ;;  %v5857_v59 = vcombine.high %v2906_v51, %v2910_v54  ;;  %v2913_v18 = vld [vmem:[%s7235_s11 + $0x300] sm:$0xff] }
 0xdc5   : > { %3724 = vmatprep.subr.bf16.mxu0 %v5825_v60  ;;  %v2917_v60 = vld [vmem:[%s7235_s11 + $0x320] sm:$0xff] }
 0xdc6   : > { %v5863_v61 = vcombine.high %v2913_v18, %v2917_v60  ;;  %v5862_v44 = vcombine.low %v2913_v18, %v2917_v60 }
 0xdc7   : > { %3672 = vmatpush1.bf16.msra.mxu1 %v5822_v48  ;;  %v5864_v48 = vcombine.low %v2914_v52, %v2918_v23 }
 0xdc8   : > { %3725 = vmatpush1.bf16.msra.mxu0 %v5824_v62  ;;  %3673 = vmatprep.subr.bf16.mxu1 %v5831_v2  ;;  %v5865_v62 = vcombine.high %v2914_v52, %v2918_v23  ;;  %v2921_v2 = vld [vmem:[%s7235_s11 + $0x340] sm:$0xff] }
 0xdc9   : > { %3726 = vmatprep.subr.bf16.mxu0 %v5833_v24  ;;  %v2925_v24 = vld [vmem:[%s7235_s11 + $0x360] sm:$0xff] }
 0xdca   : > { %v5871_v56 = vcombine.high %v2921_v2, %v2925_v24  ;;  %v5870_v46 = vcombine.low %v2921_v2, %v2925_v24 }
 0xdcb   : > { %3674 = vmatpush1.bf16.msra.mxu1 %v5830_v6  ;;  %v5872_v6 = vcombine.low %v2922_v3, %v2926_v55 }
 0xdcc   : > { %3727 = vmatpush1.bf16.msra.mxu0 %v5832_v34  ;;  %3675 = vmatprep.subr.bf16.mxu1 %v5839_v49  ;;  %v5873_v34 = vcombine.high %v2922_v3, %v2926_v55  ;;  %v2929_v49 = vld [vmem:[%s7235_s11 + $0x380] sm:$0xff] }
 0xdcd   : > { %3728 = vmatprep.subr.bf16.mxu0 %v5841_v7  ;;  %v2933_v7 = vld [vmem:[%s7235_s11 + $0x3a0] sm:$0xff] }
 0xdcf   : > { %3676 = vmatpush1.bf16.msra.mxu1 %v5838_v58  ;;  %v2930_v58 = vld [vmem:[%s7235_s11 + $0x388] sm:$0xff] }
 0xdd0   : > { %3729 = vmatpush1.bf16.msra.mxu0 %v5840_v10  ;;  %3677 = vmatprep.subr.bf16.mxu1 %v5847_v36  ;;  %v5878_v10 = vcombine.low %v2929_v49, %v2933_v7  ;;  %v7915_v36 = vld [vmem:[%s7235_s11 + $0x30] sm:$0xff] }
 0xdd1   : > { %3730 = vmatprep.subr.bf16.mxu0 %v5849_v4  ;;  %v7925_v4 = vld [vmem:[%s7235_s11 + $0x38] sm:$0xff] }
 0xdd2   : > { %v5772_v1 = vcombine.low %v7918_v47, %v7925_v4  ;;  %v5773_v9 = vcombine.high %v7918_v47, %v7925_v4  ;;  %v2851_v4 = vld [vmem:[%s7235_s11 + $0x110] sm:$0xff] }
 0xdd3   : > { %3678 = vmatpush1.bf16.msra.mxu1 %v5846_v31  ;;  %v5770_v31 = vcombine.low %v7912_v41, %v7915_v36 }
 0xdd4   : > { %3731 = vmatpush1.bf16.msra.mxu0 %v5848_v50  ;;  %3679 = vmatprep.subr.bf16.mxu1 %v5855_v53  ;;  %v5771_v50 = vcombine.high %v7912_v41, %v7915_v36 }
 0xdd5   : > { %3732 = vmatprep.subr.bf16.mxu0 %v5857_v59 }
 0xdd7   : > { %3680 = vmatpush1.bf16.msra.mxu1 %v5854_v8 }
 0xdd8   : > { %3733 = vmatpush1.bf16.msra.mxu0 %v5856_v57  ;;  %3681 = vmatprep.subr.bf16.mxu1 %v5863_v61 }
 0xdd9   : > { %3734 = vmatprep.subr.bf16.mxu0 %v5865_v62 }
 0xddb   : > { %3682 = vmatpush1.bf16.msra.mxu1 %v5862_v44 }
 0xddc   : > { %3735 = vmatpush1.bf16.msra.mxu0 %v5864_v48  ;;  %3683 = vmatprep.subr.bf16.mxu1 %v5871_v56 }
 0xddd   : > { %3736 = vmatprep.subr.bf16.mxu0 %v5873_v34 }
 0xddf   : > { %3684 = vmatpush1.bf16.msra.mxu1 %v5870_v46 }
 0xde0   : > { %3737 = vmatpush1.bf16.msra.mxu0 %v5872_v6  ;;  %v7952_v6 = vld [vmem:[%s7251_s17 + $0x10] sm:$0xff] }
 0xde1   : > { %v2768_v34 = vrot.slane %v7952_v6, %v7367_v29 }
 0xe09   : > { %v2699_v11 = vpop.xlane.xlu0 %2698 }
 0xe0a   : > { %v2709_v12 = vmul.f32 0.00390625, %v2699_v11  ;;  %v5879_v11 = vcombine.high %v2929_v49, %v2933_v7  ;;  %v2764_v49 = vrot.slane %v7952_v6, %v7364_v28  ;;  %v2794_v7 = vrot.slane %v7795_v63, %v7367_v29 }
 0xe0b   : > { %v2702_v13 = vpop.xlane.xlu1 %2701 }
 0xe0c   : > { %v7868_v16 = vsub.f32 %v7803_v0, %v2709_v12  ;;  %v7871_v45 = vsub.f32 %v7805_v43, %v2709_v12  ;;  %v2710_v20 = vmul.f32 0.00390625, %v2702_v13  ;;  %v2934_v12 = vld [vmem:[%s7235_s11 + $0x3a8] sm:$0xff]  ;;  %v2937_v13 = vld [vmem:[%s7235_s11 + $0x3c0] sm:$0xff]  ;;  %3685 = vmatprep.subr.bf16.mxu1 %v5879_v11  ;;  %v7966_v11 = vrot.slane %v2764_v49, %v7364_v28  ;;  %v2848_v49 = vld [vmem:[%s7235_s11 + $0xf8] sm:$0xff] }
 0xe0d   : > { %3686 = vmatpush1.bf16.msra.mxu1 %v5878_v10  ;;  %v7963_v10 = vrot.slane %v2768_v34, %v7364_v28  ;;  %v2844_v34 = vld [vmem:[%s7235_s11 + $0xd8] sm:$0xff] }
 0xe0e   : > { %v7874_v25 = vsub.f32 %v7807_v14, %v2710_v20  ;;  %v7877_v26 = vsub.f32 %v7809_v17, %v2710_v20  ;;  %v2721_v27 = vmul.f32 %v7868_v16, %v7868_v16  ;;  %v2722_v39 = vmul.f32 %v7871_v45, %v7871_v45  ;;  %v2941_v20 = vld [vmem:[%s7235_s11 + $0x3e0] sm:$0xff] }
 0xe0f   : > { %v5886_v40 = vcombine.low %v2937_v13, %v2941_v20 }
 0xe10   : > { %v2729_v30 = vadd.f32 %v2722_v39, %v2721_v27  ;;  %v2723_v32 = vmul.f32 %v7874_v25, %v7874_v25  ;;  %v2724_v37 = vmul.f32 %v7877_v26, %v7877_v26  ;;  %v5880_v27 = vcombine.low %v2930_v58, %v2934_v12 }
 0xe11   : > { %v5881_v39 = vcombine.high %v2930_v58, %v2934_v12  ;;  %v2790_v58 = vrot.slane %v7795_v63, %v7364_v28 }
 0xe12   : > { %2730 = vadd.xlane.f32.xlu1 %v2729_v30  ;;  %v2732_v38 = vadd.f32 %v2724_v37, %v2723_v32  ;;  %v5887_v30 = vcombine.high %v2937_v13, %v2941_v20  ;;  %v2938_v32 = vld [vmem:[%s7235_s11 + $0x3c8] sm:$0xff] }
 0xe13   : > { %v2942_v37 = vld [vmem:[%s7235_s11 + $0x3e8] sm:$0xff]  ;;  %3738 = vmatprep.subr.bf16.mxu0 %v5881_v39  ;;  %v7971_v39 = vrot.slane %v2794_v7, %v7364_v28  ;;  %v7974_v63 = vrot.slane %v2790_v58, %v7364_v28  ;;  %v2852_v7 = vld [vmem:[%s7235_s11 + $0x118] sm:$0xff] }
 0xe14   : > { %2733 = vadd.xlane.f32.xlu0 %v2732_v38  ;;  %v5889_v38 = vcombine.high %v2938_v32, %v2942_v37  ;;  %3739 = vmatpush1.bf16.msra.mxu0 %v5880_v27  ;;  %v5888_v35 = vcombine.low %v2938_v32, %v2942_v37  ;;  %v2856_v58 = vld [vmem:[%s7235_s11 + $0x138] sm:$0xff] }
 0xe15   : > { %3687 = vmatprep.subr.bf16.mxu1 %v5887_v30 }
 0xe16   : > { %3740 = vmatprep.subr.bf16.mxu0 %v5889_v38  ;;  %3688 = vmatpush1.bf16.msra.mxu1 %v5886_v40  ;;  %v2827_v40 = vld [vmem:[%s7235_s11 + $0x50] sm:$0xff] }
 0xe17   : > { %3763 = vmatprep.subr.bf16.mxu1 %v5771_v50 }
 0xe18   : > { %3741 = vmatpush1.bf16.msra.mxu0 %v5888_v35 }
 0xe19   : > { %3816 = vmatprep.subr.bf16.mxu0 %v5773_v9  ;;  %v2831_v9 = vld [vmem:[%s7235_s11 + $0x70] sm:$0xff] }
 0xe42   : > { %v2705_v51 = vpop.xlane.xlu0 %2704 }
 0xe43   : > { %v2711_v53 = vmul.f32 0.00390625, %v2705_v51  ;;  %v2828_v51 = vld [vmem:[%s7235_s11 + $0x58] sm:$0xff] }
 0xe45   : > { %v7932_v54 = vsub.f32 %v7815_v33, %v2711_v53  ;;  %v7935_v8 = vsub.f32 %v7817_v15, %v2711_v53  ;;  %v2832_v53 = vld [vmem:[%s7235_s11 + $0x78] sm:$0xff]  ;;  %v6600_v15 = vld [vmem:[%s7253_s24 + $0x204] ss:$8 sps:$4 sm:$0xff]  }
 0xe46   : > { %v2708_v57 = vpop.xlane.xlu0 %2707 }
 0xe47   : > { %v2712_v59 = vmul.f32 0.00390625, %v2708_v57  ;;  %v2725_v18 = vmul.f32 %v7932_v54, %v7932_v54  ;;  %v2726_v60 = vmul.f32 %v7935_v8, %v7935_v8 }
 0xe49   : > { %v7942_v52 = vsub.f32 %v7819_v42, %v2712_v59  ;;  %v7945_v61 = vsub.f32 %v7821_v22, %v2712_v59  ;;  %v2735_v23 = vadd.f32 %v2726_v60, %v2725_v18  ;;  %v5779_v18 = vcombine.high %v2827_v40, %v2831_v9 }
 0xe4a   : > { %v5781_v60 = vcombine.high %v2828_v51, %v2832_v53 }
 0xe4b   : > { %2736 = vadd.xlane.f32.xlu1 %v2735_v23  ;;  %v2727_v44 = vmul.f32 %v7942_v52, %v7942_v52  ;;  %v2728_v48 = vmul.f32 %v7945_v61, %v7945_v61  ;;  %v2835_v23 = vld [vmem:[%s7235_s11 + $0x90] sm:$0xff] }
 0xe4d   : > { %v2738_v62 = vadd.f32 %v2728_v48, %v2727_v44  ;;  %v2839_v44 = vld [vmem:[%s7235_s11 + $0xb0] sm:$0xff]  ;;  %v2836_v48 = vld [vmem:[%s7235_s11 + $0x98] sm:$0xff] }
 0xe4e   : > { %v5786_v41 = vcombine.low %v2835_v23, %v2839_v44 }
 0xe4f   : > { %2739 = vadd.xlane.f32.xlu0 %v2738_v62  ;;  %v2840_v62 = vld [vmem:[%s7235_s11 + $0xb8] sm:$0xff] }
 0xe50   : > { %v5788_v36 = vcombine.low %v2836_v48, %v2840_v62 }
 0xe9f   : > { %v2731_v2 = vpop.xlane.xlu1 %2730 }
 0xea0   : > { %v2741_v24 = vmul.f32 0.00390625, %v2731_v2  ;;  %v5778_v2 = vcombine.low %v2827_v40, %v2831_v9  ;;  %v2872_v9 = vld [vmem:[%s7235_s11 + $0x1b8] sm:$0xff] }
 0xea1   : > { %v2734_v3 = vpop.xlane.xlu0 %2733 }
 0xea2   : > { %v2745_v56 = vadd.f32 1e-05, %v2741_v24  ;;  %v2742_v55 = vmul.f32 0.00390625, %v2734_v3  ;;  %v5780_v24 = vcombine.low %v2828_v51, %v2832_v53  ;;  %v5787_v3 = vcombine.high %v2835_v23, %v2839_v44  ;;  %v2875_v23 = vld [vmem:[%s7235_s11 + $0x1d0] sm:$0xff] }
 0xea3   : > { %v2879_v44 = vld [vmem:[%s7235_s11 + $0x1f0] sm:$0xff] }
 0xea4   : > { %6766 = vrsqrt.f32 %v2745_v56  ;;  %v2746_v46 = vadd.f32 1e-05, %v2742_v55  ;;  %v5789_v56 = vcombine.high %v2836_v48, %v2840_v62  ;;  %v2843_v55 = vld [vmem:[%s7235_s11 + $0xd0] sm:$0xff]  ;;  %v2876_v48 = vld [vmem:[%s7235_s11 + $0x1d8] sm:$0xff] }
 0xea5   : > { %v2880_v62 = vld [vmem:[%s7235_s11 + $0x1f8] sm:$0xff] }
 0xea6   : > { %6768 = vrsqrt.f32 %v2746_v46  ;;  %v2847_v46 = vld [vmem:[%s7235_s11 + $0xf0] sm:$0xff] }
 0xea7   : > { %v5795_v47 = vcombine.high %v2843_v55, %v2847_v46 }
 0xeae   : > { %v6767_v12 = vpop.eup %6766 }
 0xeaf   : > { %v2753_v13 = vmul.f32 %v6767_v12, %v7868_v16  ;;  %v2754_v20 = vmul.f32 %v6767_v12, %v7871_v45  ;;  %v5794_v12 = vcombine.low %v2843_v55, %v2847_v46  ;;  %v2883_v55 = vld [vmem:[%s7235_s11 + $0x210] sm:$0xff] }
 0xeb0   : > { %v6769_v27 = vpop.eup %6768  ;;  %v2887_v46 = vld [vmem:[%s7235_s11 + $0x230] sm:$0xff] }
 0xeb1   : > { %v2755_v30 = vmul.f32 %v6769_v27, %v7874_v25  ;;  %v2756_v32 = vmul.f32 %v6769_v27, %v7877_v26  ;;  %v2780_v37 = vmul.f32 %v7963_v10, %v2754_v20  ;;  %v2779_v16 = vmul.f32 %v7966_v11, %v2753_v13 }
 0xeb2   : > { %v5796_v13 = vcombine.low %v2844_v34, %v2848_v49  ;;  %v5805_v27 = vcombine.high %v2852_v7, %v2856_v58 }
 0xeb3   : > { %v2782_v45 = vmul.f32 %v7963_v10, %v2756_v32  ;;  %v2781_v38 = vmul.f32 %v7966_v11, %v2755_v30  ;;  %v2806_v35 = vadd.f32 %v7971_v39, %v2780_v37  ;;  %v2805_v25 = vadd.f32 %v7974_v63, %v2779_v16  ;;  %v2859_v30 = vld [vmem:[%s7235_s11 + $0x150] sm:$0xff]  ;;  %v2860_v37 = vld [vmem:[%s7235_s11 + $0x158] sm:$0xff] }
 0xeb4   : > { %v2863_v32 = vld [vmem:[%s7235_s11 + $0x170] sm:$0xff]  ;;  %v2864_v16 = vld [vmem:[%s7235_s11 + $0x178] sm:$0xff] }
 0xeb5   : > { %v2808_v50 = vadd.f32 %v7971_v39, %v2782_v45  ;;  %v2807_v26 = vadd.f32 %v7974_v63, %v2781_v38  ;;  %v5804_v38 = vcombine.low %v2852_v7, %v2856_v58  ;;  %v5811_v40 = vcombine.high %v2859_v30, %v2863_v32  ;;  %v2892_v7 = vld [vmem:[%s7235_s11 + $0x258] sm:$0xff] }
 0xeb6   : > { %v5810_v51 = vcombine.low %v2859_v30, %v2863_v32  ;;  %v5812_v53 = vcombine.low %v2860_v37, %v2864_v16  ;;  %v2896_v58 = vld [vmem:[%s7235_s11 + $0x278] sm:$0xff]  ;;  %v2899_v32 = vld [vmem:[%s7235_s11 + $0x290] sm:$0xff] }
 0xeb7   : > { %v7990_v57 = vpack.c.bf16 %v2808_v50, %v2806_v35  ;;  %v7992_v59 = vpack.c.bf16 %v2807_v26, %v2805_v25  ;;  %v5813_v35 = vcombine.high %v2860_v37, %v2864_v16  ;;  %v2867_v50 = vld [vmem:[%s7235_s11 + $0x190] sm:$0xff]  ;;  %v2868_v26 = vld [vmem:[%s7235_s11 + $0x198] sm:$0xff]  ;;  %v5845_v30 = vcombine.high %v2892_v7, %v2896_v58 }
 0xeb8   : > { %v2871_v25 = vld [vmem:[%s7235_s11 + $0x1b0] sm:$0xff] }
 0xeb9   : > { %3689 = vmatprep.mubr.bf16.mxu1 %v7990_v57  ;;  %3742 = vmatprep.mubr.bf16.mxu0 %v7990_v57  ;;  %v2903_v16 = vld [vmem:[%s7235_s11 + $0x2b0] sm:$0xff] }
 0xeba   : > { %3690 = vmatmul.mubr.bf16.vlgmr.msra.gmra.mrb[36].mxu1 %v7992_v59  ;;  %3743 = vmatmul.mubr.bf16.vlgmr.msra.gmra.mrb[60].mxu0 %v7992_v59 }
 0xebb   : > { %3764 = vmatpush1.bf16.msra.mxu1 %v5770_v31  ;;  %3817 = vmatpush1.bf16.msra.mxu0 %v5772_v1  ;;  %v5797_v31 = vcombine.high %v2844_v34, %v2848_v49  ;;  %v2855_v1 = vld [vmem:[%s7235_s11 + $0x130] sm:$0xff]  ;;  %v2884_v34 = vld [vmem:[%s7235_s11 + $0x218] sm:$0xff] }
 0xebc   : > { %3765 = vmatprep.subr.bf16.mxu1 %v5779_v18  ;;  %3818 = vmatprep.subr.bf16.mxu0 %v5781_v60  ;;  %v5803_v20 = vcombine.high %v2851_v4, %v2855_v1  ;;  %v5802_v45 = vcombine.low %v2851_v4, %v2855_v1  ;;  %v5819_v18 = vcombine.high %v2867_v50, %v2871_v25  ;;  %v2888_v49 = vld [vmem:[%s7235_s11 + $0x238] sm:$0xff]  ;;  %v2891_v4 = vld [vmem:[%s7235_s11 + $0x250] sm:$0xff] }
 0xebd   : > { %v5821_v60 = vcombine.high %v2868_v26, %v2872_v9  ;;  %v2895_v1 = vld [vmem:[%s7235_s11 + $0x270] sm:$0xff] }
 0xebf   : > { %3766 = vmatpush1.bf16.msra.mxu1 %v5778_v2  ;;  %3819 = vmatpush1.bf16.msra.mxu0 %v5780_v24  ;;  %v5818_v2 = vcombine.low %v2867_v50, %v2871_v25  ;;  %v5820_v24 = vcombine.low %v2868_v26, %v2872_v9  ;;  %v5844_v50 = vcombine.low %v2892_v7, %v2896_v58 }
 0xec0   : > { %3767 = vmatprep.subr.bf16.mxu1 %v5787_v3  ;;  %3820 = vmatprep.subr.bf16.mxu0 %v5789_v56  ;;  %v5827_v3 = vcombine.high %v2875_v23, %v2879_v44  ;;  %v5829_v56 = vcombine.high %v2876_v48, %v2880_v62  ;;  %v5851_v26 = vcombine.high %v2899_v32, %v2903_v16 }
 0xec3   : > { %3768 = vmatpush1.bf16.msra.mxu1 %v5786_v41  ;;  %3821 = vmatpush1.bf16.msra.mxu0 %v5788_v36  ;;  %v5826_v41 = vcombine.low %v2875_v23, %v2879_v44  ;;  %v5828_v36 = vcombine.low %v2876_v48, %v2880_v62  ;;  %v2912_v23 = vld [vmem:[%s7235_s11 + $0x2f8] sm:$0xff]  ;;  %v5850_v48 = vcombine.low %v2899_v32, %v2903_v16 }
 0xec4   : > { %3769 = vmatprep.subr.bf16.mxu1 %v5795_v47  ;;  %3822 = vmatprep.subr.bf16.mxu0 %v5797_v31  ;;  %v5835_v47 = vcombine.high %v2883_v55, %v2887_v46  ;;  %v5837_v31 = vcombine.high %v2884_v34, %v2888_v49  ;;  %v2932_v16 = vld [vmem:[%s7235_s11 + $0x398] sm:$0xff] }
 0xec7   : > { %3770 = vmatpush1.bf16.msra.mxu1 %v5794_v12  ;;  %3823 = vmatpush1.bf16.msra.mxu0 %v5796_v13  ;;  %v5834_v12 = vcombine.low %v2883_v55, %v2887_v46  ;;  %v5836_v13 = vcombine.low %v2884_v34, %v2888_v49  ;;  %v2916_v55 = vld [vmem:[%s7235_s11 + $0x318] sm:$0xff] }
 0xec8   : > { %3771 = vmatprep.subr.bf16.mxu1 %v5803_v20  ;;  %3824 = vmatprep.subr.bf16.mxu0 %v5805_v27  ;;  %v5843_v27 = vcombine.high %v2891_v4, %v2895_v1  ;;  %v2920_v46 = vld [vmem:[%s7235_s11 + $0x338] sm:$0xff] }
 0xecb   : > { %3772 = vmatpush1.bf16.msra.mxu1 %v5802_v45  ;;  %3825 = vmatpush1.bf16.msra.mxu0 %v5804_v38  ;;  %v2900_v45 = vld [vmem:[%s7235_s11 + $0x298] sm:$0xff] }
 0xecc   : > { %3773 = vmatprep.subr.bf16.mxu1 %v5811_v40  ;;  %3826 = vmatprep.subr.bf16.mxu0 %v5813_v35  ;;  %v2904_v38 = vld [vmem:[%s7235_s11 + $0x2b8] sm:$0xff]  ;;  %v5842_v35 = vcombine.low %v2891_v4, %v2895_v1 }
 0xecd   : > { %v5853_v9 = vcombine.high %v2900_v45, %v2904_v38  ;;  %v5852_v62 = vcombine.low %v2900_v45, %v2904_v38  ;;  %v2924_v4 = vld [vmem:[%s7235_s11 + $0x358] sm:$0xff] }
 0xece   : > { %v2928_v1 = vld [vmem:[%s7235_s11 + $0x378] sm:$0xff] }
 0xecf   : > { %3774 = vmatpush1.bf16.msra.mxu1 %v5810_v51  ;;  %3827 = vmatpush1.bf16.msra.mxu0 %v5812_v53  ;;  %v2907_v51 = vld [vmem:[%s7235_s11 + $0x2d0] sm:$0xff]  ;;  %v5877_v32 = vcombine.high %v2924_v4, %v2928_v1  ;;  %v2936_v45 = vld [vmem:[%s7235_s11 + $0x3b8] sm:$0xff] }
 0xed0   : > { %3775 = vmatprep.subr.bf16.mxu1 %v5819_v18  ;;  %3828 = vmatprep.subr.bf16.mxu0 %v5821_v60  ;;  %v2911_v18 = vld [vmem:[%s7235_s11 + $0x2f0] sm:$0xff]  ;;  %v2908_v60 = vld [vmem:[%s7235_s11 + $0x2d8] sm:$0xff] }
 0xed1   : > { %v5858_v34 = vcombine.low %v2907_v51, %v2911_v18  ;;  %v5860_v49 = vcombine.low %v2908_v60, %v2912_v23 }
 0xed3   : > { %3776 = vmatpush1.bf16.msra.mxu1 %v5818_v2  ;;  %3829 = vmatpush1.bf16.msra.mxu0 %v5820_v24  ;;  %v5859_v2 = vcombine.high %v2907_v51, %v2911_v18  ;;  %v5861_v24 = vcombine.high %v2908_v60, %v2912_v23  ;;  %v5884_v23 = vcombine.low %v2932_v16, %v2936_v45 }
 0xed4   : > { %3777 = vmatprep.subr.bf16.mxu1 %v5827_v3  ;;  %3830 = vmatprep.subr.bf16.mxu0 %v5829_v56  ;;  %v2915_v3 = vld [vmem:[%s7235_s11 + $0x310] sm:$0xff] }
 0xed5   : > { %v2919_v56 = vld [vmem:[%s7235_s11 + $0x330] sm:$0xff] }
 0xed6   : > { %v5866_v58 = vcombine.low %v2915_v3, %v2919_v56 }
 0xed7   : > { %3778 = vmatpush1.bf16.msra.mxu1 %v5826_v41  ;;  %3831 = vmatpush1.bf16.msra.mxu0 %v5828_v36  ;;  %v5867_v41 = vcombine.high %v2915_v3, %v2919_v56  ;;  %v5869_v36 = vcombine.high %v2916_v55, %v2920_v46 }
 0xed8   : > { %v2737_v20 = vpop.xlane.xlu1 %2736  ;;  %3779 = vmatprep.subr.bf16.mxu1 %v5835_v47  ;;  %3832 = vmatprep.subr.bf16.mxu0 %v5837_v31  ;;  %v2923_v47 = vld [vmem:[%s7235_s11 + $0x350] sm:$0xff] }
 0xed9   : > { %v2743_v37 = vmul.f32 0.00390625, %v2737_v20  ;;  %v2927_v31 = vld [vmem:[%s7235_s11 + $0x370] sm:$0xff] }
 0xeda   : > { %v2931_v20 = vld [vmem:[%s7235_s11 + $0x390] sm:$0xff]  ;;  %v5874_v38 = vcombine.low %v2923_v47, %v2927_v31 }
 0xedb   : > { %v2747_v40 = vadd.f32 1e-05, %v2743_v37  ;;  %3780 = vmatpush1.bf16.msra.mxu1 %v5834_v12  ;;  %3833 = vmatpush1.bf16.msra.mxu0 %v5836_v13  ;;  %v5868_v12 = vcombine.low %v2916_v55, %v2920_v46  ;;  %v5875_v13 = vcombine.high %v2923_v47, %v2927_v31  ;;  %v2935_v37 = vld [vmem:[%s7235_s11 + $0x3b0] sm:$0xff]  ;;  %v6502_v46 = vld [vmem:[%s7253_s24] ss:$8 sps:$4 sm:$0xff]  }
 0xedc   : > { %v2740_v25 = vpop.xlane.xlu0 %2739  ;;  %3781 = vmatprep.subr.bf16.mxu1 %v5843_v27  ;;  %3834 = vmatprep.subr.bf16.mxu0 %v5845_v30  ;;  %v5882_v60 = vcombine.low %v2931_v20, %v2935_v37  ;;  %v6516_v47 = vld [vmem:[%s7253_s24 + $0x44] ss:$8 sps:$4 sm:$0xff]   ;;  %v6514_v31 = vld [vmem:[%s7253_s24 + $0x40] ss:$8 sps:$4 sm:$0xff]  }
 0xedd   : > { %6770 = vrsqrt.f32 %v2747_v40  ;;  %v2744_v53 = vmul.f32 0.00390625, %v2740_v25  ;;  %v5876_v40 = vcombine.low %v2924_v4, %v2928_v1  ;;  %v5883_v25 = vcombine.high %v2931_v20, %v2935_v37  ;;  %v6519_v4 = vld [vmem:[%s7253_s24 + $0x54] ss:$8 sps:$4 sm:$0xff]   ;;  %v6517_v1 = vld [vmem:[%s7253_s24 + $0x50] ss:$8 sps:$4 sm:$0xff]  }
 0xede   : > { %v6528_v20 = vld [vmem:[%s7253_s24 + $0x84] ss:$8 sps:$4 sm:$0xff]  }
 0xedf   : > { %v2748_v44 = vadd.f32 1e-05, %v2744_v53  ;;  %3782 = vmatpush1.bf16.msra.mxu1 %v5842_v35  ;;  %3835 = vmatpush1.bf16.msra.mxu0 %v5844_v50  ;;  %v6534_v37 = vld [vmem:[%s7253_s24 + $0xa4] ss:$8 sps:$4 sm:$0xff]  }
 0xee0   : > { %3783 = vmatprep.subr.bf16.mxu1 %v5851_v26  ;;  %3836 = vmatprep.subr.bf16.mxu0 %v5853_v9  ;;  %v5885_v26 = vcombine.high %v2932_v16, %v2936_v45  ;;  %v6532_v16 = vld [vmem:[%s7253_s24 + $0xa0] ss:$8 sps:$4 sm:$0xff]   ;;  %v6537_v45 = vld [vmem:[%s7253_s24 + $0xb4] ss:$8 sps:$4 sm:$0xff]  }
 0xee1   : > { %6772 = vrsqrt.f32 %v2748_v44 }
 0xee3   : > { %3784 = vmatpush1.bf16.msra.mxu1 %v5850_v48  ;;  %3837 = vmatpush1.bf16.msra.mxu0 %v5852_v62  ;;  %v2943_v62 = vld [vmem:[%s7235_s11 + $0x3f0] sm:$0xff] }
 0xee4   : > { %3785 = vmatprep.subr.bf16.mxu1 %v5859_v2  ;;  %3838 = vmatprep.subr.bf16.mxu0 %v5861_v24  ;;  %v2944_v2 = vld [vmem:[%s7235_s11 + $0x3f8] sm:$0xff] }
 0xee7   : > { %v6771_v7 = vpop.eup %6770  ;;  %3786 = vmatpush1.bf16.msra.mxu1 %v5858_v34  ;;  %3839 = vmatpush1.bf16.msra.mxu0 %v5860_v49  ;;  %v6507_v34 = vld [vmem:[%s7253_s24 + $0x14] ss:$8 sps:$4 sm:$0xff]   ;;  %v6510_v49 = vld [vmem:[%s7253_s24 + $0x24] ss:$8 sps:$4 sm:$0xff]  }
 0xee8   : > { %v2757_v27 = vmul.f32 %v6771_v7, %v7932_v54  ;;  %v2758_v30 = vmul.f32 %v6771_v7, %v7935_v8  ;;  %3787 = vmatprep.subr.bf16.mxu1 %v5867_v41  ;;  %3840 = vmatprep.subr.bf16.mxu0 %v5869_v36  ;;  %v6508_v41 = vld [vmem:[%s7253_s24 + $0x20] ss:$8 sps:$4 sm:$0xff]   ;;  %v6513_v36 = vld [vmem:[%s7253_s24 + $0x34] ss:$8 sps:$4 sm:$0xff]   ;;  %v6522_v7 = vld [vmem:[%s7253_s24 + $0x64] ss:$8 sps:$4 sm:$0xff]  }
 0xeea   : > { %v2784_v50 = vmul.f32 %v7963_v10, %v2758_v30  ;;  %v2783_v9 = vmul.f32 %v7966_v11, %v2757_v27  ;;  %v6526_v27 = vld [vmem:[%s7253_s24 + $0x80] ss:$8 sps:$4 sm:$0xff]   ;;  %v6531_v30 = vld [vmem:[%s7253_s24 + $0x94] ss:$8 sps:$4 sm:$0xff]  }
 0xeeb   : > { %v6773_v35 = vpop.eup %6772  ;;  %3788 = vmatpush1.bf16.msra.mxu1 %v5866_v58  ;;  %3841 = vmatpush1.bf16.msra.mxu0 %v5868_v12  ;;  %v6520_v58 = vld [vmem:[%s7253_s24 + $0x60] ss:$8 sps:$4 sm:$0xff]   ;;  %v6525_v12 = vld [vmem:[%s7253_s24 + $0x74] ss:$8 sps:$4 sm:$0xff]  }
 0xeec   : > { %v2759_v54 = vmul.f32 %v6773_v35, %v7942_v52  ;;  %v2760_v8 = vmul.f32 %v6773_v35, %v7945_v61  ;;  %3789 = vmatprep.subr.bf16.mxu1 %v5875_v13  ;;  %3842 = vmatprep.subr.bf16.mxu0 %v5877_v32  ;;  %v2810_v18 = vadd.f32 %v7971_v39, %v2784_v50  ;;  %v2939_v52 = vld [vmem:[%s7235_s11 + $0x3d0] sm:$0xff]  ;;  %v6538_v35 = vld [vmem:[%s7253_s24 + $0xc0] ss:$8 sps:$4 sm:$0xff]  }
 0xeed   : > { %v2809_v44 = vadd.f32 %v7974_v63, %v2783_v9  ;;  %v5891_v3 = vcombine.high %v2939_v52, %v2943_v62  ;;  %v6523_v13 = vld [vmem:[%s7253_s24 + $0x70] ss:$8 sps:$4 sm:$0xff]   ;;  %v6543_v50 = vld [vmem:[%s7253_s24 + $0xd4] ss:$8 sps:$4 sm:$0xff]  }
 0xeee   : > { %v2786_v51 = vmul.f32 %v7963_v10, %v2760_v8  ;;  %v2785_v53 = vmul.f32 %v7966_v11, %v2759_v54  ;;  %v2940_v10 = vld [vmem:[%s7235_s11 + $0x3d8] sm:$0xff]  ;;  %v6544_v54 = vld [vmem:[%s7253_s24 + $0xe0] ss:$8 sps:$4 sm:$0xff]  }
 0xeef   : > { %3790 = vmatpush1.bf16.msra.mxu1 %v5874_v38  ;;  %3843 = vmatpush1.bf16.msra.mxu0 %v5876_v40  ;;  %v5893_v56 = vcombine.high %v2940_v10, %v2944_v2  ;;  %v5892_v55 = vcombine.low %v2940_v10, %v2944_v2  ;;  %v6529_v32 = vld [vmem:[%s7253_s24 + $0x90] ss:$8 sps:$4 sm:$0xff]   ;;  %v6540_v40 = vld [vmem:[%s7253_s24 + $0xc4] ss:$8 sps:$4 sm:$0xff]   ;;  %v6549_v8 = vld [vmem:[%s7253_s24 + $0xf4] ss:$8 sps:$4 sm:$0xff]  }
 0xef0   : > { %v2812_v61 = vadd.f32 %v7971_v39, %v2786_v51  ;;  %v2811_v48 = vadd.f32 %v7974_v63, %v2785_v53  ;;  %3791 = vmatprep.subr.bf16.mxu1 %v5883_v25  ;;  %3844 = vmatprep.subr.bf16.mxu0 %v5885_v26  ;;  %v5890_v39 = vcombine.low %v2939_v52, %v2943_v62  ;;  %v6504_v63 = vld [vmem:[%s7253_s24 + $0x4] ss:$8 sps:$4 sm:$0xff]   ;;  %v6535_v38 = vld [vmem:[%s7253_s24 + $0xb0] ss:$8 sps:$4 sm:$0xff]   ;;  %v8110_v53 = vsub.s32 2, %v7361_v21 }
 0xef1   : > { %v6541_v25 = vld [vmem:[%s7253_s24 + $0xd0] ss:$8 sps:$4 sm:$0xff]   ;;  %v6546_v26 = vld [vmem:[%s7253_s24 + $0xe4] ss:$8 sps:$4 sm:$0xff]  }
 0xef2   : > { %v2816_v11 = vpack.c.bf16 %v2812_v61, %v2810_v18  ;;  %v2815_v24 = vpack.c.bf16 %v2811_v48, %v2809_v44  ;;  %v6547_v9 = vld [vmem:[%s7253_s24 + $0xf0] ss:$8 sps:$4 sm:$0xff]   ;;  %v6552_v51 = vld [vmem:[%s7253_s24 + $0x104] ss:$8 sps:$4 sm:$0xff]   ;;  %8822 = vst [vmem:[#allocation23_spill] sm:$0xff] %v8110_v53  ;;  %v8113_v18 = vsub.s32 6, %v7361_v21 }
 0xef3   : > { %3792 = vmatpush1.bf16.msra.mxu1 %v5882_v60  ;;  %3845 = vmatpush1.bf16.msra.mxu0 %v5884_v23  ;;  %v6847_v60 = vld [vmem:[%s7251_s17] sm:$0xff]  ;;  %v6848_v52 = vld [vmem:[%s7251_s17 + $0x8] sm:$0xff] }
 0xef4   : > { %3699 = vmatprep.mubr.bf16.mxu1 %v2816_v11  ;;  %3752 = vmatprep.mubr.bf16.mxu0 %v2816_v11  ;;  %v2948_v23 = vrot.slane %v6847_v60, %v8110_v53  ;;  %v2956_v61 = vrot.slane %v6848_v52, %v8110_v53  ;;  %v2952_v44 = vrot.slane %v6847_v60, %v8113_v18 }
 0xef5   : > { %3700 = vmatmul.mubr.bf16.gmra.mrb[40].mxu1 %v2815_v24  ;;  %3753 = vmatmul.mubr.bf16.gmra.mrb[64].mxu0 %v2815_v24  ;;  %v2960_v48 = vrot.slane %v6848_v52, %v8113_v18 }
 0xef6   : > { %3795 = vmatprep.mubr.bf16.mxu1 %v7990_v57  ;;  %3848 = vmatprep.mubr.bf16.mxu0 %v7990_v57  ;;  %v6505_v57 = vld [vmem:[%s7253_s24 + $0x10] ss:$8 sps:$4 sm:$0xff]   ;;  %v8122_v62 = vrot.slane %v2948_v23, %v8110_v53  ;;  %v8125_v10 = vrot.slane %v2956_v61, %v8110_v53  ;;  %v8128_v2 = vrot.slane %v2952_v44, %v8110_v53 }
 0xef7   : > { %3793 = vmatprep.subr.bf16.mxu1 %v5891_v3  ;;  %3846 = vmatprep.subr.bf16.mxu0 %v5893_v56 }
 0xef8   : > { %3794 = vmatpush1.bf16.msra.mxu1 %v5890_v39  ;;  %3847 = vmatpush1.bf16.msra.mxu0 %v5892_v55 }
 0xef9   : > { %4959 = vmatprep.subr.bf16.mxu1 %v6504_v63 }
 0xefd   : > { %3796 = vmatmul.mubr.bf16.vlgmr.msra.gmra.mrb[44].mxu1 %v7992_v59  ;;  %3849 = vmatmul.mubr.bf16.vlgmr.msra.gmra.mrb[68].mxu0 %v7992_v59  ;;  %v6511_v59 = vld [vmem:[%s7253_s24 + $0x30] ss:$8 sps:$4 sm:$0xff]  }
 0xefe   : > { %3805 = vmatprep.mubr.bf16.mxu1 %v2816_v11  ;;  %3858 = vmatprep.mubr.bf16.mxu0 %v2816_v11  ;;  %v8131_v11 = vrot.slane %v2960_v48, %v8110_v53 }
 0xeff   : > { %4960 = vmatpush1.bf16.msra.mxu1 %v6502_v46 }
 0xf00   : > { %4961 = vmatprep.subr.bf16.mxu1 %v6507_v34 }
 0xf03   : > { %4962 = vmatpush1.bf16.msra.mxu1 %v6505_v57 }
 0xf04   : > { %4963 = vmatprep.subr.bf16.mxu1 %v6510_v49 }
 0xf05   : > { %3806 = vmatmul.mubr.bf16.gmra.mrb[48].mxu1 %v2815_v24  ;;  %3859 = vmatmul.mubr.bf16.gmra.mrb[72].mxu0 %v2815_v24 }
 0xf07   : > { %4964 = vmatpush1.bf16.msra.mxu1 %v6508_v41 }
 0xf08   : > { %4965 = vmatprep.subr.bf16.mxu1 %v6513_v36 }
 0xf0b   : > { %4966 = vmatpush1.bf16.msra.mxu1 %v6511_v59 }
 0xf0c   : > { %4967 = vmatprep.subr.bf16.mxu1 %v6516_v47 }
 0xf0f   : > { %4968 = vmatpush1.bf16.msra.mxu1 %v6514_v31 }
 0xf10   : > { %4969 = vmatprep.subr.bf16.mxu1 %v6519_v4 }
 0xf13   : > { %4970 = vmatpush1.bf16.msra.mxu1 %v6517_v1 }
 0xf14   : > { %4971 = vmatprep.subr.bf16.mxu1 %v6522_v7 }
 0xf17   : > { %4972 = vmatpush1.bf16.msra.mxu1 %v6520_v58 }
 0xf18   : > { %4973 = vmatprep.subr.bf16.mxu1 %v6525_v12 }
 0xf1b   : > { %4974 = vmatpush1.bf16.msra.mxu1 %v6523_v13 }
 0xf1c   : > { %4975 = vmatprep.subr.bf16.mxu1 %v6528_v20 }
 0xf1f   : > { %4976 = vmatpush1.bf16.msra.mxu1 %v6526_v27 }
 0xf20   : > { %4977 = vmatprep.subr.bf16.mxu1 %v6531_v30 }
 0xf23   : > { %4978 = vmatpush1.bf16.msra.mxu1 %v6529_v32 }
 0xf24   : > { %4979 = vmatprep.subr.bf16.mxu1 %v6534_v37 }
 0xf27   : > { %4980 = vmatpush1.bf16.msra.mxu1 %v6532_v16 }
 0xf28   : > { %4981 = vmatprep.subr.bf16.mxu1 %v6537_v45 }
 0xf2b   : > { %4982 = vmatpush1.bf16.msra.mxu1 %v6535_v38 }
 0xf2c   : > { %4983 = vmatprep.subr.bf16.mxu1 %v6540_v40 }
 0xf2f   : > { %4984 = vmatpush1.bf16.msra.mxu1 %v6538_v35 }
 0xf30   : > { %4985 = vmatprep.subr.bf16.mxu1 %v6543_v50 }
 0xf33   : > { %4986 = vmatpush1.bf16.msra.mxu1 %v6541_v25 }
 0xf34   : > { %4987 = vmatprep.subr.bf16.mxu1 %v6546_v26 }
 0xf37   : > { %4988 = vmatpush1.bf16.msra.mxu1 %v6544_v54 }
 0xf38   : > { %4989 = vmatprep.subr.bf16.mxu1 %v6549_v8 }
 0xf3b   : > { %4990 = vmatpush1.bf16.msra.mxu1 %v6547_v9 }
 0xf3c   : > { %5012 = vmatprep.subr.bf16.mxu1 %v6552_v51 }
 0xf8d   : > { %v3691_v24 = vpop.f32.mrb[36].mxu1  ;;  %v3744_v3 = vpop.f32.mrb[60].mxu0 }
 0xf8e   : > { %v8134_v56 = vadd.f32 %v3691_v24, %v8122_v62  ;;  %v8137_v39 = vadd.f32 %v3744_v3, %v8125_v10  ;;  %v3693_v55 = vpop.f32.mrb[37].mxu1  ;;  %v3746_v63 = vpop.f32.mrb[61].mxu0 }
 0xf8f   : > { %v8140_v46 = vadd.f32 %v3693_v55, %v8128_v2  ;;  %v8143_v34 = vadd.f32 %v3746_v63, %v8131_v11  ;;  %v3695_v57 = vpop.f32.mrb[38].mxu1  ;;  %v3748_v49 = vpop.f32.mrb[62].mxu0 }
 0xf90   : > { %v3869_v41 = vmul.f32 %v8134_v56, %v8134_v56  ;;  %v3871_v36 = vmul.f32 %v8137_v39, %v8137_v39  ;;  %v8150_v59 = vadd.f32 %v3695_v57, %v8122_v62  ;;  %v8153_v47 = vadd.f32 %v3748_v49, %v8125_v10  ;;  %v3697_v31 = vpop.f32.mrb[39].mxu1  ;;  %v3750_v4 = vpop.f32.mrb[63].mxu0 }
 0xf91   : > { %v3870_v1 = vmul.f32 %v8140_v46, %v8140_v46  ;;  %v3872_v7 = vmul.f32 %v8143_v34, %v8143_v34  ;;  %v8160_v58 = vadd.f32 %v3697_v31, %v8128_v2  ;;  %v8163_v12 = vadd.f32 %v3750_v4, %v8131_v11 }
 0xf92   : > { %v3901_v13 = vmul.f32 %v3869_v41, %v8134_v56  ;;  %v3903_v20 = vmul.f32 %v3871_v36, %v8137_v39  ;;  %v3877_v27 = vmul.f32 %v8150_v59, %v8150_v59  ;;  %v3879_v30 = vmul.f32 %v8153_v47, %v8153_v47 }
 0xf93   : > { %v3902_v32 = vmul.f32 %v3870_v1, %v8140_v46  ;;  %v3904_v37 = vmul.f32 %v3872_v7, %v8143_v34  ;;  %v3878_v16 = vmul.f32 %v8160_v58, %v8160_v58  ;;  %v3880_v45 = vmul.f32 %v8163_v12, %v8163_v12 }
 0xf94   : > { %v3933_v38 = vmul.f32 0.044715, %v3901_v13  ;;  %v3935_v40 = vmul.f32 0.044715, %v3903_v20  ;;  %v3909_v35 = vmul.f32 %v3877_v27, %v8150_v59  ;;  %v3911_v50 = vmul.f32 %v3879_v30, %v8153_v47 }
 0xf95   : > { %v3934_v25 = vmul.f32 0.044715, %v3902_v32  ;;  %v3936_v26 = vmul.f32 0.044715, %v3904_v37  ;;  %v3910_v54 = vmul.f32 %v3878_v16, %v8160_v58  ;;  %v3912_v8 = vmul.f32 %v3880_v45, %v8163_v12 }
 0xf96   : > { %v3965_v9 = vadd.f32 %v3933_v38, %v8134_v56  ;;  %v3967_v51 = vadd.f32 %v3935_v40, %v8137_v39  ;;  %v3941_v60 = vmul.f32 0.044715, %v3909_v35  ;;  %v3943_v23 = vmul.f32 0.044715, %v3911_v50 }
 0xf97   : > { %v3966_v52 = vadd.f32 %v3934_v25, %v8140_v46  ;;  %v3968_v61 = vadd.f32 %v3936_v26, %v8143_v34  ;;  %v3942_v44 = vmul.f32 0.044715, %v3910_v54  ;;  %v3944_v48 = vmul.f32 0.044715, %v3912_v8 }
 0xf98   : > { %v3997_v24 = vmul.f32 0.7978846, %v3965_v9  ;;  %v3999_v3 = vmul.f32 0.7978846, %v3967_v51  ;;  %v3973_v55 = vadd.f32 %v3941_v60, %v8150_v59  ;;  %v3975_v63 = vadd.f32 %v3943_v23, %v8153_v47 }
 0xf99   : > { %v3998_v57 = vmul.f32 0.7978846, %v3966_v52  ;;  %v4000_v49 = vmul.f32 0.7978846, %v3968_v61  ;;  %v3974_v41 = vadd.f32 %v3942_v44, %v8160_v58  ;;  %v3976_v36 = vadd.f32 %v3944_v48, %v8163_v12 }
 0xf9a   : > { %6774 = vtanh.f32 %v3997_v24  ;;  %v4005_v31 = vmul.f32 0.7978846, %v3973_v55  ;;  %v4007_v4 = vmul.f32 0.7978846, %v3975_v63 }
 0xf9b   : > { %6776 = vtanh.f32 %v3999_v3  ;;  %v4006_v1 = vmul.f32 0.7978846, %v3974_v41  ;;  %v4008_v7 = vmul.f32 0.7978846, %v3976_v36  ;;  %v6550_v36 = vld [vmem:[%s7253_s24 + $0x100] ss:$8 sps:$4 sm:$0xff]  }
 0xf9c   : > { %6778 = vtanh.f32 %v3998_v57 }
 0xf9d   : > { %6780 = vtanh.f32 %v4000_v49 }
 0xf9e   : > { %6782 = vtanh.f32 %v4005_v31  ;;  %v6555_v31 = vld [vmem:[%s7253_s24 + $0x114] ss:$8 sps:$4 sm:$0xff]  }
 0xf9f   : > { %6784 = vtanh.f32 %v4007_v4  ;;  %v6561_v4 = vld [vmem:[%s7253_s24 + $0x134] ss:$8 sps:$4 sm:$0xff]  }
 0xfa0   : > { %6786 = vtanh.f32 %v4006_v1  ;;  %v6559_v1 = vld [vmem:[%s7253_s24 + $0x130] ss:$8 sps:$4 sm:$0xff]  }
 0xfa1   : > { %6788 = vtanh.f32 %v4008_v7  ;;  %v6564_v7 = vld [vmem:[%s7253_s24 + $0x144] ss:$8 sps:$4 sm:$0xff]  }
 0xfa4   : > { %v6775_v13 = vpop.eup %6774 }
 0xfa5   : > { %v6777_v20 = vpop.eup %6776  ;;  %v4061_v27 = vadd.f32 1.0, %v6775_v13  ;;  %v6562_v13 = vld [vmem:[%s7253_s24 + $0x140] ss:$8 sps:$4 sm:$0xff]  }
 0xfa6   : > { %v6779_v30 = vpop.eup %6778  ;;  %v4063_v32 = vadd.f32 1.0, %v6777_v20  ;;  %v6567_v20 = vld [vmem:[%s7253_s24 + $0x154] ss:$8 sps:$4 sm:$0xff]  }
 0xfa7   : > { %v6781_v37 = vpop.eup %6780  ;;  %v4062_v16 = vadd.f32 1.0, %v6779_v30  ;;  %v4093_v35 = vmul.f32 0.5, %v4061_v27  ;;  %v6565_v27 = vld [vmem:[%s7253_s24 + $0x150] ss:$8 sps:$4 sm:$0xff]   ;;  %v2964_v30 = vrot.slane %v7952_v6, %v8110_v53 }
 0xfa8   : > { %v6783_v45 = vpop.eup %6782  ;;  %v4064_v38 = vadd.f32 1.0, %v6781_v37  ;;  %v4095_v26 = vmul.f32 0.5, %v4063_v32  ;;  %v6849_v32 = vld [vmem:[%s7251_s17 + $0x18] sm:$0xff] }
 0xfa9   : > { %v6785_v40 = vpop.eup %6784  ;;  %v4069_v50 = vadd.f32 1.0, %v6783_v45  ;;  %v4094_v60 = vmul.f32 0.5, %v4062_v16  ;;  %v4125_v44 = vmul.f32 %v4093_v35, %v8134_v56  ;;  %v2972_v37 = vrot.slane %v6849_v32, %v8110_v53  ;;  %v6570_v16 = vld [vmem:[%s7253_s24 + $0x164] ss:$8 sps:$4 sm:$0xff]  }
 0xfaa   : > { %v6787_v25 = vpop.eup %6786  ;;  %v4071_v54 = vadd.f32 1.0, %v6785_v40  ;;  %v4096_v61 = vmul.f32 0.5, %v4064_v38  ;;  %v8192_v3 = vmul.f32 %v4095_v26, %v8137_v39  ;;  %v2968_v45 = vrot.slane %v7952_v6, %v8113_v18 }
 0xfab   : > { %v6789_v8 = vpop.eup %6788  ;;  %v4101_v9 = vmul.f32 0.5, %v4069_v50  ;;  %v4070_v51 = vadd.f32 1.0, %v6787_v25  ;;  %v4126_v49 = vmul.f32 %v4094_v60, %v8140_v46  ;;  %v2976_v38 = vrot.slane %v6849_v32, %v8113_v18 }
 0xfac   : > { %v4103_v23 = vmul.f32 0.5, %v4071_v54  ;;  %v4072_v52 = vadd.f32 1.0, %v6789_v8  ;;  %v6568_v8 = vld [vmem:[%s7253_s24 + $0x160] ss:$8 sps:$4 sm:$0xff]   ;;  %v8239_v6 = vrot.slane %v2972_v37, %v8110_v53 }
 0xfad   : > { %v4133_v48 = vmul.f32 %v4101_v9, %v8150_v59  ;;  %v4102_v24 = vmul.f32 0.5, %v4070_v51  ;;  %v8202_v59 = vmul.f32 %v4096_v61, %v8143_v34  ;;  %v6558_v34 = vld [vmem:[%s7253_s24 + $0x124] ss:$8 sps:$4 sm:$0xff]   ;;  %v8236_v9 = vrot.slane %v2964_v30, %v8110_v53  ;;  %v6574_v37 = vld [vmem:[%s7253_s24 + $0x180] ss:$8 sps:$4 sm:$0xff]  }
 0xfae   : > { %v8195_v55 = vmul.f32 %v4103_v23, %v8153_v47  ;;  %v4104_v63 = vmul.f32 0.5, %v4072_v52  ;;  %v6573_v52 = vld [vmem:[%s7253_s24 + $0x174] ss:$8 sps:$4 sm:$0xff]   ;;  %v8249_v61 = vrot.slane %v2968_v45, %v8110_v53 }
 0xfaf   : > { %v4157_v57 = vpack.c.bf16 %v4133_v48, %v4125_v44  ;;  %v4134_v41 = vmul.f32 %v4102_v24, %v8160_v58  ;;  %v6553_v58 = vld [vmem:[%s7253_s24 + $0x110] ss:$8 sps:$4 sm:$0xff]   ;;  %v8252_v44 = vrot.slane %v2976_v38, %v8110_v53 }
 0xfb0   : > { %v8205_v39 = vmul.f32 %v4104_v63, %v8163_v12  ;;  %v6556_v12 = vld [vmem:[%s7253_s24 + $0x120] ss:$8 sps:$4 sm:$0xff]  }
 0xfb1   : > { %v4158_v47 = vpack.c.bf16 %v4134_v41, %v4126_v49 }
 0xfb3   : > { %4991 = vmatprep.mubr.bf16.mxu1 %v4158_v47 }
 0xfb4   : > { %4992 = vmatmul.mubr.bf16.vlgmr.msra.gmra.mrb[52].mxu1 %v4157_v57 }
 0xfb5   : > { %5013 = vmatpush1.bf16.msra.mxu1 %v6550_v36 }
 0xfb6   : > { %5014 = vmatprep.subr.bf16.mxu1 %v6555_v31 }
 0xfb9   : > { %5015 = vmatpush1.bf16.msra.mxu1 %v6553_v58 }
 0xfba   : > { %5016 = vmatprep.subr.bf16.mxu1 %v6558_v34 }
 0xfbd   : > { %5017 = vmatpush1.bf16.msra.mxu1 %v6556_v12 }
 0xfbe   : > { %5018 = vmatprep.subr.bf16.mxu1 %v6561_v4  ;;  %v6571_v4 = vld [vmem:[%s7253_s24 + $0x170] ss:$8 sps:$4 sm:$0xff]  }
 0xfc1   : > { %5019 = vmatpush1.bf16.msra.mxu1 %v6559_v1 }
 0xfc2   : > { %5020 = vmatprep.subr.bf16.mxu1 %v6564_v7 }
 0xfc5   : > { %5021 = vmatpush1.bf16.msra.mxu1 %v6562_v13  ;;  %v6576_v13 = vld [vmem:[%s7253_s24 + $0x184] ss:$8 sps:$4 sm:$0xff]  }
 0xfc6   : > { %5022 = vmatprep.subr.bf16.mxu1 %v6567_v20 }
 0xfc8   : > { %v3701_v40 = vpop.f32.mrb[40].mxu1  ;;  %v3754_v35 = vpop.f32.mrb[64].mxu0 }
 0xfc9   : > { %v8229_v50 = vadd.f32 %v3701_v40, %v8122_v62  ;;  %v8232_v25 = vadd.f32 %v3754_v35, %v8125_v10  ;;  %5023 = vmatpush1.bf16.msra.mxu1 %v6565_v27  ;;  %v3703_v26 = vpop.f32.mrb[41].mxu1  ;;  %v3756_v54 = vpop.f32.mrb[65].mxu0 }
 0xfca   : > { %v8242_v18 = vadd.f32 %v3703_v26, %v8128_v2  ;;  %v8245_v51 = vadd.f32 %v3756_v54, %v8131_v11  ;;  %v3705_v60 = vpop.f32.mrb[42].mxu1  ;;  %v3758_v23 = vpop.f32.mrb[66].mxu0  ;;  %5024 = vmatprep.subr.bf16.mxu1 %v6570_v16  ;;  %v6579_v54 = vld [vmem:[%s7253_s24 + $0x194] ss:$8 sps:$4 sm:$0xff]  }
 0xfcb   : > { %v3885_v48 = vmul.f32 %v8229_v50, %v8229_v50  ;;  %v3887_v24 = vmul.f32 %v8232_v25, %v8232_v25  ;;  %v8259_v63 = vadd.f32 %v3705_v60, %v8122_v62  ;;  %v8262_v57 = vadd.f32 %v3758_v23, %v8125_v10  ;;  %v3707_v49 = vpop.f32.mrb[43].mxu1  ;;  %v3760_v41 = vpop.f32.mrb[67].mxu0 }
 0xfcc   : > { %v3886_v47 = vmul.f32 %v8242_v18, %v8242_v18  ;;  %v3888_v36 = vmul.f32 %v8245_v51, %v8245_v51  ;;  %v8269_v31 = vadd.f32 %v3707_v49, %v8128_v2  ;;  %v8272_v58 = vadd.f32 %v3760_v41, %v8131_v11 }
 0xfcd   : > { %v3917_v62 = vmul.f32 %v3885_v48, %v8229_v50  ;;  %v3919_v10 = vmul.f32 %v3887_v24, %v8232_v25  ;;  %v3893_v34 = vmul.f32 %v8259_v63, %v8259_v63  ;;  %v3895_v12 = vmul.f32 %v8262_v57, %v8262_v57  ;;  %5025 = vmatpush1.bf16.msra.mxu1 %v6568_v8 }
 0xfce   : > { %v3918_v1 = vmul.f32 %v3886_v47, %v8242_v18  ;;  %v3920_v2 = vmul.f32 %v3888_v36, %v8245_v51  ;;  %v3894_v11 = vmul.f32 %v8269_v31, %v8269_v31  ;;  %v3896_v7 = vmul.f32 %v8272_v58, %v8272_v58  ;;  %5026 = vmatprep.subr.bf16.mxu1 %v6573_v52 }
 0xfcf   : > { %v3949_v20 = vmul.f32 0.044715, %v3917_v62  ;;  %v3951_v27 = vmul.f32 0.044715, %v3919_v10  ;;  %v3925_v30 = vmul.f32 %v3893_v34, %v8259_v63  ;;  %v3927_v32 = vmul.f32 %v3895_v12, %v8262_v57 }
 0xfd0   : > { %v3950_v16 = vmul.f32 0.044715, %v3918_v1  ;;  %v3952_v45 = vmul.f32 0.044715, %v3920_v2  ;;  %v3926_v38 = vmul.f32 %v3894_v11, %v8269_v31  ;;  %v3928_v40 = vmul.f32 %v3896_v7, %v8272_v58  ;;  %v3797_v35 = vpop.f32.mrb[44].mxu1  ;;  %v3850_v26 = vpop.f32.mrb[68].mxu0 }
 0xfd1   : > { %v3981_v8 = vadd.f32 %v3949_v20, %v8229_v50  ;;  %v3983_v60 = vadd.f32 %v3951_v27, %v8232_v25  ;;  %v3957_v23 = vmul.f32 0.044715, %v3925_v30  ;;  %v3959_v52 = vmul.f32 0.044715, %v3927_v32  ;;  %5027 = vmatpush1.bf16.msra.mxu1 %v6571_v4  ;;  %v3799_v48 = vpop.f32.mrb[45].mxu1  ;;  %v3852_v24 = vpop.f32.mrb[69].mxu0 }
 0xfd2   : > { %v3982_v49 = vadd.f32 %v3950_v16, %v8242_v18  ;;  %v3984_v41 = vadd.f32 %v3952_v45, %v8245_v51  ;;  %v3958_v47 = vmul.f32 0.044715, %v3926_v38  ;;  %v3960_v36 = vmul.f32 0.044715, %v3928_v40  ;;  %v3801_v62 = vpop.f32.mrb[46].mxu1  ;;  %v3854_v10 = vpop.f32.mrb[70].mxu0  ;;  %5028 = vmatprep.subr.bf16.mxu1 %v6576_v13 }
 0xfd3   : > { %v4013_v34 = vmul.f32 0.7978846, %v3981_v8  ;;  %v4015_v12 = vmul.f32 0.7978846, %v3983_v60  ;;  %v3989_v1 = vadd.f32 %v3957_v23, %v8259_v63  ;;  %v3991_v2 = vadd.f32 %v3959_v52, %v8262_v57  ;;  %v3803_v11 = vpop.f32.mrb[47].mxu1  ;;  %v3856_v4 = vpop.f32.mrb[71].mxu0 }
 0xfd4   : > { %v4014_v7 = vmul.f32 0.7978846, %v3982_v49  ;;  %v4016_v20 = vmul.f32 0.7978846, %v3984_v41  ;;  %v3990_v27 = vadd.f32 %v3958_v47, %v8269_v31  ;;  %v3992_v30 = vadd.f32 %v3960_v36, %v8272_v58  ;;  %v6577_v45 = vld [vmem:[%s7253_s24 + $0x190] ss:$8 sps:$4 sm:$0xff]  }
 0xfd5   : > { %6790 = vtanh.f32 %v4013_v34  ;;  %v4021_v32 = vmul.f32 0.7978846, %v3989_v1  ;;  %v4023_v16 = vmul.f32 0.7978846, %v3991_v2  ;;  %v8303_v13 = vadd.f32 %v3797_v35, %v8236_v9  ;;  %5029 = vmatpush1.bf16.msra.mxu1 %v6574_v37  ;;  %v6582_v60 = vld [vmem:[%s7253_s24 + $0x1a4] ss:$8 sps:$4 sm:$0xff]  }
 0xfd6   : > { %6792 = vtanh.f32 %v4015_v12  ;;  %v4022_v38 = vmul.f32 0.7978846, %v3990_v27  ;;  %v4024_v40 = vmul.f32 0.7978846, %v3992_v30  ;;  %v8307_v8 = vadd.f32 %v3850_v26, %v8239_v6  ;;  %5030 = vmatprep.subr.bf16.mxu1 %v6579_v54 }
 0xfd7   : > { %6794 = vtanh.f32 %v4014_v7  ;;  %v3873_v23 = vmul.f32 %v8303_v13, %v8303_v13  ;;  %v8313_v52 = vadd.f32 %v3799_v48, %v8249_v61  ;;  %v8316_v35 = vadd.f32 %v3852_v24, %v8252_v44 }
 0xfd8   : > { %6796 = vtanh.f32 %v4016_v20  ;;  %v3875_v37 = vmul.f32 %v8307_v8, %v8307_v8  ;;  %v8321_v26 = vadd.f32 %v3801_v62, %v8236_v9  ;;  %v8324_v54 = vadd.f32 %v3854_v10, %v8239_v6  ;;  %v8326_v49 = vpop.f32.mrb[48].mxu1  ;;  %v8328_v41 = vpop.f32.mrb[72].mxu0  ;;  %v6580_v10 = vld [vmem:[%s7253_s24 + $0x1a0] ss:$8 sps:$4 sm:$0xff]   ;;  %v6585_v20 = vld [vmem:[%s7253_s24 + $0x1b4] ss:$8 sps:$4 sm:$0xff]  }
 0xfd9   : > { %6798 = vtanh.f32 %v4021_v32  ;;  %v3905_v48 = vmul.f32 %v3873_v23, %v8303_v13  ;;  %v3874_v24 = vmul.f32 %v8313_v52, %v8313_v52  ;;  %v3876_v47 = vmul.f32 %v8316_v35, %v8316_v35  ;;  %5031 = vmatpush1.bf16.msra.mxu1 %v6577_v45  ;;  %v8335_v36 = vpop.f32.mrb[49].mxu1  ;;  %v8337_v62 = vpop.f32.mrb[73].mxu0 }
 0xfda   : > { %6800 = vtanh.f32 %v4023_v16  ;;  %v3907_v34 = vmul.f32 %v3875_v37, %v8307_v8  ;;  %v3881_v12 = vmul.f32 %v8321_v26, %v8321_v26  ;;  %v3883_v1 = vmul.f32 %v8324_v54, %v8324_v54  ;;  %v8345_v2 = vpop.f32.mrb[50].mxu1  ;;  %v8347_v7 = vpop.f32.mrb[74].mxu0  ;;  %5032 = vmatprep.subr.bf16.mxu1 %v6582_v60 }
 0xfdb   : > { %6802 = vtanh.f32 %v4022_v38  ;;  %v3937_v27 = vmul.f32 0.044715, %v3905_v48  ;;  %v3906_v30 = vmul.f32 %v3874_v24, %v8313_v52  ;;  %v3908_v32 = vmul.f32 %v3876_v47, %v8316_v35  ;;  %v8352_v16 = vpop.f32.mrb[51].mxu1  ;;  %v8354_v45 = vpop.f32.mrb[75].mxu0  ;;  %v6583_v24 = vld [vmem:[%s7253_s24 + $0x1b0] ss:$8 sps:$4 sm:$0xff]  }
 0xfdc   : > { %6804 = vtanh.f32 %v4024_v40  ;;  %v3939_v23 = vmul.f32 0.044715, %v3907_v34  ;;  %v3913_v37 = vmul.f32 %v3881_v12, %v8321_v26  ;;  %v3915_v56 = vmul.f32 %v3883_v1, %v8324_v54  ;;  %v6588_v34 = vld [vmem:[%s7253_s24 + $0x1c4] ss:$8 sps:$4 sm:$0xff]  }
 0xfdd   : > { %v3969_v60 = vadd.f32 %v3937_v27, %v8303_v13  ;;  %v3938_v46 = vmul.f32 0.044715, %v3906_v30  ;;  %v3940_v38 = vmul.f32 0.044715, %v3908_v32  ;;  %v8360_v48 = vadd.f32 %v3803_v11, %v8249_v61  ;;  %5033 = vmatpush1.bf16.msra.mxu1 %v6580_v10 }
 0xfde   : > { %v3971_v47 = vadd.f32 %v3939_v23, %v8307_v8  ;;  %v3945_v53 = vmul.f32 0.044715, %v3913_v37  ;;  %v3947_v19 = vmul.f32 0.044715, %v3915_v56  ;;  %v8365_v40 = vadd.f32 %v3856_v4, %v8252_v44  ;;  %5034 = vmatprep.subr.bf16.mxu1 %v6585_v20 }
 0xfdf   : > { %v8368_v12 = vpop.eup %6790  ;;  %v4001_v1 = vmul.f32 0.7978846, %v3969_v60  ;;  %v3970_v27 = vadd.f32 %v3938_v46, %v8313_v52  ;;  %v3972_v11 = vadd.f32 %v3940_v38, %v8316_v35  ;;  %v3882_v10 = vmul.f32 %v8360_v48, %v8360_v48  ;;  %v6586_v38 = vld [vmem:[%s7253_s24 + $0x1c0] ss:$8 sps:$4 sm:$0xff]  }
 0xfe0   : > { %v8374_v30 = vpop.eup %6792  ;;  %v4003_v32 = vmul.f32 0.7978846, %v3971_v47  ;;  %v3977_v56 = vadd.f32 %v3945_v53, %v8321_v26  ;;  %v3979_v4 = vadd.f32 %v3947_v19, %v8324_v54  ;;  %v3884_v20 = vmul.f32 %v8365_v40, %v8365_v40  ;;  %v6591_v19 = vld [vmem:[%s7253_s24 + $0x1d4] ss:$8 sps:$4 sm:$0xff]  }
 0xfe1   : > { %v8380_v23 = vpop.eup %6794  ;;  %6806 = vtanh.f32 %v4001_v1  ;;  %v4002_v46 = vmul.f32 0.7978846, %v3970_v27  ;;  %v4004_v37 = vmul.f32 0.7978846, %v3972_v11  ;;  %v3914_v60 = vmul.f32 %v3882_v10, %v8360_v48  ;;  %5035 = vmatpush1.bf16.msra.mxu1 %v6583_v24 }
 0xfe2   : > { %v8384_v5 = vpop.eup %6796  ;;  %6808 = vtanh.f32 %v4003_v32  ;;  %v4009_v47 = vmul.f32 0.7978846, %v3977_v56  ;;  %v4011_v53 = vmul.f32 0.7978846, %v3979_v4  ;;  %v3916_v28 = vmul.f32 %v3884_v20, %v8365_v40  ;;  %5036 = vmatprep.subr.bf16.mxu1 %v6588_v34  ;;  %v6589_v4 = vld [vmem:[%s7253_s24 + $0x1d0] ss:$8 sps:$4 sm:$0xff]  }
 0xfe3   : > { %v8388_v29 = vpop.eup %6798  ;;  %6810 = vtanh.f32 %v4002_v46  ;;  %v3946_v1 = vmul.f32 0.044715, %v3914_v60  ;;  %v8392_v27 = vadd.f32 %v8326_v49, %v8236_v9  ;;  %v8396_v24 = vadd.f32 %v8328_v41, %v8239_v6 }
 0xfe4   : > { %v8398_v11 = vpop.eup %6800  ;;  %6812 = vtanh.f32 %v4004_v37  ;;  %v3948_v10 = vmul.f32 0.044715, %v3916_v28  ;;  %v8402_v34 = vadd.f32 %v8335_v36, %v8249_v61  ;;  %v8406_v32 = vadd.f32 %v8337_v62, %v8252_v44  ;;  %v6594_v37 = vld [vmem:[%s7253_s24 + $0x1e4] ss:$8 sps:$4 sm:$0xff]  }
 0xfe5   : > { %v8408_v56 = vpop.eup %6802  ;;  %6814 = vtanh.f32 %v4009_v47  ;;  %v3978_v49 = vadd.f32 %v3946_v1, %v8360_v48  ;;  %v3889_v41 = vmul.f32 %v8392_v27, %v8392_v27  ;;  %v3891_v28 = vmul.f32 %v8396_v24, %v8396_v24  ;;  %5037 = vmatpush1.bf16.msra.mxu1 %v6586_v38 }
 0xfe6   : > { %v8416_v20 = vpop.eup %6804  ;;  %6816 = vtanh.f32 %v4011_v53  ;;  %v3980_v36 = vadd.f32 %v3948_v10, %v8365_v40  ;;  %v3890_v62 = vmul.f32 %v8402_v34, %v8402_v34  ;;  %v3892_v46 = vmul.f32 %v8406_v32, %v8406_v32  ;;  %5038 = vmatprep.subr.bf16.mxu1 %v6591_v19 }
 0xfe7   : > { %v4010_v60 = vmul.f32 0.7978846, %v3978_v49  ;;  %v3921_v47 = vmul.f32 %v3889_v41, %v8392_v27  ;;  %v3923_v38 = vmul.f32 %v3891_v28, %v8396_v24  ;;  %v8428_v1 = vadd.f32 %v8345_v2, %v8236_v9  ;;  %v6592_v28 = vld [vmem:[%s7253_s24 + $0x1e0] ss:$8 sps:$4 sm:$0xff]  }
 0xfe8   : > { %v4012_v53 = vmul.f32 0.7978846, %v3980_v36  ;;  %v3922_v10 = vmul.f32 %v3890_v62, %v8402_v34  ;;  %v3924_v22 = vmul.f32 %v3892_v46, %v8406_v32  ;;  %v8434_v42 = vadd.f32 %v8347_v7, %v8239_v6  ;;  %v6597_v62 = vld [vmem:[%s7253_s24 + $0x1f4] ss:$8 sps:$4 sm:$0xff]  }
 0xfe9   : > { %6818 = vtanh.f32 %v4010_v60  ;;  %v3953_v19 = vmul.f32 0.044715, %v3921_v47  ;;  %v3955_v49 = vmul.f32 0.044715, %v3923_v38  ;;  %v3897_v41 = vmul.f32 %v8428_v1, %v8428_v1  ;;  %5039 = vmatpush1.bf16.msra.mxu1 %v6589_v4 }
 0xfea   : > { %6820 = vtanh.f32 %v4012_v53  ;;  %v3954_v9 = vmul.f32 0.044715, %v3922_v10  ;;  %v3956_v2 = vmul.f32 0.044715, %v3924_v22  ;;  %v3899_v36 = vmul.f32 %v8434_v42, %v8434_v42  ;;  %5040 = vmatprep.subr.bf16.mxu1 %v6594_v37  ;;  %v6595_v10 = vld [vmem:[%s7253_s24 + $0x1f0] ss:$8 sps:$4 sm:$0xff]  }
 0xfeb   : > { %v6807_v6 = vpop.eup %6806  ;;  %v3985_v7 = vadd.f32 %v3953_v19, %v8392_v27  ;;  %v3987_v46 = vadd.f32 %v3955_v49, %v8396_v24  ;;  %v3929_v60 = vmul.f32 %v3897_v41, %v8428_v1  ;;  %v8447_v4 = vadd.f32 %v8352_v16, %v8249_v61 }
 0xfec   : > { %v6809_v47 = vpop.eup %6808  ;;  %v4065_v38 = vadd.f32 1.0, %v6807_v6  ;;  %v3986_v22 = vadd.f32 %v3954_v9, %v8402_v34  ;;  %v3988_v53 = vadd.f32 %v3956_v2, %v8406_v32  ;;  %v3931_v37 = vmul.f32 %v3899_v36, %v8434_v42 }
 0xfed   : > { %v8454_v33 = vpop.eup %6810  ;;  %v4067_v19 = vadd.f32 1.0, %v6809_v47  ;;  %v4017_v49 = vmul.f32 0.7978846, %v3985_v7  ;;  %v4019_v17 = vmul.f32 0.7978846, %v3987_v46  ;;  %v3898_v41 = vmul.f32 %v8447_v4, %v8447_v4  ;;  %5041 = vmatpush1.bf16.msra.mxu1 %v6592_v28 }
 0xfee   : > { %v8458_v61 = vpop.eup %6812  ;;  %v4097_v16 = vmul.f32 0.5, %v4065_v38  ;;  %v4018_v6 = vmul.f32 0.7978846, %v3986_v22  ;;  %v4020_v9 = vmul.f32 0.7978846, %v3988_v53  ;;  %v8462_v2 = vadd.f32 %v8354_v45, %v8252_v44  ;;  %5042 = vmatprep.subr.bf16.mxu1 %v6597_v62 }
 0xfef   : > { %v6815_v36 = vpop.eup %6814  ;;  %v4099_v14 = vmul.f32 0.5, %v4067_v19  ;;  %6822 = vtanh.f32 %v4017_v49  ;;  %v3961_v47 = vmul.f32 0.044715, %v3929_v60  ;;  %v3963_v7 = vmul.f32 0.044715, %v3931_v37 }
 0xff0   : > { %v6817_v46 = vpop.eup %6816  ;;  %v8465_v43 = vmul.f32 %v4097_v16, %v8303_v13  ;;  %v4073_v28 = vadd.f32 1.0, %v6815_v36  ;;  %6824 = vtanh.f32 %v4019_v17  ;;  %v3930_v38 = vmul.f32 %v3898_v41, %v8447_v4 }
 0xff1   : > { %v8469_v22 = vmul.f32 %v4099_v14, %v8307_v8  ;;  %v4075_v53 = vadd.f32 1.0, %v6817_v46  ;;  %6826 = vtanh.f32 %v4018_v6  ;;  %v3993_v44 = vadd.f32 %v3961_v47, %v8428_v1  ;;  %5043 = vmatpush1.bf16.msra.mxu1 %v6595_v10 }
 0xff2   : > { %v4105_v45 = vmul.f32 0.5, %v4073_v28  ;;  %6828 = vtanh.f32 %v4020_v9  ;;  %v3995_v62 = vadd.f32 %v3963_v7, %v8434_v42  ;;  %v3962_v60 = vmul.f32 0.044715, %v3930_v38  ;;  %5065 = vmatprep.subr.bf16.mxu1 %v6600_v15 }
 0xff3   : > { %v6819_v13 = vpop.eup %6818  ;;  %v4107_v37 = vmul.f32 0.5, %v4075_v53  ;;  %v4025_v19 = vmul.f32 0.7978846, %v3993_v44  ;;  %v3900_v17 = vmul.f32 %v8462_v2, %v8462_v2  ;;  %v4078_v14 = vadd.f32 1.0, %v8380_v23 }
 0xff4   : > { %v6821_v8 = vpop.eup %6820  ;;  %v8477_v49 = vmul.f32 %v4105_v45, %v8321_v26  ;;  %v4027_v41 = vmul.f32 0.7978846, %v3995_v62  ;;  %v3994_v10 = vadd.f32 %v3962_v60, %v8447_v4  ;;  %v4086_v16 = vadd.f32 1.0, %v8408_v56 }
 0xff5   : > { %v8482_v6 = vmul.f32 %v4107_v37, %v8324_v54  ;;  %6830 = vtanh.f32 %v4025_v19  ;;  %v3932_v15 = vmul.f32 %v3900_v17, %v8462_v2  ;;  %v4110_v9 = vmul.f32 0.5, %v4078_v14 }
 0xff6   : > { %v4161_v36 = vpack.c.bf16 %v8477_v49, %v8465_v43  ;;  %6832 = vtanh.f32 %v4027_v41  ;;  %v4026_v23 = vmul.f32 0.7978846, %v3994_v10  ;;  %v4118_v47 = vmul.f32 0.5, %v4086_v16  ;;  %v6655_v43 = vld [vmem:[%s7253_s24 + $0x330] ss:$8 sps:$4 sm:$0xff]  }
 0xff7   : > { %v4163_v26 = vpack.c.bf16 %v8482_v6, %v8469_v22  ;;  %v3964_v7 = vmul.f32 0.044715, %v3932_v15  ;;  %v4142_v46 = vmul.f32 %v4110_v9, %v8242_v18  ;;  %v4077_v56 = vadd.f32 1.0, %v8368_v12  ;;  %v6660_v49 = vld [vmem:[%s7253_s24 + $0x344] ss:$8 sps:$4 sm:$0xff]  }
 0xff8   : > { %6834 = vtanh.f32 %v4026_v23  ;;  %v4150_v54 = vmul.f32 %v4118_v47, %v8269_v31  ;;  %v4085_v28 = vadd.f32 1.0, %v8388_v29  ;;  %v4080_v38 = vadd.f32 1.0, %v8384_v5 }
 0xff9   : > { %v6823_v53 = vpop.eup %6822  ;;  %v3996_v44 = vadd.f32 %v3964_v7, %v8462_v2  ;;  %v4109_v45 = vmul.f32 0.5, %v4077_v56  ;;  %v4088_v62 = vadd.f32 1.0, %v8416_v20  ;;  %v4079_v60 = vadd.f32 1.0, %v8374_v30 }
 0xffa   : > { %v6825_v37 = vpop.eup %6824  ;;  %v4166_v19 = vpack.c.bf16 %v4150_v54, %v4142_v46  ;;  %v4117_v18 = vmul.f32 0.5, %v4085_v28  ;;  %v4112_v17 = vmul.f32 0.5, %v4080_v38  ;;  %v4087_v12 = vadd.f32 1.0, %v8398_v11 }
 0xffb   : > { %v6827_v14 = vpop.eup %6826  ;;  %v4028_v31 = vmul.f32 0.7978846, %v3996_v44  ;;  %v4141_v29 = vmul.f32 %v4109_v45, %v8229_v50  ;;  %v4120_v41 = vmul.f32 0.5, %v4088_v62  ;;  %v4111_v5 = vmul.f32 0.5, %v4079_v60 }
 0xffc   : > { %v6829_v10 = vpop.eup %6828  ;;  %5001 = vmatprep.mubr.bf16.mxu1 %v4166_v19  ;;  %v4149_v16 = vmul.f32 %v4117_v18, %v8259_v63  ;;  %v4144_v20 = vmul.f32 %v4112_v17, %v8245_v51  ;;  %v4119_v15 = vmul.f32 0.5, %v4087_v12  ;;  %v4066_v30 = vadd.f32 1.0, %v8454_v33 }
 0xffd   : > { %6836 = vtanh.f32 %v4028_v31  ;;  %v4152_v9 = vmul.f32 %v4120_v41, %v8272_v58  ;;  %v8504_v11 = vmul.f32 %v4111_v5, %v8232_v25  ;;  %v4074_v23 = vadd.f32 1.0, %v6819_v13  ;;  %v6603_v41 = vld [vmem:[%s7253_s24 + $0x214] ss:$8 sps:$4 sm:$0xff]  }
 0xffe   : > { %v4165_v47 = vpack.c.bf16 %v4149_v16, %v4141_v29  ;;  %v4151_v50 = vmul.f32 %v4119_v15, %v8262_v57  ;;  %v4098_v7 = vmul.f32 0.5, %v4066_v30  ;;  %v4082_v46 = vadd.f32 1.0, %v6827_v14 }
 0xfff   : > { %v6831_v56 = vpop.eup %6830  ;;  %v4168_v54 = vpack.c.bf16 %v4152_v9, %v4144_v20  ;;  %v4106_v63 = vmul.f32 0.5, %v4074_v23  ;;  %v4081_v28 = vadd.f32 1.0, %v6823_v53  ;;  %v4068_v51 = vadd.f32 1.0, %v8458_v61  ;;  %v6604_v23 = vld [vmem:[%s7253_s24 + $0x220] ss:$8 sps:$4 sm:$0xff]  }
0x1000   : > { %v6833_v38 = vpop.eup %6832  ;;  %5002 = vmatmul.mubr.bf16.gmra.mrb[56].mxu1 %v4165_v47  ;;  %v4167_v33 = vpack.c.bf16 %v4151_v50, %v8504_v11  ;;  %v4130_v58 = vmul.f32 %v4098_v7, %v8313_v52  ;;  %v4089_v25 = vadd.f32 1.0, %v6831_v56  ;;  %v8823_v13 = vpack.c.bf16 %v8205_v39, %v8202_v59  ;;  %v6609_v47 = vld [vmem:[%s7253_s24 + $0x234] ss:$8 sps:$4 sm:$0xff]   ;;  %v6612_v7 = vld [vmem:[%s7253_s24 + $0x244] ss:$8 sps:$4 sm:$0xff]  }
0x1001   : > { %v4138_v57 = vmul.f32 %v4106_v63, %v8360_v48  ;;  %v4113_v44 = vmul.f32 0.5, %v4081_v28  ;;  %v4076_v45 = vadd.f32 1.0, %v6821_v8  ;;  %v4100_v62 = vmul.f32 0.5, %v4068_v51  ;;  %v6598_v48 = vld [vmem:[%s7253_s24 + $0x200] ss:$8 sps:$4 sm:$0xff]  }
0x1002   : > { %5044 = vmatprep.mubr.bf16.mxu1 %v8823_v13  ;;  %v6835_v53 = vpop.eup %6834  ;;  %v4121_v61 = vmul.f32 0.5, %v4089_v25  ;;  %v4083_v60 = vadd.f32 1.0, %v6825_v37  ;;  %v4114_v17 = vmul.f32 0.5, %v4082_v46  ;;  %v4084_v39 = vadd.f32 1.0, %v6829_v10  ;;  %v6615_v46 = vld [vmem:[%s7253_s24 + $0x254] ss:$8 sps:$4 sm:$0xff]  }
0x1003   : > { %v4162_v19 = vpack.c.bf16 %v4138_v57, %v4130_v58  ;;  %v4090_v18 = vadd.f32 1.0, %v6835_v53  ;;  %v4108_v12 = vmul.f32 0.5, %v4076_v45  ;;  %v8515_v52 = vmul.f32 %v4113_v44, %v8392_v27  ;;  %v6613_v56 = vld [vmem:[%s7253_s24 + $0x250] ss:$8 sps:$4 sm:$0xff]   ;;  %v6616_v63 = vld [vmem:[%s7253_s24 + $0x260] ss:$8 sps:$4 sm:$0xff]  }
0x1004   : > { %v8518_v59 = vmul.f32 %v4121_v61, %v8428_v1  ;;  %v4091_v14 = vadd.f32 1.0, %v6833_v38  ;;  %v8522_v8 = vmul.f32 %v4100_v62, %v8316_v35  ;;  %v4115_v37 = vmul.f32 0.5, %v4083_v60  ;;  %v6621_v28 = vld [vmem:[%s7253_s24 + $0x274] ss:$8 sps:$4 sm:$0xff]   ;;  %v6619_v51 = vld [vmem:[%s7253_s24 + $0x270] ss:$8 sps:$4 sm:$0xff]  }
0x1005   : > { %v4122_v31 = vmul.f32 0.5, %v4090_v18  ;;  %v8525_v29 = vmul.f32 %v4108_v12, %v8365_v40  ;;  %v8531_v10 = vmul.f32 %v4114_v17, %v8402_v34  ;;  %v8824_v40 = vpack.c.bf16 %v8195_v55, %v8192_v3  ;;  %v6606_v3 = vld [vmem:[%s7253_s24 + $0x224] ss:$8 sps:$4 sm:$0xff]   ;;  %v6627_v58 = vld [vmem:[%s7253_s24 + $0x294] ss:$8 sps:$4 sm:$0xff]  }
0x1006   : > { %v4169_v27 = vpack.c.bf16 %v8518_v59, %v8515_v52  ;;  %v4123_v5 = vmul.f32 0.5, %v4091_v14  ;;  %v4116_v15 = vmul.f32 0.5, %v4084_v39  ;;  %v8542_v30 = vmul.f32 %v4115_v37, %v8396_v24  ;;  %v6624_v38 = vld [vmem:[%s7253_s24 + $0x284] ss:$8 sps:$4 sm:$0xff]   ;;  %v6625_v25 = vld [vmem:[%s7253_s24 + $0x290] ss:$8 sps:$4 sm:$0xff]  }
0x1007   : > { %v6837_v1 = vpop.eup %6836  ;;  %v8534_v16 = vmul.f32 %v4122_v31, %v8447_v4  ;;  %v4164_v35 = vpack.c.bf16 %v8525_v29, %v8522_v8  ;;  %v6601_v4 = vld [vmem:[%s7253_s24 + $0x210] ss:$8 sps:$4 sm:$0xff]   ;;  %v6630_v13 = vld [vmem:[%s7253_s24 + $0x2a4] ss:$8 sps:$4 sm:$0xff]   ;;  %v6628_v57 = vld [vmem:[%s7253_s24 + $0x2a0] ss:$8 sps:$4 sm:$0xff]  }
0x1008   : > { %5045 = vmatmul.mubr.bf16.vlgmr.msra.gmra.mrb[52].mxu1 %v8824_v40  ;;  %v4092_v20 = vadd.f32 1.0, %v6837_v1  ;;  %v8545_v34 = vmul.f32 %v4123_v5, %v8434_v42  ;;  %v8554_v24 = vmul.f32 %v4116_v15, %v8406_v32  ;;  %v6607_v32 = vld [vmem:[%s7253_s24 + $0x230] ss:$8 sps:$4 sm:$0xff]   ;;  %v6633_v44 = vld [vmem:[%s7253_s24 + $0x2b4] ss:$8 sps:$4 sm:$0xff]  }
0x1009   : > { %5066 = vmatpush1.bf16.msra.mxu1 %v6598_v48  ;;  %5054 = vmatprep.mubr.bf16.mxu1 %v4168_v54  ;;  %v4170_v9 = vpack.c.bf16 %v8534_v16, %v8531_v10  ;;  %v6618_v54 = vld [vmem:[%s7253_s24 + $0x264] ss:$8 sps:$4 sm:$0xff]   ;;  %v6631_v45 = vld [vmem:[%s7253_s24 + $0x2b0] ss:$8 sps:$4 sm:$0xff]   ;;  %v6634_v53 = vld [vmem:[%s7253_s24 + $0x2c0] ss:$8 sps:$4 sm:$0xff]  }
0x100a   : > { %5067 = vmatprep.subr.bf16.mxu1 %v6603_v41  ;;  %v4124_v55 = vmul.f32 0.5, %v4092_v20  ;;  %v4171_v11 = vpack.c.bf16 %v8545_v34, %v8542_v30  ;;  %v6636_v62 = vld [vmem:[%s7253_s24 + $0x2c4] ss:$8 sps:$4 sm:$0xff]   ;;  %v6639_v61 = vld [vmem:[%s7253_s24 + $0x2d4] ss:$8 sps:$4 sm:$0xff]  }
0x100b   : > { %v6637_v60 = vld [vmem:[%s7253_s24 + $0x2d0] ss:$8 sps:$4 sm:$0xff]   ;;  %v6640_v18 = vld [vmem:[%s7253_s24 + $0x2e0] ss:$8 sps:$4 sm:$0xff]   ;;  %v6645_v17 = vld [vmem:[%s7253_s24 + $0x2f4] ss:$8 sps:$4 sm:$0xff]  }
0x100c   : > { %v8557_v42 = vmul.f32 %v4124_v55, %v8462_v2  ;;  %v6610_v2 = vld [vmem:[%s7253_s24 + $0x240] ss:$8 sps:$4 sm:$0xff]   ;;  %v6643_v12 = vld [vmem:[%s7253_s24 + $0x2f0] ss:$8 sps:$4 sm:$0xff]   ;;  %v6648_v39 = vld [vmem:[%s7253_s24 + $0x304] ss:$8 sps:$4 sm:$0xff]  }
0x100d   : > { %5068 = vmatpush1.bf16.msra.mxu1 %v6601_v4  ;;  %v6646_v14 = vld [vmem:[%s7253_s24 + $0x300] ss:$8 sps:$4 sm:$0xff]   ;;  %v6651_v48 = vld [vmem:[%s7253_s24 + $0x314] ss:$8 sps:$4 sm:$0xff]   ;;  %v6649_v31 = vld [vmem:[%s7253_s24 + $0x310] ss:$8 sps:$4 sm:$0xff]  }
0x100e   : > { %5069 = vmatprep.subr.bf16.mxu1 %v6606_v3  ;;  %v4172_v50 = vpack.c.bf16 %v8557_v42, %v8554_v24  ;;  %v6654_v37 = vld [vmem:[%s7253_s24 + $0x324] ss:$8 sps:$4 sm:$0xff]   ;;  %v6652_v41 = vld [vmem:[%s7253_s24 + $0x320] ss:$8 sps:$4 sm:$0xff]   ;;  %v6657_v5 = vld [vmem:[%s7253_s24 + $0x334] ss:$8 sps:$4 sm:$0xff]  }
0x100f   : > { %v6663_v1 = vld [vmem:[%s7253_s24 + $0x354] ss:$8 sps:$4 sm:$0xff]   ;;  %v6661_v52 = vld [vmem:[%s7253_s24 + $0x350] ss:$8 sps:$4 sm:$0xff]   ;;  %v6666_v59 = vld [vmem:[%s7253_s24 + $0x364] ss:$8 sps:$4 sm:$0xff]  }
0x1010   : > { %5055 = vmatmul.mubr.bf16.gmra.mrb[56].mxu1 %v4167_v33  ;;  %v6622_v33 = vld [vmem:[%s7253_s24 + $0x280] ss:$8 sps:$4 sm:$0xff]   ;;  %v6669_v29 = vld [vmem:[%s7253_s24 + $0x374] ss:$8 sps:$4 sm:$0xff]   ;;  %v6672_v10 = vld [vmem:[%s7253_s24 + $0x384] ss:$8 sps:$4 sm:$0xff]  }
0x1011   : > { %5070 = vmatpush1.bf16.msra.mxu1 %v6604_v23  ;;  %5097 = vmatprep.mubr.bf16.mxu1 %v4162_v19  ;;  %v6642_v19 = vld [vmem:[%s7253_s24 + $0x2e4] ss:$8 sps:$4 sm:$0xff]   ;;  %v6664_v8 = vld [vmem:[%s7253_s24 + $0x360] ss:$8 sps:$4 sm:$0xff]   ;;  %v6673_v40 = vld [vmem:[%s7253_s24 + $0x390] ss:$8 sps:$4 sm:$0xff]  }
0x1012   : > { %5071 = vmatprep.subr.bf16.mxu1 %v6609_v47  ;;  %v6670_v16 = vld [vmem:[%s7253_s24 + $0x380] ss:$8 sps:$4 sm:$0xff]   ;;  %v6678_v20 = vld [vmem:[%s7253_s24 + $0x3a4] ss:$8 sps:$4 sm:$0xff]   ;;  %v6681_v4 = vld [vmem:[%s7253_s24 + $0x3b4] ss:$8 sps:$4 sm:$0xff]  }
0x1013   : > { %v6676_v15 = vld [vmem:[%s7253_s24 + $0x3a0] ss:$8 sps:$4 sm:$0xff]   ;;  %v6684_v3 = vld [vmem:[%s7253_s24 + $0x3c4] ss:$8 sps:$4 sm:$0xff]   ;;  %v6687_v23 = vld [vmem:[%s7253_s24 + $0x3d4] ss:$8 sps:$4 sm:$0xff]  }
0x1014   : > { %v6682_v55 = vld [vmem:[%s7253_s24 + $0x3c0] ss:$8 sps:$4 sm:$0xff]   ;;  %v6685_v47 = vld [vmem:[%s7253_s24 + $0x3d0] ss:$8 sps:$4 sm:$0xff]  }
0x1015   : > { %5072 = vmatpush1.bf16.msra.mxu1 %v6607_v32  ;;  %v6690_v32 = vld [vmem:[%s7253_s24 + $0x3e4] ss:$8 sps:$4 sm:$0xff]  }
0x1016   : > { %5073 = vmatprep.subr.bf16.mxu1 %v6612_v7  ;;  %v6688_v7 = vld [vmem:[%s7253_s24 + $0x3e0] ss:$8 sps:$4 sm:$0xff]  }
0x1017   : > { %v8825_v30 = vld [vmem:[#allocation16_spill] sm:$0xff] }
0x1019   : > { %5074 = vmatpush1.bf16.msra.mxu1 %v6610_v2  ;;  %v6693_v2 = vld [vmem:[%s7253_s24 + $0x3f4] ss:$8 sps:$4 sm:$0xff]  }
0x101a   : > { %5075 = vmatprep.subr.bf16.mxu1 %v6615_v46  ;;  %v6691_v46 = vld [vmem:[%s7253_s24 + $0x3f0] ss:$8 sps:$4 sm:$0xff]  }
0x101d   : > { %5076 = vmatpush1.bf16.msra.mxu1 %v6613_v56  ;;  %v4303_v56 = vsub.s32 3, %v7361_v21 }
0x101e   : > { %5077 = vmatprep.subr.bf16.mxu1 %v6618_v54  ;;  %v4307_v54 = vsub.s32 7, %v7361_v21 }
0x1021   : > { %5078 = vmatpush1.bf16.msra.mxu1 %v6616_v63  ;;  %v6850_v63 = vld [vmem:[%s7251_s17] sm:$0xff] }
0x1022   : > { %5079 = vmatprep.subr.bf16.mxu1 %v6621_v28  ;;  %v4304_v28 = vrot.slane %v6850_v63, %v4303_v56 }
0x1025   : > { %5080 = vmatpush1.bf16.msra.mxu1 %v6619_v51  ;;  %v4308_v51 = vrot.slane %v6850_v63, %v4307_v54 }
0x1026   : > { %5081 = vmatprep.subr.bf16.mxu1 %v6624_v38  ;;  %v4314_v38 = vrot.slane %v4304_v28, %v4303_v56 }
0x1029   : > { %5082 = vmatpush1.bf16.msra.mxu1 %v6622_v33  ;;  %v4318_v33 = vrot.slane %v4308_v51, %v4303_v56 }
0x102a   : > { %5083 = vmatprep.subr.bf16.mxu1 %v6627_v58 }
0x102d   : > { %5084 = vmatpush1.bf16.msra.mxu1 %v6625_v25 }
0x102e   : > { %5085 = vmatprep.subr.bf16.mxu1 %v6630_v13  ;;  %v8826_v13 = vld [vmem:[#allocation17_spill] sm:$0xff] }
0x1031   : > { %5086 = vmatpush1.bf16.msra.mxu1 %v6628_v57  ;;  %v8827_v57 = vld [vmem:[#allocation18_spill] sm:$0xff] }
0x1032   : > { %5087 = vmatprep.subr.bf16.mxu1 %v6633_v44 }
0x1035   : > { %5088 = vmatpush1.bf16.msra.mxu1 %v6631_v45 }
0x1036   : > { %5089 = vmatprep.subr.bf16.mxu1 %v6636_v62 }
0x1039   : > { %5090 = vmatpush1.bf16.msra.mxu1 %v6634_v53 }
0x103a   : > { %5091 = vmatprep.subr.bf16.mxu1 %v6639_v61 }
0x103d   : > { %5092 = vmatpush1.bf16.msra.mxu1 %v6637_v60 }
0x103e   : > { %5093 = vmatprep.subr.bf16.mxu1 %v6642_v19  ;;  %v8828_v19 = vld [vmem:[#allocation19_spill] sm:$0xff] }
0x1041   : > { %5094 = vmatpush1.bf16.msra.mxu1 %v6640_v18 }
0x1042   : > { %5095 = vmatprep.subr.bf16.mxu1 %v6645_v17 }
0x1045   : > { %5096 = vmatpush1.bf16.msra.mxu1 %v6643_v12  ;;  %v8829_v12 = vld [vmem:[#allocation20_spill] sm:$0xff] }
0x1046   : > { %5118 = vmatprep.subr.bf16.mxu1 %v6648_v39 }
0x1048   : > { %5098 = vmatmul.mubr.bf16.vlgmr.msra.gmra.mrb[52].mxu1 %v4161_v36  ;;  %v6658_v36 = vld [vmem:[%s7253_s24 + $0x340] ss:$8 sps:$4 sm:$0xff]  }
0x1049   : > { %5107 = vmatprep.mubr.bf16.mxu1 %v4170_v9  ;;  %5119 = vmatpush1.bf16.msra.mxu1 %v6646_v14  ;;  %v6679_v9 = vld [vmem:[%s7253_s24 + $0x3b0] ss:$8 sps:$4 sm:$0xff]  }
0x104a   : > { %5120 = vmatprep.subr.bf16.mxu1 %v6651_v48  ;;  %v8830_v48 = vld [vmem:[#allocation21_spill] sm:$0xff] }
0x104d   : > { %5121 = vmatpush1.bf16.msra.mxu1 %v6649_v31 }
0x104e   : > { %5122 = vmatprep.subr.bf16.mxu1 %v6654_v37  ;;  %v8831_v37 = vld [vmem:[#allocation22_spill] sm:$0xff] }
0x1050   : > { %5108 = vmatmul.mubr.bf16.gmra.mrb[56].mxu1 %v4169_v27  ;;  %v6667_v27 = vld [vmem:[%s7253_s24 + $0x370] ss:$8 sps:$4 sm:$0xff]  }
0x1051   : > { %5123 = vmatpush1.bf16.msra.mxu1 %v6652_v41  ;;  %5150 = vmatprep.mubr.bf16.mxu1 %v4164_v35  ;;  %v6675_v35 = vld [vmem:[%s7253_s24 + $0x394] ss:$8 sps:$4 sm:$0xff]  }
0x1052   : > { %5124 = vmatprep.subr.bf16.mxu1 %v6657_v5 }
0x1055   : > { %5125 = vmatpush1.bf16.msra.mxu1 %v6655_v43 }
0x1056   : > { %5126 = vmatprep.subr.bf16.mxu1 %v6660_v49 }
0x1059   : > { %5127 = vmatpush1.bf16.msra.mxu1 %v6658_v36 }
0x105a   : > { %5128 = vmatprep.subr.bf16.mxu1 %v6663_v1  ;;  %v6851_v1 = vld [vmem:[%s8785_s7 + $0x40] sm:$0xff] (!%p6022_p7)  }
0x105b   : > { %6077 = vmatprep.subr.bf16.mxu0 (!%p6022_p7), %v6851_v1 }
0x105d   : > { %5129 = vmatpush1.bf16.msra.mxu1 %v6661_v52  ;;  %v6852_v52 = vld [vmem:[%s8785_s7] sm:$0xff] (!%p6022_p7)  }
0x105e   : > { %5130 = vmatprep.subr.bf16.mxu1 %v6666_v59  ;;  %6078 = vmatpush3.bf16.msra.mxu0 (!%p6022_p7), %v6852_v52 }
0x1061   : > { %5131 = vmatpush1.bf16.msra.mxu1 %v6664_v8 }
0x1062   : > { %5132 = vmatprep.subr.bf16.mxu1 %v6669_v29 }
0x1065   : > { %5133 = vmatpush1.bf16.msra.mxu1 %v6667_v27 }
0x1066   : > { %5134 = vmatprep.subr.bf16.mxu1 %v6672_v10 }
0x1069   : > { %5135 = vmatpush1.bf16.msra.mxu1 %v6670_v16 }
0x106a   : > { %5136 = vmatprep.subr.bf16.mxu1 %v6675_v35 }
0x106d   : > { %5137 = vmatpush1.bf16.msra.mxu1 %v6673_v40 }
0x106e   : > { %5138 = vmatprep.subr.bf16.mxu1 %v6678_v20 }
0x1071   : > { %5139 = vmatpush1.bf16.msra.mxu1 %v6676_v15 }
0x1072   : > { %5140 = vmatprep.subr.bf16.mxu1 %v6681_v4 }
0x1075   : > { %5141 = vmatpush1.bf16.msra.mxu1 %v6679_v9 }
0x1076   : > { %5142 = vmatprep.subr.bf16.mxu1 %v6684_v3 }
0x1079   : > { %5143 = vmatpush1.bf16.msra.mxu1 %v6682_v55 }
0x107a   : > { %5144 = vmatprep.subr.bf16.mxu1 %v6687_v23 }
0x107d   : > { %5145 = vmatpush1.bf16.msra.mxu1 %v6685_v47 }
0x107e   : > { %5146 = vmatprep.subr.bf16.mxu1 %v6690_v32 }
0x1081   : > { %5147 = vmatpush1.bf16.msra.mxu1 %v6688_v7 }
0x1082   : > { %5148 = vmatprep.subr.bf16.mxu1 %v6693_v2 }
0x1085   : > { %5149 = vmatpush1.bf16.msra.mxu1 %v6691_v46 }
0x1086   : > { %6233 = vmatprep.subr.bf16.mxu1 (!%p6022_p7), %v6851_v1 }
0x1088   : > { %5151 = vmatmul.mubr.bf16.vlgmr.msra.gmra.mrb[52].mxu1 %v4163_v26 }
0x1089   : > { %5160 = vmatprep.mubr.bf16.mxu1 %v4172_v50  ;;  %6241 = vmatpush3.bf16.msra.mxu1 (!%p6022_p7), %v6852_v52  ;;  %v8835_v52 = vld [vmem:[#allocation14_spill] sm:$0xff] (!%p6022_p7) }
0x1090   : > { %5161 = vmatmul.mubr.bf16.gmra.mrb[56].mxu1 %v4171_v11 }
0x115b   : > { %v5152_v58 = vpop.f32.mrb[52].mxu1 }
0x115c   : > { %v6201_v22 = vadd.f32 %v5152_v58, %v4314_v38  ;;  %v5154_v6 = vpop.f32.mrb[53].mxu1 }
0x115d   : > { %v6202_v26 = vadd.f32 %v5154_v6, %v4318_v33  ;;  %v5156_v25 = vpop.f32.mrb[54].mxu1  ;;  %v6854_v6 = vld [vmem:[%s8785_s7 + $0x8] sm:$0xff] (!%p6022_p7)  }
0x115e   : > { %v5171_v24 = vadd.f32 %v6201_v22, %v7803_v0  ;;  %v6203_v42 = vadd.f32 %v5156_v25, %v4314_v38  ;;  %v5158_v50 = vpop.f32.mrb[55].mxu1  ;;  %v6853_v22 = vld [vmem:[%s8785_s7 + $0x48] sm:$0xff] (!%p6022_p7)   ;;  %v6856_v25 = vld [vmem:[%s8785_s7 + $0x10] sm:$0xff] (!%p6022_p7)  }
0x115f   : > { %v5172_v34 = vadd.f32 %v6202_v26, %v8825_v30  ;;  %v6204_v11 = vadd.f32 %v5158_v50, %v4318_v33  ;;  %6079 = vmatprep.subr.bf16.mxu0 (!%p6022_p7), %v6853_v22  ;;  %6234 = vmatprep.subr.bf16.mxu1 (!%p6022_p7), %v6853_v22  ;;  %v6855_v26 = vld [vmem:[%s8785_s7 + $0x50] sm:$0xff] (!%p6022_p7)   ;;  %v6859_v50 = vld [vmem:[%s8785_s7 + $0x60] sm:$0xff] (!%p6022_p7)  }
0x1160   : > { %5179 = vst [vmem:[#allocation2] sm:$0xff] %v5171_v24  ;;  %v5173_v21 = vadd.f32 %v6203_v42, %v8826_v13  ;;  %6080 = vmatpush3.bf16.msra.mxu0 (!%p6022_p7), %v6854_v6  ;;  %6242 = vmatpush3.bf16.msra.mxu1 (!%p6022_p7), %v6854_v6  ;;  %v6858_v42 = vld [vmem:[%s8785_s7 + $0x18] sm:$0xff] (!%p6022_p7)   ;;  %v6860_v30 = vld [vmem:[%s8785_s7 + $0x20] sm:$0xff] (!%p6022_p7)   ;;  %v6863_v13 = vld [vmem:[%s8785_s7 + $0x70] sm:$0xff] (!%p6022_p7)  }
0x1161   : > { %5180 = vst [vmem:[#allocation2 + $0x8] sm:$0xff] %v5172_v34  ;;  %v5174_v44 = vadd.f32 %v6204_v11, %v8827_v57  ;;  %v5192_v5 = vadd.f32 (!%p6022_p7), %v5172_v34, %v5171_v24  ;;  %6081 = vmatprep.subr.bf16.mxu0 (!%p6022_p7), %v6855_v26  ;;  %6235 = vmatprep.subr.bf16.mxu1 (!%p6022_p7), %v6855_v26  ;;  %v6862_v11 = vld [vmem:[%s8785_s7 + $0x28] sm:$0xff] (!%p6022_p7)   ;;  %v6865_v57 = vld [vmem:[%s8785_s7 + $0x78] sm:$0xff] (!%p6022_p7)  }
0x1162   : > { %5181 = vst [vmem:[#allocation2 + $0x10] sm:$0xff] %v5173_v21 }
0x1163   : > { %5182 = vst [vmem:[#allocation2 + $0x18] sm:$0xff] %v5174_v44  ;;  %v5162_v45 = vpop.f32.mrb[56].mxu1  ;;  %5193 = vadd.xlane.f32.xlu0 (!%p6022_p7), %v5192_v5  ;;  %v5195_v49 = vadd.f32 (!%p6022_p7), %v5174_v44, %v5173_v21 }
0x1164   : > { %v6205_v62 = vadd.f32 %v5162_v45, %v4314_v38  ;;  %v5164_v53 = vpop.f32.mrb[57].mxu1  ;;  %6082 = vmatpush3.bf16.msra.mxu0 (!%p6022_p7), %v6856_v25  ;;  %6243 = vmatpush3.bf16.msra.mxu1 (!%p6022_p7), %v6856_v25 }
0x1165   : > { %v6206_v61 = vadd.f32 %v5164_v53, %v4318_v33  ;;  %v5166_v60 = vpop.f32.mrb[58].mxu1  ;;  %5190 = sbr.rel (%p6022_p7) target bundleno = 4999 (0x1387), region = 72 }
0x1166   : > { %v5175_v0 = vadd.f32 %v6205_v62, %v8828_v19  ;;  %v6207_v18 = vadd.f32 %v5166_v60, %v4314_v38  ;;  %v5168_v17 = vpop.f32.mrb[59].mxu1 }
0x1167   : > { %v5176_v39 = vadd.f32 %v6206_v61, %v8829_v12  ;;  %v6208_v14 = vadd.f32 %v5168_v17, %v4318_v33  ;;  %5196 = vadd.xlane.f32.xlu0 (!%p6022_p7), %v5195_v49  ;;  %v8834_v49 = vld [vmem:[#allocation15_spill] sm:$0xff] (!%p6022_p7) }
0x1168   : > { %5183 = vst [vmem:[#allocation2 + $0x20] sm:$0xff] %v5175_v0  ;;  %v5177_v31 = vadd.f32 %v6207_v18, %v8830_v48 }
0x1169   : > { %5184 = vst [vmem:[#allocation2 + $0x28] sm:$0xff] %v5176_v39  ;;  %v5178_v41 = vadd.f32 %v6208_v14, %v8831_v37  ;;  %v5198_v43 = vadd.f32 (!%p6022_p7), %v5176_v39, %v5175_v0 }
0x116a   : > { %5185 = vst [vmem:[#allocation2 + $0x30] sm:$0xff] %v5177_v31 }
0x116b   : > { %5186 = vst [vmem:[#allocation2 + $0x38] sm:$0xff] %v5178_v41  ;;  %5199 = vadd.xlane.f32.xlu1 (!%p6022_p7), %v5198_v43  ;;  %v5201_v36 = vadd.f32 (!%p6022_p7), %v5178_v41, %v5177_v31 }
0x116f   : > { %5202 = vadd.xlane.f32.xlu1 %v5201_v36 }
0x11f0   : > { %v5194_v59 = vpop.xlane.xlu0 %5193 }
0x11f1   : > { %v5204_v29 = vmul.f32 0.00390625, %v5194_v59 }
0x11f3   : > { %v8659_v10 = vsub.f32 %v5171_v24, %v5204_v29  ;;  %v8661_v16 = vsub.f32 %v5172_v34, %v5204_v29  ;;  %v6857_v24 = vld [vmem:[%s8785_s7 + $0x58] sm:$0xff]   ;;  %v6861_v34 = vld [vmem:[%s8785_s7 + $0x68] sm:$0xff]  }
0x11f4   : > { %v5197_v20 = vpop.xlane.xlu0 %5196  ;;  %6083 = vmatprep.subr.bf16.mxu0 %v6857_v24  ;;  %6236 = vmatprep.subr.bf16.mxu1 %v6857_v24 }
0x11f5   : > { %v5205_v4 = vmul.f32 0.00390625, %v5197_v20  ;;  %v5216_v3 = vmul.f32 %v8659_v10, %v8659_v10  ;;  %v5217_v55 = vmul.f32 %v8661_v16, %v8661_v16  ;;  %6084 = vmatpush3.bf16.msra.mxu0 %v6858_v42  ;;  %6244 = vmatpush3.bf16.msra.mxu1 %v6858_v42 }
0x11f6   : > { %6085 = vmatprep.subr.bf16.mxu0 %v6859_v50  ;;  %6237 = vmatprep.subr.bf16.mxu1 %v6859_v50 }
0x11f7   : > { %v8675_v32 = vsub.f32 %v5173_v21, %v5205_v4  ;;  %v8677_v7 = vsub.f32 %v5174_v44, %v5205_v4  ;;  %v5224_v56 = vadd.f32 %v5217_v55, %v5216_v3  ;;  %v6864_v21 = vld [vmem:[%s8785_s7 + $0x30] sm:$0xff]   ;;  %v6866_v44 = vld [vmem:[%s8785_s7 + $0x38] sm:$0xff]  }
0x11f8   : > { %v5200_v8 = vpop.xlane.xlu1 %5199 }
0x11f9   : > { %v5206_v27 = vmul.f32 0.00390625, %v5200_v8  ;;  %v5218_v54 = vmul.f32 %v8675_v32, %v8675_v32  ;;  %v5219_v63 = vmul.f32 %v8677_v7, %v8677_v7  ;;  %5225 = vadd.xlane.f32.xlu0 %v5224_v56  ;;  %6086 = vmatpush3.bf16.msra.mxu0 %v6860_v30 }
0x11fa   : > { %6245 = vmatpush3.bf16.msra.mxu1 %v6860_v30  ;;  %6087 = vmatprep.subr.bf16.mxu0 %v6861_v34 }
0x11fb   : > { %v8663_v35 = vsub.f32 %v5175_v0, %v5206_v27  ;;  %v8665_v40 = vsub.f32 %v5176_v39, %v5206_v27  ;;  %v5227_v33 = vadd.f32 %v5219_v63, %v5218_v54  ;;  %6238 = vmatprep.subr.bf16.mxu1 %v6861_v34  ;;  %v5191_v39 = vld [vmem:[%s8784_s6] sm:$0xff] }
0x11fc   : > { %v5203_v15 = vpop.xlane.xlu1 %5202  ;;  %v5290_v36 = vrot.slane %v5191_v39, %v8834_v49  ;;  %v5286_v59 = vrot.slane %v5191_v39, %v8835_v52 }
0x11fd   : > { %v5207_v9 = vmul.f32 0.00390625, %v5203_v15  ;;  %v5220_v23 = vmul.f32 %v8663_v35, %v8663_v35  ;;  %v5221_v47 = vmul.f32 %v8665_v40, %v8665_v40  ;;  %5228 = vadd.xlane.f32.xlu1 %v5227_v33  ;;  %6088 = vmatpush3.bf16.msra.mxu0 %v6862_v11 }
0x11fe   : > { %6246 = vmatpush3.bf16.msra.mxu1 %v6862_v11  ;;  %6089 = vmatprep.subr.bf16.mxu0 %v6863_v13  ;;  %v5300_v4 = vrot.slane %v5290_v36, %v8835_v52  ;;  %v5296_v3 = vrot.slane %v5286_v59, %v8835_v52 }
0x11ff   : > { %v8679_v2 = vsub.f32 %v5177_v31, %v5207_v9  ;;  %v8681_v46 = vsub.f32 %v5178_v41, %v5207_v9  ;;  %v5230_v38 = vadd.f32 %v5221_v47, %v5220_v23  ;;  %6239 = vmatprep.subr.bf16.mxu1 %v6863_v13  ;;  %v8832_v31 = vld [vmem:[#allocation13_spill] sm:$0xff]  ;;  %v8833_v41 = vld [vmem:[#allocation12_spill] sm:$0xff]  ;;  %v8836_v13 = vld [vmem:[#allocation23_spill] sm:$0xff] }
0x1200   : > { %v5264_v37 = vrot.slane %v5191_v39, %v8832_v31  ;;  %v5260_v5 = vrot.slane %v5191_v39, %v8833_v41 }
0x1201   : > { %v5222_v28 = vmul.f32 %v8679_v2, %v8679_v2  ;;  %v5223_v51 = vmul.f32 %v8681_v46, %v8681_v46  ;;  %5231 = vadd.xlane.f32.xlu0 %v5230_v38  ;;  %6090 = vmatpush3.bf16.msra.mxu0 %v6864_v21 }
0x1202   : > { %6247 = vmatpush3.bf16.msra.mxu1 %v6864_v21  ;;  %6091 = vmatprep.subr.bf16.mxu0 %v6865_v57  ;;  %v5274_v43 = vrot.slane %v5264_v37, %v8833_v41  ;;  %v5270_v1 = vrot.slane %v5260_v5, %v8833_v41  ;;  %v5348_v21 = vrot.slane %v5191_v39, %v8836_v13 }
0x1203   : > { %v5233_v58 = vadd.f32 %v5223_v51, %v5222_v28  ;;  %6240 = vmatprep.subr.bf16.mxu1 %v6865_v57 }
0x1205   : > { %5234 = vadd.xlane.f32.xlu1 %v5233_v58  ;;  %6092 = vmatpush3.bf16.msra.mxu0 %v6866_v44 }
0x1206   : > { %6248 = vmatpush3.bf16.msra.mxu1 %v6866_v44 }
0x1286   : > { %v5226_v45 = vpop.xlane.xlu0 %5225 }
0x1287   : > { %v5236_v62 = vmul.f32 0.00390625, %v5226_v45 }
0x1289   : > { %v5240_v53 = vadd.f32 1e-05, %v5236_v62 }
0x128a   : > { %v5229_v61 = vpop.xlane.xlu1 %5228 }
0x128b   : > { %v5237_v60 = vmul.f32 0.00390625, %v5229_v61  ;;  %6867 = vrsqrt.f32 %v5240_v53 }
0x128d   : > { %v5241_v18 = vadd.f32 1e-05, %v5237_v60 }
0x128e   : > { %v5232_v19 = vpop.xlane.xlu0 %5231 }
0x128f   : > { %v5238_v0 = vmul.f32 0.00390625, %v5232_v19  ;;  %6869 = vrsqrt.f32 %v5241_v18 }
0x1291   : > { %v5242_v17 = vadd.f32 1e-05, %v5238_v0 }
0x1292   : > { %v5235_v12 = vpop.xlane.xlu1 %5234 }
0x1293   : > { %v5239_v14 = vmul.f32 0.00390625, %v5235_v12  ;;  %6871 = vrsqrt.f32 %v5242_v17 }
0x1295   : > { %v5243_v48 = vadd.f32 1e-05, %v5239_v14  ;;  %v6868_v8 = vpop.eup %6867 }
0x1296   : > { %v5249_v29 = vmul.f32 %v6868_v8, %v8661_v16  ;;  %v5248_v27 = vmul.f32 %v6868_v8, %v8659_v10 }
0x1297   : > { %6873 = vrsqrt.f32 %v5243_v48 }
0x1298   : > { %v5276_v15 = vmul.f32 %v5274_v43, %v5249_v29  ;;  %v5275_v9 = vmul.f32 %v5270_v1, %v5248_v27 }
0x1299   : > { %v6870_v20 = vpop.eup %6869 }
0x129a   : > { %v5251_v23 = vmul.f32 %v6870_v20, %v8677_v7  ;;  %v5250_v47 = vmul.f32 %v6870_v20, %v8675_v32  ;;  %v5302_v10 = vadd.f32 %v5300_v4, %v5276_v15  ;;  %v5301_v51 = vadd.f32 %v5296_v3, %v5275_v9 }
0x129c   : > { %v5278_v63 = vmul.f32 %v5274_v43, %v5251_v23  ;;  %v5277_v16 = vmul.f32 %v5270_v1, %v5250_v47 }
0x129d   : > { %v6872_v55 = vpop.eup %6871 }
0x129e   : > { %v5253_v56 = vmul.f32 %v6872_v55, %v8665_v40  ;;  %v5252_v54 = vmul.f32 %v6872_v55, %v8663_v35  ;;  %v5304_v58 = vadd.f32 %v5300_v4, %v5278_v63  ;;  %v5303_v22 = vadd.f32 %v5296_v3, %v5277_v16 }
0x12a0   : > { %v5280_v38 = vmul.f32 %v5274_v43, %v5253_v56  ;;  %v5279_v33 = vmul.f32 %v5270_v1, %v5252_v54  ;;  %v5310_v7 = vpack.c.bf16 %v5304_v58, %v5302_v10  ;;  %v5309_v25 = vpack.c.bf16 %v5303_v22, %v5301_v51 }
0x12a1   : > { %v6874_v28 = vpop.eup %6873 }
0x12a2   : > { %v5255_v6 = vmul.f32 %v6874_v28, %v8681_v46  ;;  %v5254_v26 = vmul.f32 %v6874_v28, %v8679_v2  ;;  %5477 = vmatprep.mubr.bf16.mxu0 %v5310_v7  ;;  %v5306_v40 = vadd.f32 %v5300_v4, %v5280_v38  ;;  %v5305_v42 = vadd.f32 %v5296_v3, %v5279_v33 }
0x12a3   : > { %5478 = vmatmul.mubr.bf16.vlgmr.msra.gmra.mrb[0].mxu0 %v5309_v25 }
0x12a4   : > { %v5282_v32 = vmul.f32 %v5274_v43, %v5255_v6  ;;  %v5281_v24 = vmul.f32 %v5270_v1, %v5254_v26 }
0x12a6   : > { %v5308_v35 = vadd.f32 %v5300_v4, %v5282_v32  ;;  %v5307_v50 = vadd.f32 %v5296_v3, %v5281_v24 }
0x12a8   : > { %v5312_v30 = vpack.c.bf16 %v5308_v35, %v5306_v40  ;;  %v5311_v34 = vpack.c.bf16 %v5307_v50, %v5305_v42 }
0x12aa   : > { %5485 = vmatprep.mubr.bf16.mxu1 %v5312_v30 }
0x12ab   : > { %5486 = vmatmul.mubr.bf16.vlgmr.msra.gmra.mrb[0].mxu1 %v5311_v34 }
0x1376   : > { %v6093_v11 = vpop.f32.mrb[0].mxu0 }
0x1377   : > { %v6094_v46 = vpop.f32.mrb[1].mxu0 }
0x1378   : > { %v6095_v57 = vadd.f32 %v6094_v46, %v6093_v11  ;;  %v6096_v2 = vpop.f32.mrb[2].mxu0 }
0x1379   : > { %v6097_v44 = vpop.f32.mrb[3].mxu0 }
0x137a   : > { %v5480_v45 = vadd.f32 %v6095_v57, %v5348_v21  ;;  %v6098_v62 = vadd.f32 %v6097_v44, %v6096_v2 }
0x137c   : > { %5494 = vst [vmem:[%s8786_s8] sm:$0xff] %v5480_v45  ;;  %v5483_v60 = vadd.f32 %v6098_v62, %v5348_v21 }
0x137e   : > { %v6099_v53 = vpop.f32.mrb[0].mxu1  ;;  %5495 = vst [vmem:[%s8786_s8 + $0x8] sm:$0xff] %v5483_v60 }
0x137f   : > { %v6100_v61 = vpop.f32.mrb[1].mxu1 }
0x1380   : > { %v6101_v19 = vadd.f32 %v6100_v61, %v6099_v53  ;;  %v6102_v0 = vpop.f32.mrb[2].mxu1 }
0x1381   : > { %v6103_v18 = vpop.f32.mrb[3].mxu1 }
0x1382   : > { %v5488_v17 = vadd.f32 %v6101_v19, %v5348_v21  ;;  %v6104_v12 = vadd.f32 %v6103_v18, %v6102_v0 }
0x1384   : > { %5496 = vst [vmem:[%s8786_s8 + $0x10] sm:$0xff] %v5488_v17  ;;  %v5491_v39 = vadd.f32 %v6104_v12, %v5348_v21 }
0x1386   : > { %5497 = vst [vmem:[%s8786_s8 + $0x18] sm:$0xff] %v5491_v39 }
0x1387 PF: > { %s8837_s17 = sld [smem:[#allocation11_spill]]  ;;  %p21_p12 = scmp.ge.s32.totalorder %s7084_s10, 4  }
0x1388   : > { %s8838_s27 = smov %s6995_s28  ;;  %s8839_s28 = smov %s6999_s29 }
0x1389   : > { %s8841_s30 = smov %s7084_s10  ;;  %23 = sbr.rel (!%p21_p12) target bundleno = 7 (0x7), region = 126 }
0x138d   : > { %s8840_s29 = smov %s8837_s17 }
0x1390   :  { %5509 = vsyncpa [#allocation5], 1 }
0x1391   :  { %5511 = vsyncpa [#allocation5 + $0x1], 1 }
0x1392   :  { %5512 = vsyncpa [#allocation7], 1 }
0x1393   :  { %5514 = vsyncpa [#allocation7 + $0x1], 1 }

</bundles_post_ra>
